<compile_context>
chip_gen: v5e
topology: v5e:2x2
jax: 0.10.0
libtpu: 0.0.40
codegen_flags: <defaults>
</compile_context>

<pallas_src>
import collections
import functools

import jax
import jax.numpy as jnp
from jax.experimental import pallas as pl
from jax.experimental.pallas import tpu as pltpu

# ----------------------------- model configuration -----------------------------
ALPHA = -0.5
BETA = -0.5
POLY_DEGREE = 2

# Small demo shapes (PyTorch reference uses batch=32, num_points=2048, SCALE=5.0).
BATCH = 2
NUM_POINTS = 256
INPUT_CHANNELS = 3
NUM_OBJECTS = 16
OUTPUT_CHANNELS = 50
SCALE = 0.25
C128 = int(128 * SCALE)      # jacobikan4 / jacobikan9 output width
C1024 = int(1024 * SCALE)    # jacobikan5 output width
BN_EPS = 1e-5

# Tiling policy (see header).  Caps chosen so every layer at full scale
# (K <= 1280, N <= 1024) gets a single K tile and a single N tile.
TK_CAP = 1536
TN_CAP = 1024
TM_DEFAULT = 2048
MIN_PALLAS_CIN = 16          # below this, padding waste >90% -> use plain XLA


def _round_up(x, m):
    return (x + m - 1) // m * m


def _jacobi_recurrence_coeffs(i, a, b):
    A = (2 * i + a + b - 1) * (2 * i + a + b) / (2 * i * (i + a + b))
    B = (2 * i + a + b - 1) * (a ** 2 - b ** 2) / (
        2 * i * (i + a + b) * (2 * i + a + b - 2))
    C = -2 * (i + a - 1) * (i + b - 1) * (2 * i + a + b) / (
        2 * i * (i + a + b) * (2 * i + a + b - 2))
    return A, B, C


def _jacobi_basis(t, degree, a, b):
    """List of Jacobi polynomials P_0..P_degree evaluated at t (VPU work)."""
    basis = [jnp.ones_like(t)]
    if degree > 0:
        basis.append(0.5 * (a - b) + 0.5 * (a + b + 2.0) * t)
    for i in range(2, degree + 1):
        A, B, C = _jacobi_recurrence_coeffs(i, a, b)
        basis.append((A * t + B) * basis[-1] + C * basis[-2])
    return basis


# --------------------------------- Pallas kernel --------------------------------
def _kan_kernel(t_ref, w_ref, o_ref, *, degree, a, b, tk, single_k):
    """One (tm, tn) output tile.

    t_ref:  (tm, tk) bf16             tanh(x) tile (tanh hoisted to the wrapper)
    w_ref:  ((degree+1)*tk, tn) bf16  degree-folded Jacobi coeff block (VMEM resident)
    o_ref:  (tm, tn) f32              output tile (k-invariant block -> accumulator)
    """
    t = t_ref[...].astype(jnp.float32)
    basis = _jacobi_basis(t, degree, a, b)

    # D+1 MXU dots against static row-slices of the resident weight block; f32
    # accumulation.  No concatenate / phi staging buffer needed.
    contrib = jnp.dot(basis[0].astype(jnp.bfloat16), w_ref[0:tk, :],
                      preferred_element_type=jnp.float32)
    for d in range(1, degree + 1):
        contrib += jnp.dot(basis[d].astype(jnp.bfloat16),
                           w_ref[d * tk:(d + 1) * tk, :],
                           preferred_element_type=jnp.float32)

    if single_k:
        o_ref[...] = contrib.astype(o_ref.dtype)
    else:
        @pl.when(pl.program_id(2) == 0)
        def _():
            o_ref[...] = contrib.astype(o_ref.dtype)

        @pl.when(pl.program_id(2) != 0)
        def _():
            o_ref[...] += contrib.astype(o_ref.dtype)


# --------------------------- weight preparation (one-time) -----------------------
KANMeta = collections.namedtuple(
    "KANMeta", ["c_in", "c_out", "kp", "np_", "tk", "tn", "degree", "use_pallas"])


@jax.tree_util.register_pytree_node_class
class PreparedKANLayer:
    """Either bf16 degree-folded padded weights (Pallas path) or raw f32 coeffs
    (tiny-K XLA path) + static tiling metadata."""

    def __init__(self, w, meta):
        self.w = w
        self.meta = meta

    def tree_flatten(self):
        return (self.w,), self.meta          # meta (namedtuple of ints/bool) is static

    @classmethod
    def tree_unflatten(cls, meta, children):
        return cls(children[0], meta)


def prepare_kan_layer(coeffs):
    """coeffs: (C_in, C_out, D+1) f32 (torch layout) -> PreparedKANLayer."""
    c_in, c_out, dp1 = coeffs.shape
    degree = dp1 - 1

    if c_in < MIN_PALLAS_CIN:
        # Tiny-K layer (jacobikan4, c_in=3): >95% of a 128-padded MXU tile would be
        # zero padding; plain XLA handles this GEMM better than a pallas_call.
        meta = KANMeta(c_in, c_out, c_in, c_out, c_in, c_out, degree, False)
        return PreparedKANLayer(jnp.asarray(coeffs, jnp.float32), meta)

    kf = _round_up(c_in, 128)
    nf = _round_up(c_out, 128)
    tk = kf if kf <= TK_CAP else 512      # full-K tile whenever it fits the cap
    tn = nf if nf <= TN_CAP else 512      # full-N tile whenever it fits the cap
    kp = _round_up(c_in, tk)
    np_ = _round_up(c_out, tn)

    # (C_in, C_out, D+1) -> (D+1, C_in, C_out); zero-pad so padded input channels
    # contribute nothing regardless of their (nonzero) Jacobi basis.
    w = jnp.transpose(jnp.asarray(coeffs, jnp.float32), (2, 0, 1))
    if (kp, np_) != (c_in, c_out):
        w = jnp.pad(w, ((0, 0), (0, kp - c_in), (0, np_ - c_out)))
    # Fold the degree axis into K, grouped per K-chunk of size tk, so each grid-k
    # step reads one contiguous ((D+1)*tk, tn) block laid out [P0 | P1 | ... | PD]
    # for that chunk, matching the per-degree slices inside the kernel.
    w = w.reshape(dp1, kp // tk, tk, np_).transpose(1, 0, 2, 3)
    w = w.reshape((kp // tk) * dp1 * tk, np_).astype(jnp.bfloat16)

    return PreparedKANLayer(w, KANMeta(c_in, c_out, kp, np_, tk, tn, degree, True))


# ------------------------------ VMEM / tile planning -----------------------------
@functools.lru_cache(maxsize=1)
def _vmem_capacity_bytes():
    try:
        return int(pltpu.get_tpu_info().vmem_capacity_bytes)
    except Exception:  # interpret mode / older runtimes
        return 128 * 1024 * 1024


def _layer_working_set_bytes(tm, tk, tn, degree):
    t_blk = 2 * tm * tk * 2                          # bf16 activations, dbl-buffered
    w_blk = 2 * (degree + 1) * tk * tn * 2           # bf16 weights
    o_blk = 2 * tm * tn * 4                          # f32 output
    temps = (degree + 2) * tm * tk * 4 + tm * tn * 4 # f32 t + basis + contrib
    return t_blk + w_blk + o_blk + temps


# ------------------------------- Pallas layer wrapper -----------------------------
def jacobi_kan_layer(x_mc, prep, *, a=ALPHA, b=BETA):
    """x_mc: (M, C_in) f32, prep: PreparedKANLayer -> (M, C_out) f32."""
    m = prep.meta
    if not m.use_pallas:
        return jacobi_kan_layer_ref(x_mc, prep.w, degree=m.degree, a=a, b=b)

    M, c_in = x_mc.shape
    assert c_in == m.c_in, (c_in, m.c_in)
    tk, tn, kp, np_, degree = m.tk, m.tn, m.kp, m.np_, m.degree

    # Generation-aware tm: largest tile whose per-step working set fits ~60% of
    # physical VMEM (64 MiB/TC on v7x, 128 MiB on v5e/v6e).
    physical = _vmem_capacity_bytes()
    budget = int(physical * 0.75)
    tm = TM_DEFAULT
    while tm > 256 and _layer_working_set_bytes(tm, tk, tn, degree) > int(budget * 0.8):
        tm //= 2

    mp8 = _round_up(M, 8)
    tm = min(tm, mp8)
    # Keep >= 2 M tiles so both v7x TensorCores get work on the "parallel" axis.
    if mp8 >= 512 and mp8 // tm < 2:
        tm = _round_up(-(-mp8 // 2), 8)
    mp = _round_up(M, tm)

    # tanh hoisted out of the kernel; bf16 activation stream halves DMA bytes and
    # the t double-buffer footprint (MXU operands are bf16 anyway).
    t = jnp.tanh(x_mc.astype(jnp.float32)).astype(jnp.bfloat16)
    if (mp, kp) != (M, c_in):
        t = jnp.pad(t, ((0, mp - M), (0, kp - c_in)))

    grid = (mp // tm, np_ // tn, kp // tk)
    single_k = grid[2] == 1
    kernel = functools.partial(_kan_kernel, degree=degree, a=a, b=b, tk=tk,
                               single_k=single_k)

    # Advisory cost estimate (matmul dominates; tanh runs outside the kernel).
    flops = 2 * mp * np_ * (degree + 1) * kp
    bytes_accessed = (mp * kp * 2 * grid[1]      # bf16 activations (re-read per N tile)
                      + prep.w.size * 2          # bf16 weights (resident across M)
                      + mp * np_ * 4)            # f32 output writeback
    working_set = _layer_working_set_bytes(tm, tk, tn, degree)
    vmem_limit = int(min(budget, max(32 * 1024 * 1024, 2 * working_set)))

    out = pl.pallas_call(
        kernel,
        out_shape=jax.ShapeDtypeStruct((mp, np_), jnp.float32),
        grid_spec=pltpu.PrefetchScalarGridSpec(
            num_scalar_prefetch=0,
            grid=grid,
            in_specs=[
                pl.BlockSpec((tm, tk), lambda i, j, k: (i, k)),
                pl.BlockSpec(((degree + 1) * tk, tn), lambda i, j, k: (k, j)),
            ],
            out_specs=pl.BlockSpec((tm, tn), lambda i, j, k: (i, j)),
        ),
        compiler_params=pltpu.CompilerParams(
            dimension_semantics=("parallel", "parallel", "arbitrary"),
            vmem_limit_bytes=vmem_limit),
        cost_estimate=pl.CostEstimate(flops=flops, transcendentals=0,
                                      bytes_accessed=bytes_accessed),
    )(t, prep.w)

    if (mp, np_) != (M, m.c_out):
        out = out[:M, :m.c_out]
    return out


# ------------------------------ plain-JAX reference ------------------------------
def jacobi_kan_layer_ref(x_mc, coeffs, *, degree=POLY_DEGREE, a=ALPHA, b=BETA):
    """coeffs in raw torch layout (C_in, C_out, D+1); full f32 reference."""
    t = jnp.tanh(x_mc.astype(jnp.float32))
    phi = jnp.stack(_jacobi_basis(t, degree, a, b), axis=-1)   # (M, C_in, D+1)
    return jnp.einsum('mid,iod->mo', phi, coeffs)


# ---------------------------------- full forward ---------------------------------
def _batchnorm_train(x_mc, gamma, beta, eps=BN_EPS):
    # BatchNorm1d in training mode: batch statistics over (batch, points) per channel.
    # TODO(synk): eval-mode (running statistics) would require the torch running
    # mean/var buffers; a freshly constructed module in train mode matches this.
    mean = jnp.mean(x_mc, axis=0, keepdims=True)
    var = jnp.mean(jnp.square(x_mc - mean), axis=0, keepdims=True)
    return (x_mc - mean) * jax.lax.rsqrt(var + eps) * gamma + beta


def pointnet_kan_forward(kan_weights, bn_params, x_bcn, class_label, *,
                         layer_fn=jacobi_kan_layer):
    B, _, N = x_bcn.shape
    x = jnp.transpose(x_bcn, (0, 2, 1)).reshape(B * N, -1)       # (M, C_in)

    x = layer_fn(x, kan_weights["jk4"])
    x = _batchnorm_train(x, bn_params["bn4_gamma"], bn_params["bn4_beta"])
    local_4 = x

    x = layer_fn(x, kan_weights["jk5"])
    x = _batchnorm_train(x, bn_params["bn5_gamma"], bn_params["bn5_beta"])

    # global max pool over points (F.max_pool1d(x, kernel_size=N)) then broadcast
    x_bnc = x.reshape(B, N, -1)
    global_feature = jnp.max(x_bnc, axis=1, keepdims=True)       # (B, 1, C1024)
    global_feature = jnp.broadcast_to(
        global_feature, (B, N, x_bnc.shape[-1])).reshape(B * N, -1)

    cls = class_label.reshape(B, 1, NUM_OBJECTS)
    cls = jnp.broadcast_to(cls, (B, N, NUM_OBJECTS)).reshape(B * N, NUM_OBJECTS)

    x = jnp.concatenate([local_4, global_feature, cls], axis=-1)
    x = layer_fn(x, kan_weights["jk9"])
    x = _batchnorm_train(x, bn_params["bn9_gamma"], bn_params["bn9_beta"])
    x = layer_fn(x, kan_weights["jk10"])                         # (M, OUTPUT_CHANNELS)

    return jnp.transpose(x.reshape(B, N, OUTPUT_CHANNELS), (0, 2, 1))   # (B, C, N)


# ---------------------------------- parameters ------------------------------------
def init_params(key):
    def init_coeffs(k, in_dim, out_dim, degree):
        std = 1.0 / (in_dim * (degree + 1))
        return std * jax.random.normal(k, (in_dim, out_dim, degree + 1), jnp.float32)

    k4, k5, k9, k10 = jax.random.split(key, 4)
    c9_in = C1024 + C128 + NUM_OBJECTS
    kan = {
        "jk4": init_coeffs(k4, INPUT_CHANNELS, C128, POLY_DEGREE),
        "jk5": init_coeffs(k5, C128, C1024, POLY_DEGREE),
        "jk9": init_coeffs(k9, c9_in, C128, POLY_DEGREE),
        "jk10": init_coeffs(k10, C128, OUTPUT_CHANNELS, POLY_DEGREE),
    }
    bn = {
        "bn4_gamma": jnp.ones((C128,), jnp.float32),
        "bn4_beta": jnp.zeros((C128,), jnp.float32),
        "bn5_gamma": jnp.ones((C1024,), jnp.float32),
        "bn5_beta": jnp.zeros((C1024,), jnp.float32),
        "bn9_gamma": jnp.ones((C128,), jnp.float32),
        "bn9_beta": jnp.zeros((C128,), jnp.float32),
    }
    return kan, bn


# ------------------------------------- main ----------------------------------------
if __name__ == "__main__":
    key = jax.random.PRNGKey(0)
    k_params, k_x, k_lbl = jax.random.split(key, 3)

    kan_raw, bn_params = init_params(k_params)
    # One-time weight prep: transpose + pad + degree-fold + bf16 cast (outside jit).
    kan_prepared = {name: prepare_kan_layer(c) for name, c in kan_raw.items()}

    x = jax.random.normal(k_x, (BATCH, INPUT_CHANNELS, NUM_POINTS), jnp.float32)
    labels = jax.random.randint(k_lbl, (BATCH,), 0, NUM_OBJECTS)
    class_label = jax.nn.one_hot(labels, NUM_OBJECTS, dtype=jnp.float32)  # (B, 16)

    fwd = jax.jit(functools.partial(pointnet_kan_forward, layer_fn=jacobi_kan_layer))
    out = fwd(kan_prepared, bn_params, x, class_label)
    out = jax.block_until_ready(out)

    assert out.shape == (BATCH, OUTPUT_CHANNELS, NUM_POINTS), out.shape
    assert bool(jnp.all(jnp.isfinite(out)))

    # sanity check against a pure-JAX f32 reference of the same forward pass
    ref = pointnet_kan_forward(kan_raw, bn_params, x, class_label,
                               layer_fn=jacobi_kan_layer_ref)
    ref = jax.block_until_ready(ref)
    max_err = float(jnp.max(jnp.abs(out - ref)))
    max_ref = float(jnp.max(jnp.abs(ref)))
    tol = 2e-2 + 3e-2 * max_ref   # bf16 MXU operands vs f32 reference
    assert max_err < tol, f"mismatch vs reference: {max_err} (tol {tol})"

    print("KERNEL_OK")
</pallas_src>

<mosaic_0001>
module attributes {stable_mosaic.version = 11 : i64} {
  func.func @_kan_kernel(%arg0: i32, %arg1: i32, %arg2: i32, %arg3: memref<256x128xbf16, #tpu.memory_space<vmem>>, %arg4: memref<384x256xbf16, #tpu.memory_space<vmem>>, %arg5: memref<256x256xf32, #tpu.memory_space<vmem>>) attributes {dimension_semantics = [#tpu.dimension_semantics<parallel>, #tpu.dimension_semantics<parallel>, #tpu.dimension_semantics<arbitrary>], iteration_bounds = array<i64: 2, 1, 1>, scalar_prefetch = 0 : i64, scratch_operands = 0 : i64, tpu.core_type = #tpu.core_type<tc>, window_params = [{transform_indices = @transform_0, window_bounds = array<i64: 256, 128>}, {transform_indices = @transform_1, window_bounds = array<i64: 384, 256>}, {transform_indices = @transform_2, window_bounds = array<i64: 256, 256>}]} {
    %c0 = arith.constant 0 : index
    %c0_0 = arith.constant 0 : index
    %0 = vector.load %arg3[%c0, %c0_0] : memref<256x128xbf16, #tpu.memory_space<vmem>>, vector<256x128xbf16>
    %1 = arith.extf %0 : vector<256x128xbf16> to vector<256x128xf32>
    %cst = arith.constant 1.000000e+00 : f32
    %2 = vector.broadcast %cst : f32 to vector<256x128xf32>
    %cst_1 = arith.constant 5.000000e-01 : f32
    %3 = vector.broadcast %cst_1 : f32 to vector<256x128xf32>
    %4 = arith.mulf %3, %1 : vector<256x128xf32>
    %cst_2 = arith.constant 0.000000e+00 : f32
    %5 = vector.broadcast %cst_2 : f32 to vector<256x128xf32>
    %6 = arith.addf %5, %4 : vector<256x128xf32>
    %cst_3 = arith.constant 1.500000e+00 : f32
    %7 = vector.broadcast %cst_3 : f32 to vector<256x128xf32>
    %8 = arith.mulf %7, %1 : vector<256x128xf32>
    %cst_4 = arith.constant 0.000000e+00 : f32
    %9 = vector.broadcast %cst_4 : f32 to vector<256x128xf32>
    %10 = arith.addf %8, %9 : vector<256x128xf32>
    %11 = arith.mulf %10, %6 : vector<256x128xf32>
    %cst_5 = arith.constant -3.750000e-01 : f32
    %12 = vector.broadcast %cst_5 : f32 to vector<256x128xf32>
    %13 = arith.mulf %12, %2 : vector<256x128xf32>
    %14 = arith.addf %11, %13 : vector<256x128xf32>
    %15 = arith.truncf %2 : vector<256x128xf32> to vector<256x128xbf16>
    %c0_6 = arith.constant 0 : index
    %c0_7 = arith.constant 0 : index
    %16 = vector.load %arg4[%c0_6, %c0_7] : memref<384x256xbf16, #tpu.memory_space<vmem>>, vector<128x256xbf16>
    %cst_8 = arith.constant dense<0.000000e+00> : vector<256x256xf32>
    %17 = tpu.matmul %15, %16, %cst_8 {dimension_numbers = #tpu.dot_dimension_numbers<[1], [0], [0], [1], [0, 0, 1, 1], [], []>} : vector<256x128xbf16>, vector<128x256xbf16>, vector<256x256xf32> -> vector<256x256xf32>
    %18 = arith.truncf %6 : vector<256x128xf32> to vector<256x128xbf16>
    %c128 = arith.constant 128 : index
    %c0_9 = arith.constant 0 : index
    %19 = vector.load %arg4[%c128, %c0_9] : memref<384x256xbf16, #tpu.memory_space<vmem>>, vector<128x256xbf16>
    %cst_10 = arith.constant dense<0.000000e+00> : vector<256x256xf32>
    %20 = tpu.matmul %18, %19, %cst_10 {dimension_numbers = #tpu.dot_dimension_numbers<[1], [0], [0], [1], [0, 0, 1, 1], [], []>} : vector<256x128xbf16>, vector<128x256xbf16>, vector<256x256xf32> -> vector<256x256xf32>
    %21 = arith.addf %17, %20 : vector<256x256xf32>
    %22 = arith.truncf %14 : vector<256x128xf32> to vector<256x128xbf16>
    %c256 = arith.constant 256 : index
    %c0_11 = arith.constant 0 : index
    %23 = vector.load %arg4[%c256, %c0_11] : memref<384x256xbf16, #tpu.memory_space<vmem>>, vector<128x256xbf16>
    %cst_12 = arith.constant dense<0.000000e+00> : vector<256x256xf32>
    %24 = tpu.matmul %22, %23, %cst_12 {dimension_numbers = #tpu.dot_dimension_numbers<[1], [0], [0], [1], [0, 0, 1, 1], [], []>} : vector<256x128xbf16>, vector<128x256xbf16>, vector<256x256xf32> -> vector<256x256xf32>
    %25 = arith.addf %21, %24 : vector<256x256xf32>
    %c0_13 = arith.constant 0 : index
    %c0_14 = arith.constant 0 : index
    %26 = vector.load %arg5[%c0_13, %c0_14] : memref<256x256xf32, #tpu.memory_space<vmem>>, vector<256x256xf32>
    tpu.vector_store %arg5[%c0_13, %c0_14], %25 {strides = array<i32>} : memref<256x256xf32, #tpu.memory_space<vmem>>, vector<256x256xf32>,
    return
  }
  func.func @transform_0(%arg0: i32, %arg1: i32, %arg2: i32) -> (i32, i32) {
    %c0_i32 = arith.constant 0 : i32
    return %arg0, %arg2 : i32, i32
  }
  func.func @transform_1(%arg0: i32, %arg1: i32, %arg2: i32) -> (i32, i32) {
    %c0_i32 = arith.constant 0 : i32
    return %arg2, %arg1 : i32, i32
  }
  func.func @transform_2(%arg0: i32, %arg1: i32, %arg2: i32) -> (i32, i32) {
    %c0_i32 = arith.constant 0 : i32
    return %arg0, %arg1 : i32, i32
  }
}

module attributes {stable_mosaic.version = 11 : i64} {
  func.func @_kan_kernel(%arg0: i32, %arg1: i32, %arg2: i32, %arg3: memref<256x384xbf16, #tpu.memory_space<vmem>>, %arg4: memref<1152x128xbf16, #tpu.memory_space<vmem>>, %arg5: memref<256x128xf32, #tpu.memory_space<vmem>>) attributes {dimension_semantics = [#tpu.dimension_semantics<parallel>, #tpu.dimension_semantics<parallel>, #tpu.dimension_semantics<arbitrary>], iteration_bounds = array<i64: 2, 1, 1>, scalar_prefetch = 0 : i64, scratch_operands = 0 : i64, tpu.core_type = #tpu.core_type<tc>, window_params = [{transform_indices = @transform_0, window_bounds = array<i64: 256, 384>}, {transform_indices = @transform_1, window_bounds = array<i64: 1152, 128>}, {transform_indices = @transform_2, window_bounds = array<i64: 256, 128>}]} {
    %c0 = arith.constant 0 : index
    %c0_0 = arith.constant 0 : index
    %0 = vector.load %arg3[%c0, %c0_0] : memref<256x384xbf16, #tpu.memory_space<vmem>>, vector<256x384xbf16>
    %1 = arith.extf %0 : vector<256x384xbf16> to vector<256x384xf32>
    %cst = arith.constant 1.000000e+00 : f32
    %2 = vector.broadcast %cst : f32 to vector<256x384xf32>
    %cst_1 = arith.constant 5.000000e-01 : f32
    %3 = vector.broadcast %cst_1 : f32 to vector<256x384xf32>
    %4 = arith.mulf %3, %1 : vector<256x384xf32>
    %cst_2 = arith.constant 0.000000e+00 : f32
    %5 = vector.broadcast %cst_2 : f32 to vector<256x384xf32>
    %6 = arith.addf %5, %4 : vector<256x384xf32>
    %cst_3 = arith.constant 1.500000e+00 : f32
    %7 = vector.broadcast %cst_3 : f32 to vector<256x384xf32>
    %8 = arith.mulf %7, %1 : vector<256x384xf32>
    %cst_4 = arith.constant 0.000000e+00 : f32
    %9 = vector.broadcast %cst_4 : f32 to vector<256x384xf32>
    %10 = arith.addf %8, %9 : vector<256x384xf32>
    %11 = arith.mulf %10, %6 : vector<256x384xf32>
    %cst_5 = arith.constant -3.750000e-01 : f32
    %12 = vector.broadcast %cst_5 : f32 to vector<256x384xf32>
    %13 = arith.mulf %12, %2 : vector<256x384xf32>
    %14 = arith.addf %11, %13 : vector<256x384xf32>
    %15 = arith.truncf %2 : vector<256x384xf32> to vector<256x384xbf16>
    %c0_6 = arith.constant 0 : index
    %c0_7 = arith.constant 0 : index
    %16 = vector.load %arg4[%c0_6, %c0_7] : memref<1152x128xbf16, #tpu.memory_space<vmem>>, vector<384x128xbf16>
    %cst_8 = arith.constant dense<0.000000e+00> : vector<256x128xf32>
    %17 = tpu.matmul %15, %16, %cst_8 {dimension_numbers = #tpu.dot_dimension_numbers<[1], [0], [0], [1], [0, 0, 1, 1], [], []>} : vector<256x384xbf16>, vector<384x128xbf16>, vector<256x128xf32> -> vector<256x128xf32>
    %18 = arith.truncf %6 : vector<256x384xf32> to vector<256x384xbf16>
    %c384 = arith.constant 384 : index
    %c0_9 = arith.constant 0 : index
    %19 = vector.load %arg4[%c384, %c0_9] : memref<1152x128xbf16, #tpu.memory_space<vmem>>, vector<384x128xbf16>
    %cst_10 = arith.constant dense<0.000000e+00> : vector<256x128xf32>
    %20 = tpu.matmul %18, %19, %cst_10 {dimension_numbers = #tpu.dot_dimension_numbers<[1], [0], [0], [1], [0, 0, 1, 1], [], []>} : vector<256x384xbf16>, vector<384x128xbf16>, vector<256x128xf32> -> vector<256x128xf32>
    %21 = arith.addf %17, %20 : vector<256x128xf32>
    %22 = arith.truncf %14 : vector<256x384xf32> to vector<256x384xbf16>
    %c768 = arith.constant 768 : index
    %c0_11 = arith.constant 0 : index
    %23 = vector.load %arg4[%c768, %c0_11] : memref<1152x128xbf16, #tpu.memory_space<vmem>>, vector<384x128xbf16>
    %cst_12 = arith.constant dense<0.000000e+00> : vector<256x128xf32>
    %24 = tpu.matmul %22, %23, %cst_12 {dimension_numbers = #tpu.dot_dimension_numbers<[1], [0], [0], [1], [0, 0, 1, 1], [], []>} : vector<256x384xbf16>, vector<384x128xbf16>, vector<256x128xf32> -> vector<256x128xf32>
    %25 = arith.addf %21, %24 : vector<256x128xf32>
    %c0_13 = arith.constant 0 : index
    %c0_14 = arith.constant 0 : index
    %26 = vector.load %arg5[%c0_13, %c0_14] : memref<256x128xf32, #tpu.memory_space<vmem>>, vector<256x128xf32>
    tpu.vector_store %arg5[%c0_13, %c0_14], %25 {strides = array<i32>} : memref<256x128xf32, #tpu.memory_space<vmem>>, vector<256x128xf32>,
    return
  }
  func.func @transform_0(%arg0: i32, %arg1: i32, %arg2: i32) -> (i32, i32) {
    %c0_i32 = arith.constant 0 : i32
    return %arg0, %arg2 : i32, i32
  }
  func.func @transform_1(%arg0: i32, %arg1: i32, %arg2: i32) -> (i32, i32) {
    %c0_i32 = arith.constant 0 : i32
    return %arg2, %arg1 : i32, i32
  }
  func.func @transform_2(%arg0: i32, %arg1: i32, %arg2: i32) -> (i32, i32) {
    %c0_i32 = arith.constant 0 : i32
    return %arg0, %arg1 : i32, i32
  }
}

module attributes {stable_mosaic.version = 11 : i64} {
  func.func @_kan_kernel(%arg0: i32, %arg1: i32, %arg2: i32, %arg3: memref<256x128xbf16, #tpu.memory_space<vmem>>, %arg4: memref<384x128xbf16, #tpu.memory_space<vmem>>, %arg5: memref<256x128xf32, #tpu.memory_space<vmem>>) attributes {dimension_semantics = [#tpu.dimension_semantics<parallel>, #tpu.dimension_semantics<parallel>, #tpu.dimension_semantics<arbitrary>], iteration_bounds = array<i64: 2, 1, 1>, scalar_prefetch = 0 : i64, scratch_operands = 0 : i64, tpu.core_type = #tpu.core_type<tc>, window_params = [{transform_indices = @transform_0, window_bounds = array<i64: 256, 128>}, {transform_indices = @transform_1, window_bounds = array<i64: 384, 128>}, {transform_indices = @transform_2, window_bounds = array<i64: 256, 128>}]} {
    %c0 = arith.constant 0 : index
    %c0_0 = arith.constant 0 : index
    %0 = vector.load %arg3[%c0, %c0_0] : memref<256x128xbf16, #tpu.memory_space<vmem>>, vector<256x128xbf16>
    %1 = arith.extf %0 : vector<256x128xbf16> to vector<256x128xf32>
    %cst = arith.constant 1.000000e+00 : f32
    %2 = vector.broadcast %cst : f32 to vector<256x128xf32>
    %cst_1 = arith.constant 5.000000e-01 : f32
    %3 = vector.broadcast %cst_1 : f32 to vector<256x128xf32>
    %4 = arith.mulf %3, %1 : vector<256x128xf32>
    %cst_2 = arith.constant 0.000000e+00 : f32
    %5 = vector.broadcast %cst_2 : f32 to vector<256x128xf32>
    %6 = arith.addf %5, %4 : vector<256x128xf32>
    %cst_3 = arith.constant 1.500000e+00 : f32
    %7 = vector.broadcast %cst_3 : f32 to vector<256x128xf32>
    %8 = arith.mulf %7, %1 : vector<256x128xf32>
    %cst_4 = arith.constant 0.000000e+00 : f32
    %9 = vector.broadcast %cst_4 : f32 to vector<256x128xf32>
    %10 = arith.addf %8, %9 : vector<256x128xf32>
    %11 = arith.mulf %10, %6 : vector<256x128xf32>
    %cst_5 = arith.constant -3.750000e-01 : f32
    %12 = vector.broadcast %cst_5 : f32 to vector<256x128xf32>
    %13 = arith.mulf %12, %2 : vector<256x128xf32>
    %14 = arith.addf %11, %13 : vector<256x128xf32>
    %15 = arith.truncf %2 : vector<256x128xf32> to vector<256x128xbf16>
    %c0_6 = arith.constant 0 : index
    %c0_7 = arith.constant 0 : index
    %16 = vector.load %arg4[%c0_6, %c0_7] : memref<384x128xbf16, #tpu.memory_space<vmem>>, vector<128x128xbf16>
    %cst_8 = arith.constant dense<0.000000e+00> : vector<256x128xf32>
    %17 = tpu.matmul %15, %16, %cst_8 {dimension_numbers = #tpu.dot_dimension_numbers<[1], [0], [0], [1], [0, 0, 1, 1], [], []>} : vector<256x128xbf16>, vector<128x128xbf16>, vector<256x128xf32> -> vector<256x128xf32>
    %18 = arith.truncf %6 : vector<256x128xf32> to vector<256x128xbf16>
    %c128 = arith.constant 128 : index
    %c0_9 = arith.constant 0 : index
    %19 = vector.load %arg4[%c128, %c0_9] : memref<384x128xbf16, #tpu.memory_space<vmem>>, vector<128x128xbf16>
    %cst_10 = arith.constant dense<0.000000e+00> : vector<256x128xf32>
    %20 = tpu.matmul %18, %19, %cst_10 {dimension_numbers = #tpu.dot_dimension_numbers<[1], [0], [0], [1], [0, 0, 1, 1], [], []>} : vector<256x128xbf16>, vector<128x128xbf16>, vector<256x128xf32> -> vector<256x128xf32>
    %21 = arith.addf %17, %20 : vector<256x128xf32>
    %22 = arith.truncf %14 : vector<256x128xf32> to vector<256x128xbf16>
    %c256 = arith.constant 256 : index
    %c0_11 = arith.constant 0 : index
    %23 = vector.load %arg4[%c256, %c0_11] : memref<384x128xbf16, #tpu.memory_space<vmem>>, vector<128x128xbf16>
    %cst_12 = arith.constant dense<0.000000e+00> : vector<256x128xf32>
    %24 = tpu.matmul %22, %23, %cst_12 {dimension_numbers = #tpu.dot_dimension_numbers<[1], [0], [0], [1], [0, 0, 1, 1], [], []>} : vector<256x128xbf16>, vector<128x128xbf16>, vector<256x128xf32> -> vector<256x128xf32>
    %25 = arith.addf %21, %24 : vector<256x128xf32>
    %c0_13 = arith.constant 0 : index
    %c0_14 = arith.constant 0 : index
    %26 = vector.load %arg5[%c0_13, %c0_14] : memref<256x128xf32, #tpu.memory_space<vmem>>, vector<256x128xf32>
    tpu.vector_store %arg5[%c0_13, %c0_14], %25 {strides = array<i32>} : memref<256x128xf32, #tpu.memory_space<vmem>>, vector<256x128xf32>,
    return
  }
  func.func @transform_0(%arg0: i32, %arg1: i32, %arg2: i32) -> (i32, i32) {
    %c0_i32 = arith.constant 0 : i32
    return %arg0, %arg2 : i32, i32
  }
  func.func @transform_1(%arg0: i32, %arg1: i32, %arg2: i32) -> (i32, i32) {
    %c0_i32 = arith.constant 0 : i32
    return %arg2, %arg1 : i32, i32
  }
  func.func @transform_2(%arg0: i32, %arg1: i32, %arg2: i32) -> (i32, i32) {
    %c0_i32 = arith.constant 0 : i32
    return %arg0, %arg1 : i32, i32
  }
}

</mosaic_0001>

<bundles_post_ra>
// kernel: pointnet_kan_forward.3
= control target key start
LH: loop header
LB: loop body
LE: loop exit
PB: predicated region body
PF: predicated region fallthrough
CT: control target
= control target key end

     0   :  { %s1995_s9 = smov 0   ;;  %s1997_s10 = smov 0   ;;  %s2841_s0 = inlined_call_operand.vmem [shape: bf16[512,128], index: 0, kind: input, shape index: {}]   ;;  %s2842_s1 = inlined_call_operand.vmem [shape: bf16[384,256], index: 1, kind: input, shape index: {}]   ;;  %s2843_s2 = inlined_call_operand.vmem [shape: f32[512,256], index: 2, kind: output, shape index: {}]  }
   0x1   :  { %s1999_s11 = smov 0  }
   0x2 LB: > { %s31_s12 = sadd.s32 1, %s1973_s10  ;;  %p1586_p0 = scmp.ge.s32.totalorder %s1977_s11, 1  ;;  %s1977_s11 = sphi %s1999_s11, %s12_s11   ;;  %s1973_s10 = sphi %s1997_s10, %s2904_s10   ;;  %s1969_s9 = sphi %s1995_s9, %s2903_s9  }
   0x3   : > { %p33_p1 = scmp.ge.s32.totalorder %s31_s12, 2  ;;  %p158_p2 = scmp.lt.s32.totalorder %s1977_s11, 3 }
   0x5   : > { %s2906_s12 = smov (%p33_p1, %s31_s12), 0  ;;  %p159_p3 = pnand %p1586_p0, %p158_p2 }
   0x7   : > { %162 = sbr.rel (%p159_p3) target bundleno = 562 (0x232), region = 28 }
   0xc   : > { %v1650_v0 = vld [vmem:[%s2842_s1 + $0xf0] sm:$0xf]  ;;  %v1818_v1 = vld [vmem:[%s2842_s1 + $0xf4] sm:$0xf0]  ;;  %v1817_v2 = vld [vmem:[%s2842_s1 + $0xf4] sm:$0xf] }
   0xd   : > { %v1651_v3 = vor.u32 %v1818_v1, %v1650_v0  ;;  %v1652_v4 = vld [vmem:[%s2842_s1 + $0xf8] sm:$0xf0]  ;;  %v1642_v5 = vld [vmem:[%s2842_s1 + $0xe0] sm:$0xf]  ;;  %v1816_v6 = vld [vmem:[%s2842_s1 + $0xe4] sm:$0xf0] }
   0xe   : > { %v1655_v7 = vor.u32 %v1817_v2, %v1652_v4  ;;  %v1815_v8 = vld [vmem:[%s2842_s1 + $0xe4] sm:$0xf]  ;;  %v1644_v9 = vld [vmem:[%s2842_s1 + $0xe8] sm:$0xf0]  ;;  %v1643_v10 = vor.u32 %v1816_v6, %v1642_v5  ;;  %v1634_v12 = vld [vmem:[%s2842_s1 + $0xd0] sm:$0xf] }
   0xf   : > { %616 = vmatpush.bf16.msra.mxu0 %v1651_v3  ;;  %1914 = vmatpush.bf16.msra.mxu2 %v1651_v3  ;;  %v1647_v11 = vor.u32 %v1815_v8, %v1644_v9  ;;  %v1814_v13 = vld [vmem:[%s2842_s1 + $0xd4] sm:$0xf0]  ;;  %v1813_v14 = vld [vmem:[%s2842_s1 + $0xd4] sm:$0xf]  ;;  %v1636_v15 = vld [vmem:[%s2842_s1 + $0xd8] sm:$0xf0] }
  0x10   : > { %705 = vmatpush.bf16.msra.mxu1 %v1655_v7  ;;  %1922 = vmatpush.bf16.msra.mxu3 %v1655_v7  ;;  %v1635_v16 = vor.u32 %v1814_v13, %v1634_v12  ;;  %v1639_v17 = vor.u32 %v1813_v14, %v1636_v15  ;;  %v1626_v18 = vld [vmem:[%s2842_s1 + $0xc0] sm:$0xf]  ;;  %v1812_v19 = vld [vmem:[%s2842_s1 + $0xc4] sm:$0xf0]  ;;  %v1811_v20 = vld [vmem:[%s2842_s1 + $0xc4] sm:$0xf] }
  0x11   : > { %v1628_v21 = vld [vmem:[%s2842_s1 + $0xc8] sm:$0xf0]  ;;  %s1587_s21 = sshll.u32 %s1969_s9, 5  ;;  %v1627_v22 = vor.u32 %v1812_v19, %v1626_v18  ;;  %v1618_v24 = vld [vmem:[%s2842_s1 + $0xb0] sm:$0xf] }
  0x12   : > { %p199_p4 = scmp.lt.s32.totalorder %s1587_s21, 63  ;;  %v1631_v23 = vor.u32 %v1811_v20, %v1628_v21  ;;  %v1810_v25 = vld [vmem:[%s2842_s1 + $0xb4] sm:$0xf0]  ;;  %v1809_v26 = vld [vmem:[%s2842_s1 + $0xb4] sm:$0xf] }
  0x13   : > { %617 = vmatpush.bf16.msra.mxu0 %v1643_v10  ;;  %1915 = vmatpush.bf16.msra.mxu2 %v1643_v10  ;;  %v1620_v27 = vld [vmem:[%s2842_s1 + $0xb8] sm:$0xf0]  ;;  %v1619_v28 = vor.u32 %v1810_v25, %v1618_v24  ;;  %v1610_v29 = vld [vmem:[%s2842_s1 + $0xa0] sm:$0xf]  ;;  %v1808_v31 = vld [vmem:[%s2842_s1 + $0xa4] sm:$0xf0] }
  0x14   : > { %706 = vmatpush.bf16.msra.mxu1 %v1647_v11  ;;  %1923 = vmatpush.bf16.msra.mxu3 %v1647_v11  ;;  %s2908_s21 = smov (!%p199_p4, %s1587_s21), 63  ;;  %v1623_v30 = vor.u32 %v1809_v26, %v1620_v27  ;;  %v1807_v32 = vld [vmem:[%s2842_s1 + $0xa4] sm:$0xf]  ;;  %v1612_v33 = vld [vmem:[%s2842_s1 + $0xa8] sm:$0xf0]  ;;  %v1611_v41 = vor.u32 %v1808_v31, %v1610_v29 }
  0x15   : > { %s1588_s3 = sshll.u32 %s2908_s21, 2  ;;  %v1615_v42 = vor.u32 %v1807_v32, %v1612_v33  ;;  %v1602_v43 = vld [vmem:[%s2842_s1 + $0x90] sm:$0xf]  ;;  %v1806_v44 = vld [vmem:[%s2842_s1 + $0x94] sm:$0xf0]  ;;  %s1786_s23 = sshll.u32 %s2908_s21, 4 }
  0x16   : > { %s2094_s16 = scalar_lea.vmem %s2841_s0, %s1588_s3  ;;  %v1805_v45 = vld [vmem:[%s2842_s1 + $0x94] sm:$0xf]  ;;  %v1604_v48 = vld [vmem:[%s2842_s1 + $0x98] sm:$0xf0]  ;;  %v1603_v57 = vor.u32 %v1806_v44, %v1602_v43  ;;  %v1594_v61 = vld [vmem:[%s2842_s1 + $0x80] sm:$0xf]  ;;  %s2679_s26 = scalar_lea.vmem %s2843_s2, %s1786_s23 }
  0x17   : > { %618 = vmatpush.bf16.msra.mxu0 %v1635_v16  ;;  %1916 = vmatpush.bf16.msra.mxu2 %v1635_v16  ;;  %v1836_v34 = vld [vmem:[%s2094_s16] sm:$0xff]   ;;  %v1907_v40 = vld [vmem:[%s2094_s16 + $0x48] sm:$0xff]   ;;  %v1607_v60 = vor.u32 %v1805_v45, %v1604_v48  ;;  %v1714_v7 = vld [vmem:[%s2842_s1 + $0x70] sm:$0xf] }
  0x18   : > { %707 = vmatpush.bf16.msra.mxu1 %v1639_v17  ;;  %1924 = vmatpush.bf16.msra.mxu3 %v1639_v17  ;;  %v1906_v35 = vld [vmem:[%s2094_s16 + $0x40] sm:$0xff]   ;;  %v1837_v36 = vunpack.c.l.bf16 %v1836_v34  ;;  %v1838_v37 = vunpack.c.h.bf16 %v1836_v34  ;;  %v1873_v46 = vunpack.c.l.bf16 %v1907_v40  ;;  %v1874_v47 = vunpack.c.h.bf16 %v1907_v40  ;;  %v1804_v0 = vld [vmem:[%s2842_s1 + $0x84] sm:$0xf0]  ;;  %v1596_v6 = vld [vmem:[%s2842_s1 + $0x88] sm:$0xf0] }
  0x19   : > { %v1869_v38 = vunpack.c.l.bf16 %v1906_v35  ;;  %v1870_v39 = vunpack.c.h.bf16 %v1906_v35  ;;  %v1803_v5 = vld [vmem:[%s2842_s1 + $0x84] sm:$0xf]  ;;  %v1802_v8 = vld [vmem:[%s2842_s1 + $0x74] sm:$0xf0]  ;;  %v1801_v9 = vld [vmem:[%s2842_s1 + $0x74] sm:$0xf]  ;;  %v1595_v13 = vor.u32 %v1804_v0, %v1594_v61 }
  0x1a   : > { %v296_v49 = vmul.f32 0.5, %v1837_v36  ;;  %v297_v50 = vmul.f32 0.5, %v1838_v37  ;;  %v360_v51 = vmul.f32 1.5, %v1837_v36  ;;  %v361_v52 = vmul.f32 1.5, %v1838_v37  ;;  %v1716_v10 = vld [vmem:[%s2842_s1 + $0x78] sm:$0xf0] }
  0x1b   : > { %619 = vmatpush.bf16.msra.mxu0 %v1627_v22  ;;  %1917 = vmatpush.bf16.msra.mxu2 %v1627_v22  ;;  %v312_v53 = vmul.f32 0.5, %v1869_v38  ;;  %v313_v54 = vmul.f32 0.5, %v1870_v39  ;;  %v376_v55 = vmul.f32 1.5, %v1869_v38  ;;  %v377_v56 = vmul.f32 1.5, %v1870_v39  ;;  %v1778_v15 = vld [vmem:[%s2842_s1 + $0x170] sm:$0xf] }
  0x1c   : > { %708 = vmatpush.bf16.msra.mxu1 %v1631_v23  ;;  %1925 = vmatpush.bf16.msra.mxu3 %v1631_v23  ;;  %v2111_v58 = vmul.f32 %v360_v51, %v296_v49  ;;  %v2113_v59 = vmul.f32 %v361_v52, %v297_v50  ;;  %v2125_v1 = vmul.f32 0.5, %v1873_v46  ;;  %v2127_v2 = vmul.f32 0.5, %v1874_v47  ;;  %v1834_v16 = vld [vmem:[%s2842_s1 + $0x174] sm:$0xf0]  ;;  %v1908_v17 = vld [vmem:[%s2094_s16 + $0x50] sm:$0xff]   ;;  %v2191_v38 = vld [vmem:[%s2094_s16 + $0x8] sm:$0xff]  }
  0x1d   : > { %v2118_v62 = vmul.f32 %v376_v55, %v312_v53  ;;  %v2120_v63 = vmul.f32 %v377_v56, %v313_v54  ;;  %v378_v3 = vmul.f32 1.5, %v1873_v46  ;;  %v379_v4 = vmul.f32 1.5, %v1874_v47  ;;  %v1833_v20 = vld [vmem:[%s2842_s1 + $0x174] sm:$0xf]  ;;  %v1780_v21 = vld [vmem:[%s2842_s1 + $0x178] sm:$0xf0] }
  0x1e   : > { %v1599_v14 = vor.u32 %v1803_v5, %v1596_v6  ;;  %v1715_v18 = vor.u32 %v1802_v8, %v1714_v7  ;;  %v1719_v19 = vor.u32 %v1801_v9, %v1716_v10  ;;  %v1706_v22 = vld [vmem:[%s2842_s1 + $0x60] sm:$0xf]  ;;  %v504_v23 = vpack.c.bf16 %v297_v50, %v296_v49  ;;  %v1800_v25 = vld [vmem:[%s2842_s1 + $0x64] sm:$0xf0]  ;;  %v1799_v26 = vld [vmem:[%s2842_s1 + $0x64] sm:$0xf] }
  0x1f   : > { %620 = vmatpush.bf16.msra.mxu0 %v1619_v28  ;;  %1918 = vmatpush.bf16.msra.mxu2 %v1619_v28  ;;  %v2148_v11 = vmul.f32 %v378_v3, %v2125_v1  ;;  %v2151_v12 = vmul.f32 %v379_v4, %v2127_v2  ;;  %v512_v24 = vpack.c.bf16 %v313_v54, %v312_v53  ;;  %v1708_v27 = vld [vmem:[%s2842_s1 + $0x68] sm:$0xf0]  ;;  %v1877_v28 = vunpack.c.l.bf16 %v1908_v17  ;;  %v1770_v32 = vld [vmem:[%s2842_s1 + $0x160] sm:$0xf]  ;;  %v1832_v33 = vld [vmem:[%s2842_s1 + $0x164] sm:$0xf0] }
  0x20   : > { %709 = vmatpush.bf16.msra.mxu1 %v1623_v30  ;;  %1926 = vmatpush.bf16.msra.mxu3 %v1623_v30  ;;  %v1878_v29 = vunpack.c.h.bf16 %v1908_v17  ;;  %v1779_v30 = vor.u32 %v1834_v16, %v1778_v15  ;;  %v1783_v31 = vor.u32 %v1833_v20, %v1780_v21  ;;  %v1707_v34 = vor.u32 %v1800_v25, %v1706_v22  ;;  %v1831_v36 = vld [vmem:[%s2842_s1 + $0x164] sm:$0xf]  ;;  %v1772_v37 = vld [vmem:[%s2842_s1 + $0x168] sm:$0xf0]  ;;  %v1698_v44 = vld [vmem:[%s2842_s1 + $0x50] sm:$0xf] }
  0x21   : > { %v1711_v35 = vor.u32 %v1799_v26, %v1708_v27  ;;  %v2193_v39 = vmul.f32 0.5, %v1877_v28  ;;  %v1771_v43 = vor.u32 %v1832_v33, %v1770_v32  ;;  %v1798_v45 = vld [vmem:[%s2842_s1 + $0x54] sm:$0xf0]  ;;  %v1797_v46 = vld [vmem:[%s2842_s1 + $0x54] sm:$0xf]  ;;  %v1775_v47 = vor.u32 %v1831_v36, %v1772_v37 }
  0x22   : > { %v2195_v40 = vmul.f32 0.5, %v1878_v29  ;;  %v1700_v50 = vld [vmem:[%s2842_s1 + $0x58] sm:$0xf0]  ;;  %v1762_v51 = vld [vmem:[%s2842_s1 + $0x150] sm:$0xf]  ;;  %v1699_v52 = vor.u32 %v1798_v45, %v1698_v44  ;;  %v513_v7 = vpack.c.bf16 %v2127_v2, %v2125_v1  ;;  %v1910_v45 = vld [vmem:[%s2094_s16 + $0x60] sm:$0xff]  }
  0x23   : > { %621 = vmatpush.bf16.msra.mxu0 %v1611_v41  ;;  %1919 = vmatpush.bf16.msra.mxu2 %v1611_v41  ;;  %v380_v41 = vmul.f32 1.5, %v1877_v28  ;;  %v1703_v53 = vor.u32 %v1797_v46, %v1700_v50  ;;  %v1830_v54 = vld [vmem:[%s2842_s1 + $0x154] sm:$0xf0]  ;;  %v1829_v55 = vld [vmem:[%s2842_s1 + $0x154] sm:$0xf]  ;;  %v1885_v50 = vunpack.c.l.bf16 %v1910_v45 }
  0x24   : > { %710 = vmatpush.bf16.msra.mxu1 %v1615_v42  ;;  %1927 = vmatpush.bf16.msra.mxu3 %v1615_v42  ;;  %v381_v42 = vmul.f32 1.5, %v1878_v29  ;;  %v1764_v56 = vld [vmem:[%s2842_s1 + $0x158] sm:$0xf0]  ;;  %v1763_v61 = vor.u32 %v1830_v54, %v1762_v51  ;;  %v2243_v10 = vld [vmem:[%s2094_s16 + $0x10] sm:$0xff]   ;;  %v1690_v17 = vld [vmem:[%s2842_s1 + $0x40] sm:$0xf]  ;;  %v1886_v51 = vunpack.c.h.bf16 %v1910_v45 }
  0x25   : > { %v2207_v48 = vmul.f32 %v380_v41, %v2193_v39  ;;  %v1767_v0 = vor.u32 %v1829_v55, %v1764_v56  ;;  %v1909_v5 = vld [vmem:[%s2094_s16 + $0x58] sm:$0xff]   ;;  %v1796_v1 = vld [vmem:[%s2842_s1 + $0x44] sm:$0xf0]  ;;  %v1795_v2 = vld [vmem:[%s2842_s1 + $0x44] sm:$0xf]  ;;  %v384_v55 = vmul.f32 1.5, %v1885_v50 }
  0x26   : > { %v2210_v49 = vmul.f32 %v381_v42, %v2195_v40  ;;  %v1881_v8 = vunpack.c.l.bf16 %v1909_v5  ;;  %v1882_v9 = vunpack.c.h.bf16 %v1909_v5  ;;  %v1691_v20 = vor.u32 %v1796_v1, %v1690_v17  ;;  %v1692_v21 = vld [vmem:[%s2842_s1 + $0x48] sm:$0xf0]  ;;  %v1754_v22 = vld [vmem:[%s2842_s1 + $0x140] sm:$0xf]  ;;  %v1827_v27 = vld [vmem:[%s2842_s1 + $0x144] sm:$0xf] }
  0x27   : > { %622 = vmatpush.bf16.msra.mxu0 %v1603_v57  ;;  %1920 = vmatpush.bf16.msra.mxu2 %v1603_v57  ;;  %v1841_v57 = vunpack.c.l.bf16 %v2191_v38  ;;  %v1695_v25 = vor.u32 %v1795_v2, %v1692_v21  ;;  %v1756_v28 = vld [vmem:[%s2842_s1 + $0x148] sm:$0xf0]  ;;  %v1902_v29 = vld [vmem:[%s2094_s16 + $0x20] sm:$0xff]   ;;  %v2310_v54 = vmul.f32 0.5, %v1886_v51  ;;  %v385_v56 = vmul.f32 1.5, %v1886_v51 }
  0x28   : > { %711 = vmatpush.bf16.msra.mxu1 %v1607_v60  ;;  %1928 = vmatpush.bf16.msra.mxu3 %v1607_v60  ;;  %v1842_v60 = vunpack.c.h.bf16 %v2191_v38  ;;  %v382_v15 = vmul.f32 1.5, %v1881_v8  ;;  %v383_v16 = vmul.f32 1.5, %v1882_v9  ;;  %v1853_v32 = vunpack.c.l.bf16 %v1902_v29  ;;  %v1825_v1 = vld [vmem:[%s2842_s1 + $0x134] sm:$0xf]  ;;  %v1748_v2 = vld [vmem:[%s2842_s1 + $0x138] sm:$0xf0] }
  0x29   : > { %v2231_v3 = vmul.f32 0.5, %v1841_v57  ;;  %v1854_v33 = vunpack.c.h.bf16 %v1902_v29  ;;  %v2325_v5 = vmul.f32 %v385_v56, %v2310_v54 }
  0x2a   : > { %v2235_v4 = vmul.f32 0.5, %v1842_v60  ;;  %v368_v36 = vmul.f32 1.5, %v1853_v32 }
  0x2b   : > { %623 = vmatpush.bf16.msra.mxu0 %v1595_v13  ;;  %1921 = vmatpush.bf16.msra.mxu2 %v1595_v13  ;;  %v2245_v13 = vmul.f32 0.5, %v1881_v8  ;;  %v369_v37 = vmul.f32 1.5, %v1854_v33  ;;  %v1746_v8 = vld [vmem:[%s2842_s1 + $0x130] sm:$0xf] }
  0x2c   : > { %712 = vmatpush.bf16.msra.mxu1 %v1599_v14  ;;  %1929 = vmatpush.bf16.msra.mxu3 %v1599_v14  ;;  %v505_v6 = vpack.c.bf16 %v2235_v4, %v2231_v3  ;;  %v2247_v14 = vmul.f32 0.5, %v1882_v9  ;;  %v1826_v9 = vld [vmem:[%s2842_s1 + $0x134] sm:$0xf0] }
  0x2d   : > { %v1747_v17 = vor.u32 %v1826_v9, %v1746_v8  ;;  %v1676_v8 = vld [vmem:[%s2842_s1 + $0x28] sm:$0xf0]  ;;  %v1738_v9 = vld [vmem:[%s2842_s1 + $0x120] sm:$0xf] }
  0x2e   : > { %624 = vmatmul.bf16.vlgmr.msra.gmra.mxu0 %v504_v23  ;;  %664 = vmatmul.bf16.vlgmr.msra.gmra.mxu2 %v512_v24 }
  0x2f   : > { %874 = vmatpush.bf16.msrb.mxu2 %v1715_v18  ;;  %713 = vmatmul.bf16.vlgmr.msra.gmra.mxu1 %v504_v23  ;;  %v2259_v18 = vmul.f32 %v382_v15, %v2245_v13  ;;  %v1828_v23 = vld [vmem:[%s2842_s1 + $0x144] sm:$0xf0] }
  0x30   : > { %963 = vmatpush.bf16.msrb.mxu3 %v1719_v19  ;;  %1164 = vmatpush.bf16.msrb.mxu0 %v1779_v30  ;;  %v2262_v19 = vmul.f32 %v383_v16, %v2247_v14  ;;  %v1755_v26 = vor.u32 %v1828_v23, %v1754_v22  ;;  %v1846_v30 = vunpack.c.h.bf16 %v2243_v10  ;;  %v1751_v22 = vor.u32 %v1825_v1, %v1748_v2  ;;  %v1823_v2 = vld [vmem:[%s2842_s1 + $0x124] sm:$0xf] }
  0x31   : > { %753 = vmatmul.bf16.vlgmr.msra.gmra.mxu3 %v512_v24  ;;  %1253 = vmatpush.bf16.msrb.mxu1 %v1783_v31  ;;  %v1845_v24 = vunpack.c.l.bf16 %v2243_v10  ;;  %v1759_v31 = vor.u32 %v1827_v27, %v1756_v28 }
  0x32   : > { %v2292_v42 = vmul.f32 0.5, %v1846_v30 }
  0x33   : > { %875 = vmatpush.bf16.msrb.mxu2 %v1707_v34  ;;  %v2282_v34 = vmul.f32 0.5, %v1853_v32  ;;  %v2288_v41 = vmul.f32 0.5, %v1845_v24 }
  0x34   : > { %964 = vmatpush.bf16.msrb.mxu3 %v1711_v35  ;;  %1165 = vmatpush.bf16.msrb.mxu0 %v1771_v43  ;;  %v2284_v35 = vmul.f32 0.5, %v1854_v33 }
  0x35   : > { %1254 = vmatpush.bf16.msrb.mxu1 %v1775_v47  ;;  %v2295_v43 = vmul.f32 %v368_v36, %v2282_v34  ;;  %v506_v46 = vpack.c.bf16 %v2292_v42, %v2288_v41  ;;  %v514_v47 = vpack.c.bf16 %v2195_v40, %v2193_v39  ;;  %v1794_v39 = vld [vmem:[%s2842_s1 + $0x34] sm:$0xf0]  ;;  %v1793_v40 = vld [vmem:[%s2842_s1 + $0x34] sm:$0xf] }
  0x36   : > { %v2298_v44 = vmul.f32 %v369_v37, %v2284_v35  ;;  %v1911_v37 = vld [vmem:[%s2094_s16 + $0x68] sm:$0xff]  }
  0x37   : > { %876 = vmatpush.bf16.msrb.mxu2 %v1699_v52  ;;  %v2306_v52 = vld [vmem:[%s2094_s16 + $0x18] sm:$0xff]  }
  0x38   : > { %965 = vmatpush.bf16.msrb.mxu3 %v1703_v53  ;;  %1166 = vmatpush.bf16.msrb.mxu0 %v1763_v61  ;;  %v2308_v53 = vmul.f32 0.5, %v1885_v50  ;;  %v1682_v61 = vld [vmem:[%s2842_s1 + $0x30] sm:$0xf]  ;;  %v1849_v15 = vunpack.c.l.bf16 %v2306_v52  ;;  %v1850_v21 = vunpack.c.h.bf16 %v2306_v52  ;;  %v1890_v50 = vunpack.c.h.bf16 %v1911_v37 }
  0x39   : > { %1255 = vmatpush.bf16.msrb.mxu1 %v1767_v0 }
  0x3a   : > { %v2322_v0 = vmul.f32 %v384_v55, %v2308_v53  ;;  %v2355_v32 = vmul.f32 0.5, %v1850_v21  ;;  %v2370_v55 = vmul.f32 0.5, %v1890_v50 }
  0x3b   : > { %877 = vmatpush.bf16.msrb.mxu2 %v1691_v20  ;;  %v1903_v20 = vld [vmem:[%s2094_s16 + $0x28] sm:$0xff]  }
  0x3c   : > { %966 = vmatpush.bf16.msrb.mxu3 %v1695_v25  ;;  %1167 = vmatpush.bf16.msrb.mxu0 %v1755_v26  ;;  %v1857_v23 = vunpack.c.l.bf16 %v1903_v20  ;;  %v1858_v25 = vunpack.c.h.bf16 %v1903_v20  ;;  %v1740_v20 = vld [vmem:[%s2842_s1 + $0x128] sm:$0xf0] }
  0x3d   : > { %1256 = vmatpush.bf16.msrb.mxu1 %v1759_v31  ;;  %v2351_v31 = vmul.f32 0.5, %v1849_v15 }
  0x3e   : > { %629 = vmatmul.bf16.gmra.mxu0 %v505_v6  ;;  %669 = vmatmul.bf16.gmra.mxu2 %v513_v7  ;;  %v2345_v26 = vmul.f32 0.5, %v1857_v23  ;;  %v2347_v27 = vmul.f32 0.5, %v1858_v25  ;;  %v370_v28 = vmul.f32 1.5, %v1857_v23  ;;  %v371_v29 = vmul.f32 1.5, %v1858_v25 }
  0x3f   : > { %718 = vmatmul.bf16.gmra.mxu1 %v505_v6  ;;  %v1683_v6 = vor.u32 %v1794_v39, %v1682_v61  ;;  %v507_v45 = vpack.c.bf16 %v2355_v32, %v2351_v31  ;;  %v387_v61 = vmul.f32 1.5, %v1890_v50  ;;  %v1674_v39 = vld [vmem:[%s2842_s1 + $0x20] sm:$0xf]  ;;  %v1743_v23 = vor.u32 %v1823_v2, %v1740_v20  ;;  %v1668_v2 = vld [vmem:[%s2842_s1 + $0x18] sm:$0xf0] }
  0x40   : > { %1168 = vmatpush.bf16.msrb.mxu0 %v1747_v17  ;;  %v2358_v33 = vmul.f32 %v370_v28, %v2345_v26  ;;  %v2361_v36 = vmul.f32 %v371_v29, %v2347_v27  ;;  %v1730_v20 = vld [vmem:[%s2842_s1 + $0x110] sm:$0xf] }
  0x41   : > { %758 = vmatmul.bf16.gmra.mxu3 %v513_v7  ;;  %v1684_v7 = vld [vmem:[%s2842_s1 + $0x38] sm:$0xf0]  ;;  %878 = vmatpush.bf16.msrb.mxu2 %v1683_v6  ;;  %v2385_v6 = vmul.f32 %v387_v61, %v2370_v55  ;;  %v508_v61 = vpack.c.bf16 %v2284_v35, %v2282_v34  ;;  %v1666_v34 = vld [vmem:[%s2842_s1 + $0x10] sm:$0xf]  ;;  %v1790_v35 = vld [vmem:[%s2842_s1 + $0x14] sm:$0xf0] }
  0x42   : > { %v1687_v16 = vor.u32 %v1793_v40, %v1684_v7  ;;  %1257 = vmatpush.bf16.msrb.mxu1 %v1751_v22  ;;  %v1904_v22 = vld [vmem:[%s2094_s16 + $0x30] sm:$0xff]  }
  0x43   : > { %v1861_v25 = vunpack.c.l.bf16 %v1904_v22  ;;  %v1862_v28 = vunpack.c.h.bf16 %v1904_v22  ;;  %v1822_v22 = vld [vmem:[%s2842_s1 + $0x114] sm:$0xf0] }
  0x44   : > { %967 = vmatpush.bf16.msrb.mxu3 %v1687_v16  ;;  %v1824_v16 = vld [vmem:[%s2842_s1 + $0x124] sm:$0xf0] }
  0x45   : > { %v1739_v1 = vor.u32 %v1824_v16, %v1738_v9  ;;  %v2403_v29 = vmul.f32 0.5, %v1861_v25 }
  0x46   : > { %1258 = vmatpush.bf16.msrb.mxu1 %v1743_v23 }
  0x47   : > { %1169 = vmatpush.bf16.msrb.mxu0 %v1739_v1  ;;  %v1667_v1 = vor.u32 %v1790_v35, %v1666_v34 }
  0x4e   : > { %634 = vmatmul.bf16.gmra.mxu0 %v506_v46  ;;  %674 = vmatmul.bf16.gmra.mxu2 %v514_v47 }
  0x4f   : > { %723 = vmatmul.bf16.gmra.mxu1 %v506_v46  ;;  %v515_v46 = vpack.c.bf16 %v2247_v14, %v2245_v13  ;;  %v1792_v13 = vld [vmem:[%s2842_s1 + $0x24] sm:$0xf0]  ;;  %v1791_v14 = vld [vmem:[%s2842_s1 + $0x24] sm:$0xf] }
  0x50   : > { %v1675_v7 = vor.u32 %v1792_v13, %v1674_v39  ;;  %v1679_v17 = vor.u32 %v1791_v14, %v1676_v8  ;;  %v516_v39 = vpack.c.bf16 %v2310_v54, %v2308_v53  ;;  %v1789_v53 = vld [vmem:[%s2842_s1 + $0x14] sm:$0xf] }
  0x51   : > { %763 = vmatmul.bf16.gmra.mxu3 %v514_v47  ;;  %v1889_v47 = vunpack.c.l.bf16 %v1911_v37  ;;  %v2405_v37 = vmul.f32 0.5, %v1862_v28  ;;  %v1671_v23 = vor.u32 %v1789_v53, %v1668_v2  ;;  %v1913_v53 = vld [vmem:[%s2094_s16 + $0x78] sm:$0xff]   ;;  %v509_v2 = vpack.c.bf16 %v2347_v27, %v2345_v26  ;;  %v1788_v26 = vld [vmem:[%s2842_s1 + $0x4] sm:$0xf0]  ;;  %v1787_v27 = vld [vmem:[%s2842_s1 + $0x4] sm:$0xf] }
  0x52   : > { %879 = vmatpush.bf16.msrb.mxu2 %v1675_v7  ;;  %968 = vmatpush.bf16.msrb.mxu3 %v1679_v17 }
  0x53   : > { %v2368_v51 = vmul.f32 0.5, %v1889_v47  ;;  %v386_v56 = vmul.f32 1.5, %v1889_v47 }
  0x55   : > { %v2382_v40 = vmul.f32 %v386_v56, %v2368_v51  ;;  %v1912_v56 = vld [vmem:[%s2094_s16 + $0x70] sm:$0xff]  }
  0x56   : > { %v1893_v13 = vunpack.c.l.bf16 %v1912_v56  ;;  %v1894_v14 = vunpack.c.h.bf16 %v1912_v56  ;;  %880 = vmatpush.bf16.msrb.mxu2 %v1667_v1  ;;  %969 = vmatpush.bf16.msrb.mxu3 %v1671_v23  ;;  %v517_v1 = vpack.c.bf16 %v2370_v55, %v2368_v51 }
  0x58   : > { %v2418_v7 = vmul.f32 0.5, %v1893_v13  ;;  %v2420_v8 = vmul.f32 0.5, %v1894_v14  ;;  %v388_v9 = vmul.f32 1.5, %v1893_v13  ;;  %v389_v16 = vmul.f32 1.5, %v1894_v14 }
  0x5a   : > { %v2432_v54 = vmul.f32 %v388_v9, %v2418_v7  ;;  %v2435_v17 = vmul.f32 %v389_v16, %v2420_v8 }
  0x5e   : > { %639 = vmatmul.bf16.gmra.mxu0 %v507_v45  ;;  %679 = vmatmul.bf16.gmra.mxu2 %v515_v46 }
  0x5f   : > { %728 = vmatmul.bf16.gmra.mxu1 %v507_v45  ;;  %v372_v45 = vmul.f32 1.5, %v1861_v25  ;;  %v1731_v25 = vor.u32 %v1822_v22, %v1730_v20  ;;  %v1897_v20 = vunpack.c.l.bf16 %v1913_v53  ;;  %v1898_v22 = vunpack.c.h.bf16 %v1913_v53 }
  0x61   : > { %768 = vmatmul.bf16.gmra.mxu3 %v515_v46  ;;  %v373_v46 = vmul.f32 1.5, %v1862_v28  ;;  %v2408_v47 = vmul.f32 %v372_v45, %v2403_v29  ;;  %v1821_v28 = vld [vmem:[%s2842_s1 + $0x114] sm:$0xf]  ;;  %v1732_v45 = vld [vmem:[%s2842_s1 + $0x118] sm:$0xf0]  ;;  %1170 = vmatpush.bf16.msrb.mxu0 %v1731_v25  ;;  %v326_v23 = vmul.f32 0.5, %v1897_v20 }
  0x62   : > { %v1735_v56 = vor.u32 %v1821_v28, %v1732_v45  ;;  %v327_v25 = vmul.f32 0.5, %v1898_v22  ;;  %v390_v28 = vmul.f32 1.5, %v1897_v20  ;;  %v391_v45 = vmul.f32 1.5, %v1898_v22 }
  0x63   : > { %v2411_v50 = vmul.f32 %v373_v46, %v2405_v37  ;;  %v1905_v46 = vld [vmem:[%s2094_s16 + $0x38] sm:$0xff]   ;;  %v510_v22 = vpack.c.bf16 %v2405_v37, %v2403_v29  ;;  %v2844_v37 = vmov 1065369472  }
  0x64   : > { %1259 = vmatpush.bf16.msrb.mxu1 %v1735_v56  ;;  %v2471_v51 = vmul.f32 %v390_v28, %v326_v23  ;;  %v2473_v55 = vmul.f32 %v391_v45, %v327_v25  ;;  %v518_v28 = vpack.c.bf16 %v2420_v8, %v2418_v7  ;;  %v456_v45 = vadd.f32 -0.375, %v2111_v58 }
  0x65   : > { %v362_v58 = vmul.f32 1.5, %v1841_v57 }
  0x6e   : > { %644 = vmatmul.bf16.gmra.mxu0 %v508_v61  ;;  %684 = vmatmul.bf16.gmra.mxu2 %v516_v39 }
  0x6f   : > { %733 = vmatmul.bf16.gmra.mxu1 %v508_v61  ;;  %v1865_v61 = vunpack.c.l.bf16 %v1905_v46 }
  0x71   : > { %773 = vmatmul.bf16.gmra.mxu3 %v516_v39  ;;  %v1866_v39 = vunpack.c.h.bf16 %v1905_v46  ;;  %v310_v13 = vmul.f32 0.5, %v1865_v61  ;;  %v374_v9 = vmul.f32 1.5, %v1865_v61  ;;  %v1658_v46 = vld [vmem:[%s2842_s1] sm:$0xf]  ;;  %v1660_v61 = vld [vmem:[%s2842_s1 + $0x8] sm:$0xf0] }
  0x72   : > { %v1659_v56 = vor.u32 %v1788_v26, %v1658_v46  ;;  %v457_v46 = vadd.f32 -0.375, %v2113_v59  ;;  %v363_v59 = vmul.f32 1.5, %v1842_v60 }
  0x73   : > { %v311_v14 = vmul.f32 0.5, %v1866_v39  ;;  %v375_v16 = vmul.f32 1.5, %v1866_v39  ;;  %v2453_v34 = vmul.f32 %v374_v9, %v310_v13  ;;  %v1722_v39 = vld [vmem:[%s2842_s1 + $0x100] sm:$0xf]  ;;  %v1820_v9 = vld [vmem:[%s2842_s1 + $0x104] sm:$0xf0] }
  0x74   : > { %v1723_v53 = vor.u32 %v1820_v9, %v1722_v39  ;;  %881 = vmatpush.bf16.msrb.mxu2 %v1659_v56  ;;  %v1052_v26 = vpack.c.bf16 %v457_v46, %v456_v45  ;;  %v519_v56 = vpack.c.bf16 %v327_v25, %v326_v23 }
  0x75   : > { %v2455_v35 = vmul.f32 %v375_v16, %v311_v14  ;;  %v1663_v16 = vor.u32 %v1787_v27, %v1660_v61  ;;  %v511_v27 = vpack.c.bf16 %v311_v14, %v310_v13  ;;  %v426_v13 = vmul.f32 %v362_v58, %v2231_v3 }
  0x76   : > { %1171 = vmatpush.bf16.msrb.mxu0 %v1723_v53  ;;  %v427_v14 = vmul.f32 %v363_v59, %v2235_v4  ;;  %v364_v3 = vmul.f32 1.5, %v1845_v24  ;;  %v365_v4 = vmul.f32 1.5, %v1846_v30  ;;  %v465_v58 = vadd.f32 -0.375, %v2298_v44 }
  0x77   : > { %970 = vmatpush.bf16.msrb.mxu3 %v1663_v16  ;;  %v458_v39 = vadd.f32 -0.375, %v426_v13  ;;  %v366_v59 = vmul.f32 1.5, %v1849_v15  ;;  %v367_v13 = vmul.f32 1.5, %v1850_v21 }
  0x78   : > { %v459_v57 = vadd.f32 -0.375, %v427_v14 }
  0x79   : > { %v430_v44 = vmul.f32 %v366_v59, %v2351_v31 }
  0x7a   : > { %v1053_v60 = vpack.c.bf16 %v459_v57, %v458_v39  ;;  %v431_v39 = vmul.f32 %v367_v13, %v2355_v32  ;;  %v468_v13 = vadd.f32 -0.375, %v2408_v47 }
  0x7c   : > { %v463_v15 = vadd.f32 -0.375, %v431_v39 }
  0x7e   : > { %649 = vmatmul.bf16.gmra.mxu0 %v509_v2  ;;  %689 = vmatmul.bf16.gmra.mxu2 %v517_v1 }
  0x7f   : > { %738 = vmatmul.bf16.gmra.mxu1 %v509_v2  ;;  %v1819_v2 = vld [vmem:[%s2842_s1 + $0x104] sm:$0xf] }
  0x81   : > { %778 = vmatmul.bf16.gmra.mxu3 %v517_v1  ;;  %v1724_v1 = vld [vmem:[%s2842_s1 + $0x108] sm:$0xf0] }
  0x82   : > { %v1727_v20 = vor.u32 %v1819_v2, %v1724_v1 }
  0x84   : > { %1260 = vmatpush.bf16.msrb.mxu1 %v1727_v20  ;;  %v428_v20 = vmul.f32 %v364_v3, %v2288_v41  ;;  %v462_v3 = vadd.f32 -0.375, %v430_v44  ;;  %v469_v44 = vadd.f32 -0.375, %v2411_v50 }
  0x86   : > { %v460_v46 = vadd.f32 -0.375, %v428_v20  ;;  %v1055_v21 = vpack.c.bf16 %v463_v15, %v462_v3  ;;  %v1058_v3 = vpack.c.bf16 %v469_v44, %v468_v13  ;;  %v470_v13 = vadd.f32 -0.375, %v2453_v34 }
  0x87   : > { %v471_v44 = vadd.f32 -0.375, %v2455_v35 }
  0x8e   : > { %654 = vmatmul.bf16.gmra.mxu0 %v510_v22  ;;  %694 = vmatmul.bf16.gmra.mxu2 %v518_v28 }
  0x8f   : > { %743 = vmatmul.bf16.gmra.mxu1 %v510_v22  ;;  %v429_v22 = vmul.f32 %v365_v4, %v2292_v42 }
  0x91   : > { %783 = vmatmul.bf16.gmra.mxu3 %v518_v28  ;;  %v461_v24 = vadd.f32 -0.375, %v429_v22  ;;  %v466_v22 = vadd.f32 -0.375, %v2358_v33 }
  0x93   : > { %v1054_v30 = vpack.c.bf16 %v461_v24, %v460_v46  ;;  %v467_v46 = vadd.f32 -0.375, %v2361_v36 }
  0x95   : > { %v1057_v32 = vpack.c.bf16 %v467_v46, %v466_v22 }
  0x9e   : > { %659 = vmatmul.bf16.gmra.mxu0 %v511_v27  ;;  %699 = vmatmul.bf16.gmra.mxu2 %v519_v56 }
  0x9f   : > { %748 = vmatmul.bf16.gmra.mxu1 %v511_v27 }
  0xa1   : > { %788 = vmatmul.bf16.gmra.mxu3 %v519_v56  ;;  %v464_v56 = vadd.f32 -0.375, %v2295_v43 }
  0xa3   : > { %v1056_v42 = vpack.c.bf16 %v465_v58, %v464_v56 }
  0xab   : > { %v2496_v61 = vpop.f32.mrf.mxu0 }
  0xac   : > { %v2498_v29 = vpop.f32.mrf.mxu1 }
  0xae   : > { %882 = vmatmul.bf16.vlgmr.msrb.gmra.mxu2 %v2844_v37  ;;  %1172 = vmatmul.bf16.vlgmr.msrb.gmra.mxu0 %v1052_v26 }
  0xaf   : > { %1261 = vmatmul.bf16.vlgmr.msrb.gmra.mxu1 %v1052_v26 }
  0xb1   : > { %971 = vmatmul.bf16.vlgmr.msrb.gmra.mxu3 %v2844_v37  ;;  %v2506_v7 = vpop.f32.mrf.mxu2 }
  0xb3   : > { %v2512_v23 = vpop.f32.mrf.mxu0 }
  0xb4   : > { %v2508_v8 = vpop.f32.mrf.mxu3  ;;  %v2514_v25 = vpop.f32.mrf.mxu1 }
  0xb9   : > { %v2516_v9 = vpop.f32.mrf.mxu2 }
  0xbb   : > { %v2520_v16 = vpop.f32.mrf.mxu0 }
  0xbc   : > { %v2518_v38 = vpop.f32.mrf.mxu3  ;;  %v2522_v53 = vpop.f32.mrf.mxu1 }
  0xbe   : > { %887 = vmatmul.bf16.gmra.mxu2 %v2844_v37  ;;  %1177 = vmatmul.bf16.gmra.mxu0 %v1053_v60 }
  0xbf   : > { %1266 = vmatmul.bf16.gmra.mxu1 %v1053_v60 }
  0xc1   : > { %976 = vmatmul.bf16.gmra.mxu3 %v2844_v37  ;;  %v2530_v2 = vpop.f32.mrf.mxu2 }
  0xc2   : > { %2846 = vst [vmem:[#allocation2_spill] sm:$0xff] %v2530_v2  ;;  %v479_v2 = vadd.f32 -0.375, %v2262_v19 }
  0xc3   : > { %v2536_v28 = vpop.f32.mrf.mxu0 }
  0xc4   : > { %v2532_v1 = vpop.f32.mrf.mxu3  ;;  %v2538_v45 = vpop.f32.mrf.mxu1 }
  0xc5   : > { %2847 = vst [vmem:[#allocation3_spill] sm:$0xff] %v2532_v1  ;;  %v478_v1 = vadd.f32 -0.375, %v2259_v18 }
  0xc9   : > { %v2540_v26 = vpop.f32.mrf.mxu2 }
  0xca   : > { %2848 = vst [vmem:[#allocation4_spill] sm:$0xff] %v2540_v26 }
  0xcb   : > { %v2544_v27 = vpop.f32.mrf.mxu0 }
  0xcc   : > { %v2542_v10 = vpop.f32.mrf.mxu3  ;;  %v2548_v41 = vpop.f32.mrf.mxu1 }
  0xcd   : > { %2849 = vst [vmem:[#allocation5_spill] sm:$0xff] %v2542_v10 }
  0xce   : > { %892 = vmatmul.bf16.gmra.mxu2 %v2844_v37  ;;  %1182 = vmatmul.bf16.gmra.mxu0 %v1054_v30 }
  0xcf   : > { %1271 = vmatmul.bf16.gmra.mxu1 %v1054_v30 }
  0xd1   : > { %981 = vmatmul.bf16.gmra.mxu3 %v2844_v37  ;;  %v2556_v14 = vpop.f32.mrf.mxu2 }
  0xd2   : > { %2850 = vst [vmem:[#allocation6_spill] sm:$0xff] %v2556_v14 }
  0xd3   : > { %v2562_v57 = vpop.f32.mrf.mxu0 }
  0xd4   : > { %v2558_v43 = vpop.f32.mrf.mxu3  ;;  %v2564_v60 = vpop.f32.mrf.mxu1 }
  0xd5   : > { %2851 = vst [vmem:[#allocation7_spill] sm:$0xff] %v2558_v43  ;;  %v477_v43 = vadd.f32 -0.375, %v2210_v49 }
  0xd9   : > { %v2566_v4 = vpop.f32.mrf.mxu2 }
  0xda   : > { %2852 = vst [vmem:[#allocation8_spill] sm:$0xff] %v2566_v4 }
  0xdb   : > { %v2570_v20 = vpop.f32.mrf.mxu0 }
  0xdc   : > { %v2568_v52 = vpop.f32.mrf.mxu3  ;;  %v2574_v31 = vpop.f32.mrf.mxu1 }
  0xdd   : > { %2853 = vst [vmem:[#allocation9_spill] sm:$0xff] %v2568_v52 }
  0xde   : > { %897 = vmatmul.bf16.gmra.mxu2 %v2844_v37  ;;  %1187 = vmatmul.bf16.gmra.mxu0 %v1055_v21 }
  0xdf   : > { %1276 = vmatmul.bf16.gmra.mxu1 %v1055_v21 }
  0xe1   : > { %986 = vmatmul.bf16.gmra.mxu3 %v2844_v37  ;;  %v2578_v24 = vpop.f32.mrf.mxu2 }
  0xe2   : > { %2854 = vst [vmem:[#allocation10_spill] sm:$0xff] %v2578_v24 }
  0xe3   : > { %v2582_v56 = vpop.f32.mrf.mxu0 }
  0xe4   : > { %v2580_v30 = vpop.f32.mrf.mxu3  ;;  %v2584_v58 = vpop.f32.mrf.mxu1 }
  0xe5   : > { %2855 = vst [vmem:[#allocation11_spill] sm:$0xff] %v2580_v30 }
  0xe9   : > { %v2586_v33 = vpop.f32.mrf.mxu2 }
  0xea   : > { %2856 = vst [vmem:[#allocation12_spill] sm:$0xff] %v2586_v33 }
  0xeb   : > { %v2590_v59 = vpop.f32.mrf.mxu0 }
  0xec   : > { %v2588_v36 = vpop.f32.mrf.mxu3  ;;  %v2594_v39 = vpop.f32.mrf.mxu1 }
  0xed   : > { %2857 = vst [vmem:[#allocation13_spill] sm:$0xff] %v2588_v36 }
  0xee   : > { %902 = vmatmul.bf16.gmra.mxu2 %v2844_v37  ;;  %1192 = vmatmul.bf16.gmra.mxu0 %v1056_v42 }
  0xef   : > { %1281 = vmatmul.bf16.gmra.mxu1 %v1056_v42  ;;  %v1059_v42 = vpack.c.bf16 %v471_v44, %v470_v13  ;;  %v472_v13 = vadd.f32 -0.375, %v2118_v62  ;;  %v473_v44 = vadd.f32 -0.375, %v2120_v63 }
  0xf1   : > { %991 = vmatmul.bf16.gmra.mxu3 %v2844_v37  ;;  %v2598_v15 = vpop.f32.mrf.mxu2 }
  0xf2   : > { %2858 = vst [vmem:[#allocation14_spill] sm:$0xff] %v2598_v15  ;;  %v2862_v15 = vmov 1065369472  }
  0xf3   : > { %v2602_v22 = vpop.f32.mrf.mxu0 }
  0xf4   : > { %v2600_v21 = vpop.f32.mrf.mxu3  ;;  %v2604_v46 = vpop.f32.mrf.mxu1 }
  0xf5   : > { %2859 = vst [vmem:[#allocation15_spill] sm:$0xff] %v2600_v21 }
  0xf9   : > { %v2606_v47 = vpop.f32.mrf.mxu2 }
  0xfa   : > { %2860 = vst [vmem:[#allocation16_spill] sm:$0xff] %v2606_v47 }
  0xfb   : > { %v2610_v36 = vpop.f32.mrf.mxu0 }
  0xfc   : > { %v2608_v50 = vpop.f32.mrf.mxu3  ;;  %v2614_v37 = vpop.f32.mrf.mxu1 }
  0xfd   : > { %2861 = vst [vmem:[#allocation17_spill] sm:$0xff] %v2608_v50 }
  0xfe   : > { %907 = vmatmul.bf16.gmra.mxu2 %v2862_v15  ;;  %1197 = vmatmul.bf16.gmra.mxu0 %v1057_v32 }
  0xff   : > { %1286 = vmatmul.bf16.gmra.mxu1 %v1057_v32  ;;  %v1060_v32 = vpack.c.bf16 %v473_v44, %v472_v13  ;;  %v474_v13 = vadd.f32 -0.375, %v2148_v11  ;;  %v475_v44 = vadd.f32 -0.375, %v2151_v12 }
 0x101   : > { %996 = vmatmul.bf16.gmra.mxu3 %v2862_v15  ;;  %v2618_v21 = vpop.f32.mrf.mxu2 }
 0x102   : > { %2863 = vst [vmem:[#allocation18_spill] sm:$0xff] %v2618_v21 }
 0x103   : > { %v2622_v50 = vpop.f32.mrf.mxu0 }
 0x104   : > { %v2620_v47 = vpop.f32.mrf.mxu3  ;;  %v2624_v33 = vpop.f32.mrf.mxu1 }
 0x105   : > { %2864 = vst [vmem:[#allocation19_spill] sm:$0xff] %v2620_v47 }
 0x109   : > { %v2626_v34 = vpop.f32.mrf.mxu2 }
 0x10a   : > { %2865 = vst [vmem:[#allocation20_spill] sm:$0xff] %v2626_v34 }
 0x10b   : > { %v2630_v30 = vpop.f32.mrf.mxu0 }
 0x10c   : > { %v2628_v35 = vpop.f32.mrf.mxu3  ;;  %v2634_v24 = vpop.f32.mrf.mxu1 }
 0x10d   : > { %2866 = vst [vmem:[#allocation21_spill] sm:$0xff] %v2628_v35 }
 0x10e   : > { %912 = vmatmul.bf16.gmra.mxu2 %v2862_v15  ;;  %1202 = vmatmul.bf16.gmra.mxu0 %v1058_v3 }
 0x10f   : > { %1291 = vmatmul.bf16.gmra.mxu1 %v1058_v3  ;;  %v1061_v3 = vpack.c.bf16 %v475_v44, %v474_v13  ;;  %v476_v44 = vadd.f32 -0.375, %v2207_v48 }
 0x111   : > { %1001 = vmatmul.bf16.gmra.mxu3 %v2862_v15  ;;  %v2638_v47 = vpop.f32.mrf.mxu2 }
 0x112   : > { %2867 = vst [vmem:[#allocation22_spill] sm:$0xff] %v2638_v47 }
 0x113   : > { %v2642_v35 = vpop.f32.mrf.mxu0 }
 0x114   : > { %v2640_v34 = vpop.f32.mrf.mxu3  ;;  %v2644_v21 = vpop.f32.mrf.mxu1 }
 0x115   : > { %2868 = vst [vmem:[#allocation23_spill] sm:$0xff] %v2640_v34 }
 0x119   : > { %v2646_v62 = vpop.f32.mrf.mxu2 }
 0x11a   : > { %2869 = vst [vmem:[#allocation24_spill] sm:$0xff] %v2646_v62 }
 0x11b   : > { %v2650_v52 = vpop.f32.mrf.mxu0 }
 0x11c   : > { %v2648_v63 = vpop.f32.mrf.mxu3  ;;  %v2654_v4 = vpop.f32.mrf.mxu1 }
 0x11d   : > { %2870 = vst [vmem:[#allocation25_spill] sm:$0xff] %v2648_v63 }
 0x11e   : > { %917 = vmatmul.bf16.gmra.mxu2 %v2862_v15  ;;  %1207 = vmatmul.bf16.gmra.mxu0 %v1059_v42 }
 0x11f   : > { %1296 = vmatmul.bf16.gmra.mxu1 %v1059_v42  ;;  %v1062_v42 = vpack.c.bf16 %v477_v43, %v476_v44 }
 0x121   : > { %1006 = vmatmul.bf16.gmra.mxu3 %v2862_v15  ;;  %v2658_v34 = vpop.f32.mrf.mxu2 }
 0x122   : > { %2871 = vst [vmem:[#allocation26_spill] sm:$0xff] %v2658_v34 }
 0x123   : > { %v2662_v63 = vpop.f32.mrf.mxu0 }
 0x124   : > { %v2660_v62 = vpop.f32.mrf.mxu3  ;;  %v2664_v47 = vpop.f32.mrf.mxu1 }
 0x125   : > { %2872 = vst [vmem:[#allocation27_spill] sm:$0xff] %v2660_v62 }
 0x129   : > { %v2666_v11 = vpop.f32.mrf.mxu2 }
 0x12a   : > { %2873 = vst [vmem:[#allocation28_spill] sm:$0xff] %v2666_v11 }
 0x12b   : > { %v1173_v13 = vpop.f32.mrf.mxu0 }
 0x12c   : > { %v2668_v12 = vpop.f32.mrf.mxu3  ;;  %v1262_v14 = vpop.f32.mrf.mxu1 }
 0x12d   : > { %2874 = vst [vmem:[#allocation29_spill] sm:$0xff] %v2668_v12 }
 0x12e   : > { %922 = vmatmul.bf16.gmra.mxu2 %v2862_v15  ;;  %1212 = vmatmul.bf16.gmra.mxu0 %v1060_v32 }
 0x12f   : > { %1301 = vmatmul.bf16.gmra.mxu1 %v1060_v32 }
 0x131   : > { %1011 = vmatmul.bf16.gmra.mxu3 %v2862_v15  ;;  %v883_v62 = vpop.f32.mrf.mxu2 }
 0x132   : > { %v884_v34 = vadd.f32 %v883_v62, %v2496_v61 }
 0x133   : > { %v1175_v49 = vpop.f32.mrf.mxu0 }
 0x134   : > { %v972_v11 = vpop.f32.mrf.mxu3  ;;  %v1342_v43 = vadd.f32 %v1173_v13, %v884_v34  ;;  %v1264_v44 = vpop.f32.mrf.mxu1  ;;  %v1063_v13 = vpack.c.bf16 %v479_v2, %v478_v1 }
 0x135   : > { %v973_v48 = vadd.f32 %v972_v11, %v2498_v29 }
 0x136   : > { %1406 = vst [vmem:[%s2679_s26] sm:$0xff] %v1342_v43 }
 0x137   : > { %v1343_v12 = vadd.f32 %v1262_v14, %v973_v48 }
 0x139   : > { %1407 = vst [vmem:[%s2679_s26 + $0x8] sm:$0xff] %v1343_v12  ;;  %v885_v32 = vpop.f32.mrf.mxu2 }
 0x13a   : > { %v886_v61 = vadd.f32 %v885_v32, %v2512_v23 }
 0x13b   : > { %v1178_v26 = vpop.f32.mrf.mxu0 }
 0x13c   : > { %v974_v62 = vpop.f32.mrf.mxu3  ;;  %v1344_v29 = vadd.f32 %v1175_v49, %v886_v61  ;;  %v1267_v11 = vpop.f32.mrf.mxu1 }
 0x13d   : > { %v975_v10 = vadd.f32 %v974_v62, %v2514_v25 }
 0x13e   : > { %1408 = vst [vmem:[%s2679_s26 + $0x10] sm:$0xff] %v1344_v29  ;;  %927 = vmatmul.bf16.gmra.mxu2 %v2862_v15  ;;  %1217 = vmatmul.bf16.gmra.mxu0 %v1061_v3 }
 0x13f   : > { %v1345_v34 = vadd.f32 %v1264_v44, %v975_v10  ;;  %1306 = vmatmul.bf16.gmra.mxu1 %v1061_v3  ;;  %v481_v44 = vadd.f32 -0.375, %v2325_v5 }
 0x141   : > { %1409 = vst [vmem:[%s2679_s26 + $0x18] sm:$0xff] %v1345_v34  ;;  %1016 = vmatmul.bf16.gmra.mxu3 %v2862_v15  ;;  %v888_v23 = vpop.f32.mrf.mxu2 }
 0x142   : > { %v889_v25 = vadd.f32 %v888_v23, %v2520_v16  ;;  %v480_v16 = vadd.f32 -0.375, %v2322_v0 }
 0x143   : > { %v1180_v14 = vpop.f32.mrf.mxu0 }
 0x144   : > { %v977_v18 = vpop.f32.mrf.mxu3  ;;  %v1346_v12 = vadd.f32 %v1178_v26, %v889_v25  ;;  %v1269_v10 = vpop.f32.mrf.mxu1  ;;  %v1064_v61 = vpack.c.bf16 %v481_v44, %v480_v16 }
 0x145   : > { %v978_v19 = vadd.f32 %v977_v18, %v2522_v53 }
 0x146   : > { %1410 = vst [vmem:[%s2679_s26 + $0x20] sm:$0xff] %v1346_v12 }
 0x147   : > { %v1347_v2 = vadd.f32 %v1267_v11, %v978_v19 }
 0x149   : > { %1411 = vst [vmem:[%s2679_s26 + $0x28] sm:$0xff] %v1347_v2  ;;  %v890_v1 = vpop.f32.mrf.mxu2 }
 0x14a   : > { %v891_v48 = vadd.f32 %v890_v1, %v2536_v28 }
 0x14b   : > { %v1183_v43 = vpop.f32.mrf.mxu0 }
 0x14c   : > { %v979_v49 = vpop.f32.mrf.mxu3  ;;  %v1348_v53 = vadd.f32 %v1180_v14, %v891_v48  ;;  %v1272_v32 = vpop.f32.mrf.mxu1  ;;  %v483_v14 = vadd.f32 -0.375, %v2385_v6 }
 0x14d   : > { %v980_v3 = vadd.f32 %v979_v49, %v2538_v45 }
 0x14e   : > { %1412 = vst [vmem:[%s2679_s26 + $0x30] sm:$0xff] %v1348_v53  ;;  %932 = vmatmul.bf16.gmra.mxu2 %v2862_v15  ;;  %1222 = vmatmul.bf16.gmra.mxu0 %v1062_v42 }
 0x14f   : > { %v1349_v26 = vadd.f32 %v1269_v10, %v980_v3  ;;  %1311 = vmatmul.bf16.gmra.mxu1 %v1062_v42 }
 0x151   : > { %1413 = vst [vmem:[%s2679_s26 + $0x38] sm:$0xff] %v1349_v26  ;;  %1021 = vmatmul.bf16.gmra.mxu3 %v2862_v15  ;;  %v893_v28 = vpop.f32.mrf.mxu2 }
 0x152   : > { %v894_v45 = vadd.f32 %v893_v28, %v2544_v27  ;;  %v482_v27 = vadd.f32 -0.375, %v2382_v40 }
 0x153   : > { %v1185_v62 = vpop.f32.mrf.mxu0 }
 0x154   : > { %v982_v0 = vpop.f32.mrf.mxu3  ;;  %v1350_v29 = vadd.f32 %v1183_v43, %v894_v45  ;;  %v1274_v11 = vpop.f32.mrf.mxu1  ;;  %v1065_v2 = vpack.c.bf16 %v483_v14, %v482_v27 }
 0x155   : > { %v983_v5 = vadd.f32 %v982_v0, %v2548_v41 }
 0x156   : > { %1414 = vst [vmem:[%s2679_s26 + $0x40] sm:$0xff] %v1350_v29 }
 0x157   : > { %v1351_v34 = vadd.f32 %v1272_v32, %v983_v5  ;;  %v485_v32 = vadd.f32 -0.375, %v2435_v17 }
 0x159   : > { %1415 = vst [vmem:[%s2679_s26 + $0x48] sm:$0xff] %v1351_v34  ;;  %v895_v23 = vpop.f32.mrf.mxu2 }
 0x15a   : > { %v896_v25 = vadd.f32 %v895_v23, %v2562_v57 }
 0x15b   : > { %v1188_v19 = vpop.f32.mrf.mxu0 }
 0x15c   : > { %v984_v18 = vpop.f32.mrf.mxu3  ;;  %v1352_v41 = vadd.f32 %v1185_v62, %v896_v25  ;;  %v1277_v12 = vpop.f32.mrf.mxu1 }
 0x15d   : > { %v985_v42 = vadd.f32 %v984_v18, %v2564_v60  ;;  %v487_v18 = vadd.f32 -0.375, %v2473_v55 }
 0x15e   : > { %1416 = vst [vmem:[%s2679_s26 + $0x50] sm:$0xff] %v1352_v41  ;;  %937 = vmatmul.bf16.gmra.mxu2 %v2862_v15  ;;  %1227 = vmatmul.bf16.gmra.mxu0 %v1063_v13 }
 0x15f   : > { %v1353_v10 = vadd.f32 %v1274_v11, %v985_v42  ;;  %1316 = vmatmul.bf16.gmra.mxu1 %v1063_v13 }
 0x161   : > { %1417 = vst [vmem:[%s2679_s26 + $0x58] sm:$0xff] %v1353_v10  ;;  %1026 = vmatmul.bf16.gmra.mxu3 %v2862_v15  ;;  %v898_v57 = vpop.f32.mrf.mxu2 }
 0x162   : > { %v899_v60 = vadd.f32 %v898_v57, %v2570_v20  ;;  %v484_v20 = vadd.f32 -0.375, %v2432_v54 }
 0x163   : > { %v1190_v1 = vpop.f32.mrf.mxu0 }
 0x164   : > { %v987_v40 = vpop.f32.mrf.mxu3  ;;  %v1354_v48 = vadd.f32 %v1188_v19, %v899_v60  ;;  %v1279_v49 = vpop.f32.mrf.mxu1  ;;  %v1066_v45 = vpack.c.bf16 %v485_v32, %v484_v20 }
 0x165   : > { %v988_v6 = vadd.f32 %v987_v40, %v2574_v31 }
 0x166   : > { %1418 = vst [vmem:[%s2679_s26 + $0x60] sm:$0xff] %v1354_v48 }
 0x167   : > { %v1355_v3 = vadd.f32 %v1277_v12, %v988_v6 }
 0x169   : > { %1419 = vst [vmem:[%s2679_s26 + $0x68] sm:$0xff] %v1355_v3  ;;  %v900_v43 = vpop.f32.mrf.mxu2 }
 0x16a   : > { %v901_v16 = vadd.f32 %v900_v43, %v2582_v56 }
 0x16b   : > { %v1193_v53 = vpop.f32.mrf.mxu0 }
 0x16c   : > { %v989_v44 = vpop.f32.mrf.mxu3  ;;  %v1356_v31 = vadd.f32 %v1190_v1, %v901_v16  ;;  %v1282_v26 = vpop.f32.mrf.mxu1 }
 0x16d   : > { %v990_v13 = vadd.f32 %v989_v44, %v2584_v58 }
 0x16e   : > { %1420 = vst [vmem:[%s2679_s26 + $0x70] sm:$0xff] %v1356_v31  ;;  %942 = vmatmul.bf16.gmra.mxu2 %v2862_v15  ;;  %1232 = vmatmul.bf16.gmra.mxu0 %v1064_v61 }
 0x16f   : > { %v1357_v28 = vadd.f32 %v1279_v49, %v990_v13  ;;  %1321 = vmatmul.bf16.gmra.mxu1 %v1064_v61 }
 0x171   : > { %1421 = vst [vmem:[%s2679_s26 + $0x78] sm:$0xff] %v1357_v28  ;;  %1031 = vmatmul.bf16.gmra.mxu3 %v2862_v15  ;;  %v903_v56 = vpop.f32.mrf.mxu2 }
 0x172   : > { %v904_v58 = vadd.f32 %v903_v56, %v2590_v59  ;;  %v486_v59 = vadd.f32 -0.375, %v2471_v51 }
 0x173   : > { %v1195_v0 = vpop.f32.mrf.mxu0 }
 0x174   : > { %v992_v54 = vpop.f32.mrf.mxu3  ;;  %v1358_v5 = vadd.f32 %v1193_v53, %v904_v58  ;;  %v1284_v62 = vpop.f32.mrf.mxu1  ;;  %v1067_v27 = vpack.c.bf16 %v487_v18, %v486_v59 }
 0x175   : > { %v993_v17 = vadd.f32 %v992_v54, %v2594_v39 }
 0x176   : > { %1422 = vst [vmem:[%s2679_s26 + $0x80] sm:$0xff] %v1358_v5 }
 0x177   : > { %v1359_v29 = vadd.f32 %v1282_v26, %v993_v17 }
 0x179   : > { %1423 = vst [vmem:[%s2679_s26 + $0x88] sm:$0xff] %v1359_v29  ;;  %v905_v11 = vpop.f32.mrf.mxu2 }
 0x17a   : > { %v906_v34 = vadd.f32 %v905_v11, %v2602_v22 }
 0x17b   : > { %v1198_v25 = vpop.f32.mrf.mxu0 }
 0x17c   : > { %v994_v23 = vpop.f32.mrf.mxu3  ;;  %v1360_v39 = vadd.f32 %v1195_v0, %v906_v34  ;;  %v1287_v42 = vpop.f32.mrf.mxu1 }
 0x17d   : > { %v995_v61 = vadd.f32 %v994_v23, %v2604_v46 }
 0x17e   : > { %1424 = vst [vmem:[%s2679_s26 + $0x90] sm:$0xff] %v1360_v39  ;;  %947 = vmatmul.bf16.gmra.mxu2 %v2862_v15  ;;  %1237 = vmatmul.bf16.gmra.mxu0 %v1065_v2 }
 0x17f   : > { %v1361_v19 = vadd.f32 %v1284_v62, %v995_v61  ;;  %1326 = vmatmul.bf16.gmra.mxu1 %v1065_v2 }
 0x181   : > { %1425 = vst [vmem:[%s2679_s26 + $0x98] sm:$0xff] %v1361_v19  ;;  %1036 = vmatmul.bf16.gmra.mxu3 %v2862_v15  ;;  %v908_v22 = vpop.f32.mrf.mxu2 }
 0x182   : > { %v909_v46 = vadd.f32 %v908_v22, %v2610_v36 }
 0x183   : > { %v1200_v14 = vpop.f32.mrf.mxu0 }
 0x184   : > { %v997_v51 = vpop.f32.mrf.mxu3  ;;  %v1362_v41 = vadd.f32 %v1198_v25, %v909_v46  ;;  %v1289_v12 = vpop.f32.mrf.mxu1 }
 0x185   : > { %v998_v55 = vadd.f32 %v997_v51, %v2614_v37 }
 0x186   : > { %1426 = vst [vmem:[%s2679_s26 + $0xa0] sm:$0xff] %v1362_v41 }
 0x187   : > { %v1363_v10 = vadd.f32 %v1287_v42, %v998_v55  ;;  %v2875_v55 = vld [vmem:[#allocation2_spill] sm:$0xff] }
 0x189   : > { %1427 = vst [vmem:[%s2679_s26 + $0xa8] sm:$0xff] %v1363_v10  ;;  %v910_v57 = vpop.f32.mrf.mxu2 }
 0x18a   : > { %v911_v60 = vadd.f32 %v910_v57, %v2622_v50 }
 0x18b   : > { %v1203_v6 = vpop.f32.mrf.mxu0 }
 0x18c   : > { %v999_v40 = vpop.f32.mrf.mxu3  ;;  %v1364_v1 = vadd.f32 %v1200_v14, %v911_v60  ;;  %v1292_v36 = vpop.f32.mrf.mxu1 }
 0x18d   : > { %v1000_v2 = vadd.f32 %v999_v40, %v2624_v33 }
 0x18e   : > { %1428 = vst [vmem:[%s2679_s26 + $0xb0] sm:$0xff] %v1364_v1  ;;  %952 = vmatmul.bf16.gmra.mxu2 %v2862_v15  ;;  %1242 = vmatmul.bf16.gmra.mxu0 %v1066_v45 }
 0x18f   : > { %v1365_v48 = vadd.f32 %v1289_v12, %v1000_v2  ;;  %1331 = vmatmul.bf16.gmra.mxu1 %v1066_v45  ;;  %v2876_v12 = vld [vmem:[#allocation3_spill] sm:$0xff]  ;;  %v2877_v2 = vld [vmem:[#allocation4_spill] sm:$0xff] }
 0x191   : > { %1429 = vst [vmem:[%s2679_s26 + $0xb8] sm:$0xff] %v1365_v48  ;;  %1041 = vmatmul.bf16.gmra.mxu3 %v2862_v15  ;;  %v913_v37 = vpop.f32.mrf.mxu2 }
 0x192   : > { %v914_v50 = vadd.f32 %v913_v37, %v2630_v30 }
 0x193   : > { %v1205_v3 = vpop.f32.mrf.mxu0 }
 0x194   : > { %v1002_v49 = vpop.f32.mrf.mxu3  ;;  %v1366_v43 = vadd.f32 %v1203_v6, %v914_v50  ;;  %v1294_v16 = vpop.f32.mrf.mxu1 }
 0x195   : > { %v1003_v33 = vadd.f32 %v1002_v49, %v2634_v24 }
 0x196   : > { %1430 = vst [vmem:[%s2679_s26 + $0xc0] sm:$0xff] %v1366_v43  ;;  %v2879_v43 = vld [vmem:[#allocation6_spill] sm:$0xff] }
 0x197   : > { %v1367_v44 = vadd.f32 %v1292_v36, %v1003_v33  ;;  %v2878_v36 = vld [vmem:[#allocation5_spill] sm:$0xff] }
 0x199   : > { %1431 = vst [vmem:[%s2679_s26 + $0xc8] sm:$0xff] %v1367_v44  ;;  %v915_v13 = vpop.f32.mrf.mxu2 }
 0x19a   : > { %v916_v53 = vadd.f32 %v915_v13, %v2642_v35  ;;  %v2880_v13 = vld [vmem:[#allocation7_spill] sm:$0xff] }
 0x19b   : > { %v1208_v31 = vpop.f32.mrf.mxu0 }
 0x19c   : > { %v1004_v20 = vpop.f32.mrf.mxu3  ;;  %v1368_v26 = vadd.f32 %v1205_v3, %v916_v53  ;;  %v1297_v30 = vpop.f32.mrf.mxu1 }
 0x19d   : > { %v1005_v32 = vadd.f32 %v1004_v20, %v2644_v21 }
 0x19e   : > { %1432 = vst [vmem:[%s2679_s26 + $0xd0] sm:$0xff] %v1368_v26  ;;  %957 = vmatmul.bf16.gmra.mxu2 %v2862_v15  ;;  %1247 = vmatmul.bf16.gmra.mxu0 %v1067_v27 }
 0x19f   : > { %v1369_v28 = vadd.f32 %v1294_v16, %v1005_v32  ;;  %1336 = vmatmul.bf16.gmra.mxu1 %v1067_v27 }
 0x1a1   : > { %1433 = vst [vmem:[%s2679_s26 + $0xd8] sm:$0xff] %v1369_v28  ;;  %1046 = vmatmul.bf16.gmra.mxu3 %v2862_v15  ;;  %v918_v24 = vpop.f32.mrf.mxu2  ;;  %v2881_v28 = vld [vmem:[#allocation8_spill] sm:$0xff] }
 0x1a2   : > { %v919_v35 = vadd.f32 %v918_v24, %v2650_v52 }
 0x1a3   : > { %v1210_v56 = vpop.f32.mrf.mxu0 }
 0x1a4   : > { %v1007_v45 = vpop.f32.mrf.mxu3  ;;  %v1370_v58 = vadd.f32 %v1208_v31, %v919_v35  ;;  %v1299_v54 = vpop.f32.mrf.mxu1 }
 0x1a5   : > { %v1008_v21 = vadd.f32 %v1007_v45, %v2654_v4  ;;  %v2882_v45 = vld [vmem:[#allocation9_spill] sm:$0xff] }
 0x1a6   : > { %1434 = vst [vmem:[%s2679_s26 + $0xe0] sm:$0xff] %v1370_v58 }
 0x1a7   : > { %v1371_v17 = vadd.f32 %v1297_v30, %v1008_v21 }
 0x1a9   : > { %1435 = vst [vmem:[%s2679_s26 + $0xe8] sm:$0xff] %v1371_v17  ;;  %v920_v0 = vpop.f32.mrf.mxu2 }
 0x1aa   : > { %v921_v5 = vadd.f32 %v920_v0, %v2662_v63 }
 0x1ab   : > { %v1213_v52 = vpop.f32.mrf.mxu0 }
 0x1ac   : > { %v1009_v62 = vpop.f32.mrf.mxu3  ;;  %v1372_v29 = vadd.f32 %v1210_v56, %v921_v5  ;;  %v1302_v11 = vpop.f32.mrf.mxu1  ;;  %v2883_v5 = vld [vmem:[#allocation10_spill] sm:$0xff] }
 0x1ad   : > { %v1010_v15 = vadd.f32 %v1009_v62, %v2664_v47 }
 0x1ae   : > { %1436 = vst [vmem:[%s2679_s26 + $0xf0] sm:$0xff] %v1372_v29 }
 0x1af   : > { %v1373_v34 = vadd.f32 %v1299_v54, %v1010_v15 }
 0x1b1   : > { %1437 = vst [vmem:[%s2679_s26 + $0xf8] sm:$0xff] %v1373_v34  ;;  %v923_v4 = vpop.f32.mrf.mxu2 }
 0x1b2   : > { %v924_v23 = vadd.f32 %v923_v4, %v2506_v7 }
 0x1b3   : > { %v1215_v63 = vpop.f32.mrf.mxu0 }
 0x1b4   : > { %v1012_v61 = vpop.f32.mrf.mxu3  ;;  %v1374_v59 = vadd.f32 %v1213_v52, %v924_v23  ;;  %v1304_v18 = vpop.f32.mrf.mxu1  ;;  %v2884_v52 = vld [vmem:[#allocation11_spill] sm:$0xff] }
 0x1b5   : > { %v1013_v25 = vadd.f32 %v1012_v61, %v2508_v8 }
 0x1b6   : > { %1438 = vst [vmem:[%s2679_s26 + $0x100] sm:$0xff] %v1374_v59 }
 0x1b7   : > { %v1375_v39 = vadd.f32 %v1302_v11, %v1013_v25  ;;  %v2885_v25 = vld [vmem:[#allocation12_spill] sm:$0xff] }
 0x1b9   : > { %1439 = vst [vmem:[%s2679_s26 + $0x108] sm:$0xff] %v1375_v39  ;;  %v925_v47 = vpop.f32.mrf.mxu2 }
 0x1ba   : > { %v926_v42 = vadd.f32 %v925_v47, %v2516_v9 }
 0x1bb   : > { %v1218_v7 = vpop.f32.mrf.mxu0 }
 0x1bc   : > { %v1014_v19 = vpop.f32.mrf.mxu3  ;;  %v1376_v22 = vadd.f32 %v1215_v63, %v926_v42  ;;  %v1307_v46 = vpop.f32.mrf.mxu1 }
 0x1bd   : > { %v1015_v27 = vadd.f32 %v1014_v19, %v2518_v38 }
 0x1be   : > { %1440 = vst [vmem:[%s2679_s26 + $0x110] sm:$0xff] %v1376_v22  ;;  %v2887_v22 = vld [vmem:[#allocation14_spill] sm:$0xff] }
 0x1bf   : > { %v1377_v51 = vadd.f32 %v1304_v18, %v1015_v27  ;;  %v2886_v18 = vld [vmem:[#allocation13_spill] sm:$0xff] }
 0x1c1   : > { %1441 = vst [vmem:[%s2679_s26 + $0x118] sm:$0xff] %v1377_v51  ;;  %v928_v8 = vpop.f32.mrf.mxu2 }
 0x1c2   : > { %v929_v14 = vadd.f32 %v928_v8, %v2875_v55  ;;  %v2888_v8 = vld [vmem:[#allocation15_spill] sm:$0xff] }
 0x1c3   : > { %v1220_v9 = vpop.f32.mrf.mxu0 }
 0x1c4   : > { %v1017_v41 = vpop.f32.mrf.mxu3  ;;  %v1378_v57 = vadd.f32 %v1218_v7, %v929_v14  ;;  %v1309_v60 = vpop.f32.mrf.mxu1 }
 0x1c5   : > { %v1018_v10 = vadd.f32 %v1017_v41, %v2876_v12 }
 0x1c6   : > { %1442 = vst [vmem:[%s2679_s26 + $0x120] sm:$0xff] %v1378_v57  ;;  %v2889_v57 = vld [vmem:[#allocation16_spill] sm:$0xff] }
 0x1c7   : > { %v1379_v40 = vadd.f32 %v1307_v46, %v1018_v10 }
 0x1c9   : > { %1443 = vst [vmem:[%s2679_s26 + $0x128] sm:$0xff] %v1379_v40  ;;  %v930_v38 = vpop.f32.mrf.mxu2 }
 0x1ca   : > { %v931_v6 = vadd.f32 %v930_v38, %v2877_v2  ;;  %v2890_v38 = vld [vmem:[#allocation17_spill] sm:$0xff] }
 0x1cb   : > { %v1223_v37 = vpop.f32.mrf.mxu0 }
 0x1cc   : > { %v1019_v1 = vpop.f32.mrf.mxu3  ;;  %v1380_v50 = vadd.f32 %v1220_v9, %v931_v6  ;;  %v1312_v49 = vpop.f32.mrf.mxu1 }
 0x1cd   : > { %v1020_v48 = vadd.f32 %v1019_v1, %v2878_v36 }
 0x1ce   : > { %1444 = vst [vmem:[%s2679_s26 + $0x130] sm:$0xff] %v1380_v50  ;;  %v2891_v50 = vld [vmem:[#allocation18_spill] sm:$0xff] }
 0x1cf   : > { %v1381_v33 = vadd.f32 %v1309_v60, %v1020_v48 }
 0x1d1   : > { %1445 = vst [vmem:[%s2679_s26 + $0x138] sm:$0xff] %v1381_v33  ;;  %v933_v3 = vpop.f32.mrf.mxu2 }
 0x1d2   : > { %v934_v16 = vadd.f32 %v933_v3, %v2879_v43  ;;  %v2892_v3 = vld [vmem:[#allocation19_spill] sm:$0xff] }
 0x1d3   : > { %v1225_v20 = vpop.f32.mrf.mxu0 }
 0x1d4   : > { %v1022_v44 = vpop.f32.mrf.mxu3  ;;  %v1382_v32 = vadd.f32 %v1223_v37, %v934_v16  ;;  %v1314_v31 = vpop.f32.mrf.mxu1 }
 0x1d5   : > { %v1023_v53 = vadd.f32 %v1022_v44, %v2880_v13 }
 0x1d6   : > { %1446 = vst [vmem:[%s2679_s26 + $0x140] sm:$0xff] %v1382_v32  ;;  %v2893_v32 = vld [vmem:[#allocation20_spill] sm:$0xff] }
 0x1d7   : > { %v1383_v26 = vadd.f32 %v1312_v49, %v1023_v53 }
 0x1d9   : > { %1447 = vst [vmem:[%s2679_s26 + $0x148] sm:$0xff] %v1383_v26  ;;  %v935_v30 = vpop.f32.mrf.mxu2 }
 0x1da   : > { %v936_v24 = vadd.f32 %v935_v30, %v2881_v28  ;;  %v2894_v30 = vld [vmem:[#allocation21_spill] sm:$0xff] }
 0x1db   : > { %v1228_v56 = vpop.f32.mrf.mxu0 }
 0x1dc   : > { %v1024_v35 = vpop.f32.mrf.mxu3  ;;  %v1384_v58 = vadd.f32 %v1225_v20, %v936_v24  ;;  %v1317_v54 = vpop.f32.mrf.mxu1 }
 0x1dd   : > { %v1025_v21 = vadd.f32 %v1024_v35, %v2882_v45 }
 0x1de   : > { %1448 = vst [vmem:[%s2679_s26 + $0x150] sm:$0xff] %v1384_v58  ;;  %v2895_v58 = vld [vmem:[#allocation22_spill] sm:$0xff] }
 0x1df   : > { %v1385_v17 = vadd.f32 %v1314_v31, %v1025_v21 }
 0x1e1   : > { %1449 = vst [vmem:[%s2679_s26 + $0x158] sm:$0xff] %v1385_v17  ;;  %v938_v0 = vpop.f32.mrf.mxu2 }
 0x1e2   : > { %v939_v62 = vadd.f32 %v938_v0, %v2883_v5  ;;  %v2896_v0 = vld [vmem:[#allocation23_spill] sm:$0xff] }
 0x1e3   : > { %v1230_v11 = vpop.f32.mrf.mxu0 }
 0x1e4   : > { %v1027_v15 = vpop.f32.mrf.mxu3  ;;  %v1386_v34 = vadd.f32 %v1228_v56, %v939_v62  ;;  %v1319_v4 = vpop.f32.mrf.mxu1 }
 0x1e5   : > { %v1028_v29 = vadd.f32 %v1027_v15, %v2884_v52 }
 0x1e6   : > { %1450 = vst [vmem:[%s2679_s26 + $0x160] sm:$0xff] %v1386_v34  ;;  %v2897_v34 = vld [vmem:[#allocation24_spill] sm:$0xff] }
 0x1e7   : > { %v1387_v23 = vadd.f32 %v1317_v54, %v1028_v29 }
 0x1e9   : > { %1451 = vst [vmem:[%s2679_s26 + $0x168] sm:$0xff] %v1387_v23  ;;  %v940_v61 = vpop.f32.mrf.mxu2 }
 0x1ea   : > { %v941_v63 = vadd.f32 %v940_v61, %v2885_v25  ;;  %v2898_v61 = vld [vmem:[#allocation25_spill] sm:$0xff] }
 0x1eb   : > { %v1233_v47 = vpop.f32.mrf.mxu0 }
 0x1ec   : > { %v1029_v59 = vpop.f32.mrf.mxu3  ;;  %v1388_v42 = vadd.f32 %v1230_v11, %v941_v63  ;;  %v1322_v19 = vpop.f32.mrf.mxu1 }
 0x1ed   : > { %v1030_v39 = vadd.f32 %v1029_v59, %v2886_v18 }
 0x1ee   : > { %1452 = vst [vmem:[%s2679_s26 + $0x170] sm:$0xff] %v1388_v42  ;;  %v2899_v42 = vld [vmem:[#allocation26_spill] sm:$0xff] }
 0x1ef   : > { %v1389_v27 = vadd.f32 %v1319_v4, %v1030_v39 }
 0x1f1   : > { %1453 = vst [vmem:[%s2679_s26 + $0x178] sm:$0xff] %v1389_v27  ;;  %v943_v7 = vpop.f32.mrf.mxu2 }
 0x1f2   : > { %v944_v46 = vadd.f32 %v943_v7, %v2887_v22  ;;  %v2900_v7 = vld [vmem:[#allocation27_spill] sm:$0xff] }
 0x1f3   : > { %v1235_v14 = vpop.f32.mrf.mxu0 }
 0x1f4   : > { %v1032_v51 = vpop.f32.mrf.mxu3  ;;  %v1390_v41 = vadd.f32 %v1233_v47, %v944_v46  ;;  %v1324_v12 = vpop.f32.mrf.mxu1 }
 0x1f5   : > { %v1033_v55 = vadd.f32 %v1032_v51, %v2888_v8 }
 0x1f6   : > { %1454 = vst [vmem:[%s2679_s26 + $0x180] sm:$0xff] %v1390_v41 }
 0x1f7   : > { %v1391_v10 = vadd.f32 %v1322_v19, %v1033_v55  ;;  %v2901_v55 = vld [vmem:[#allocation28_spill] sm:$0xff] }
 0x1f9   : > { %1455 = vst [vmem:[%s2679_s26 + $0x188] sm:$0xff] %v1391_v10  ;;  %v945_v9 = vpop.f32.mrf.mxu2  ;;  %v2902_v10 = vld [vmem:[#allocation29_spill] sm:$0xff] }
 0x1fa   : > { %v946_v60 = vadd.f32 %v945_v9, %v2889_v57 }
 0x1fb   : > { %v1238_v6 = vpop.f32.mrf.mxu0 }
 0x1fc   : > { %v1034_v40 = vpop.f32.mrf.mxu3  ;;  %v1392_v1 = vadd.f32 %v1235_v14, %v946_v60  ;;  %v1327_v36 = vpop.f32.mrf.mxu1 }
 0x1fd   : > { %v1035_v2 = vadd.f32 %v1034_v40, %v2890_v38 }
 0x1fe   : > { %1456 = vst [vmem:[%s2679_s26 + $0x190] sm:$0xff] %v1392_v1 }
 0x1ff   : > { %v1393_v48 = vadd.f32 %v1324_v12, %v1035_v2 }
 0x201   : > { %1457 = vst [vmem:[%s2679_s26 + $0x198] sm:$0xff] %v1393_v48  ;;  %v948_v37 = vpop.f32.mrf.mxu2 }
 0x202   : > { %v949_v49 = vadd.f32 %v948_v37, %v2891_v50 }
 0x203   : > { %v1240_v16 = vpop.f32.mrf.mxu0 }
 0x204   : > { %v1037_v33 = vpop.f32.mrf.mxu3  ;;  %v1394_v44 = vadd.f32 %v1238_v6, %v949_v49  ;;  %v1329_v13 = vpop.f32.mrf.mxu1 }
 0x205   : > { %v1038_v43 = vadd.f32 %v1037_v33, %v2892_v3 }
 0x206   : > { %1458 = vst [vmem:[%s2679_s26 + $0x1a0] sm:$0xff] %v1394_v44 }
 0x207   : > { %v1395_v53 = vadd.f32 %v1327_v36, %v1038_v43 }
 0x209   : > { %1459 = vst [vmem:[%s2679_s26 + $0x1a8] sm:$0xff] %v1395_v53  ;;  %v950_v20 = vpop.f32.mrf.mxu2 }
 0x20a   : > { %v951_v31 = vadd.f32 %v950_v20, %v2893_v32 }
 0x20b   : > { %v1243_v45 = vpop.f32.mrf.mxu0 }
 0x20c   : > { %v1039_v26 = vpop.f32.mrf.mxu3  ;;  %v1396_v24 = vadd.f32 %v1240_v16, %v951_v31  ;;  %v1332_v21 = vpop.f32.mrf.mxu1 }
 0x20d   : > { %v1040_v28 = vadd.f32 %v1039_v26, %v2894_v30 }
 0x20e   : > { %1460 = vst [vmem:[%s2679_s26 + $0x1b0] sm:$0xff] %v1396_v24 }
 0x20f   : > { %v1397_v35 = vadd.f32 %v1329_v13, %v1040_v28 }
 0x211   : > { %1461 = vst [vmem:[%s2679_s26 + $0x1b8] sm:$0xff] %v1397_v35  ;;  %v953_v56 = vpop.f32.mrf.mxu2 }
 0x212   : > { %v954_v54 = vadd.f32 %v953_v56, %v2895_v58 }
 0x213   : > { %v1245_v52 = vpop.f32.mrf.mxu0 }
 0x214   : > { %v1042_v17 = vpop.f32.mrf.mxu3  ;;  %v1398_v62 = vadd.f32 %v1243_v45, %v954_v54  ;;  %v1334_v29 = vpop.f32.mrf.mxu1 }
 0x215   : > { %v1043_v5 = vadd.f32 %v1042_v17, %v2896_v0 }
 0x216   : > { %1462 = vst [vmem:[%s2679_s26 + $0x1c0] sm:$0xff] %v1398_v62 }
 0x217   : > { %v1399_v15 = vadd.f32 %v1332_v21, %v1043_v5 }
 0x219   : > { %1463 = vst [vmem:[%s2679_s26 + $0x1c8] sm:$0xff] %v1399_v15  ;;  %v955_v11 = vpop.f32.mrf.mxu2 }
 0x21a   : > { %v956_v4 = vadd.f32 %v955_v11, %v2897_v34 }
 0x21b   : > { %v1248_v18 = vpop.f32.mrf.mxu0 }
 0x21c   : > { %v1044_v23 = vpop.f32.mrf.mxu3  ;;  %v1400_v63 = vadd.f32 %v1245_v52, %v956_v4  ;;  %v1337_v47 = vpop.f32.mrf.mxu1 }
 0x21d   : > { %v1045_v25 = vadd.f32 %v1044_v23, %v2898_v61 }
 0x21e   : > { %1464 = vst [vmem:[%s2679_s26 + $0x1d0] sm:$0xff] %v1400_v63 }
 0x21f   : > { %v1401_v59 = vadd.f32 %v1334_v29, %v1045_v25 }
 0x221   : > { %1465 = vst [vmem:[%s2679_s26 + $0x1d8] sm:$0xff] %v1401_v59  ;;  %v958_v39 = vpop.f32.mrf.mxu2 }
 0x222   : > { %v959_v19 = vadd.f32 %v958_v39, %v2899_v42 }
 0x223   : > { %v1250_v12 = vpop.f32.mrf.mxu0 }
 0x224   : > { %v1047_v27 = vpop.f32.mrf.mxu3  ;;  %v1402_v46 = vadd.f32 %v1248_v18, %v959_v19  ;;  %v1339_v57 = vpop.f32.mrf.mxu1 }
 0x225   : > { %v1048_v22 = vadd.f32 %v1047_v27, %v2900_v7 }
 0x226   : > { %1466 = vst [vmem:[%s2679_s26 + $0x1e0] sm:$0xff] %v1402_v46 }
 0x227   : > { %v1403_v51 = vadd.f32 %v1337_v47, %v1048_v22 }
 0x229   : > { %1467 = vst [vmem:[%s2679_s26 + $0x1e8] sm:$0xff] %v1403_v51  ;;  %v960_v8 = vpop.f32.mrf.mxu2 }
 0x22a   : > { %v961_v14 = vadd.f32 %v960_v8, %v2901_v55 }
 0x22c   : > { %v1049_v41 = vpop.f32.mrf.mxu3  ;;  %v1404_v60 = vadd.f32 %v1250_v12, %v961_v14 }
 0x22d   : > { %v1050_v9 = vadd.f32 %v1049_v41, %v2902_v10 }
 0x22e   : > { %1468 = vst [vmem:[%s2679_s26 + $0x1f0] sm:$0xff] %v1404_v60 }
 0x22f   : > { %v1405_v40 = vadd.f32 %v1339_v57, %v1050_v9 }
 0x231   : > { %1469 = vst [vmem:[%s2679_s26 + $0x1f8] sm:$0xff] %v1405_v40 }
 0x232 PF: > { %s12_s11 = sadd.s32 1, %s1977_s11   ;;  %s2903_s9 = smov %s1973_s10 }
 0x233   : > { %p9_p5 = scmp.ge.s32.totalorder %s12_s11, 4   ;;  %s2904_s10 = smov %s2906_s12 }
 0x235   :  { %11 = sbr.rel (!%p9_p5) target bundleno = 2 (0x2), region = 61 }

// kernel: pointnet_kan_forward.4
= control target key start
LH: loop header
LB: loop body
LE: loop exit
PB: predicated region body
PF: predicated region fallthrough
CT: control target
= control target key end

     0   :  { %s3075_s9 = smov 0   ;;  %s3077_s10 = smov 0   ;;  %s4674_s0 = inlined_call_operand.vmem [shape: bf16[512,384], index: 0, kind: input, shape index: {}]   ;;  %s4675_s1 = inlined_call_operand.vmem [shape: bf16[1152,128], index: 1, kind: input, shape index: {}]   ;;  %s4676_s2 = inlined_call_operand.vmem [shape: f32[512,128], index: 2, kind: output, shape index: {}]  }
   0x1   :  { %s3079_s11 = smov 0  }
   0x2 LB: > { %s31_s12 = sadd.s32 1, %s3053_s10  ;;  %p2607_p0 = scmp.ge.s32.totalorder %s3057_s11, 1  ;;  %s3057_s11 = sphi %s3079_s11, %s12_s11   ;;  %s3053_s10 = sphi %s3077_s10, %s5035_s10   ;;  %s3049_s9 = sphi %s3075_s9, %s5034_s9  }
   0x3   : > { %p33_p1 = scmp.ge.s32.totalorder %s31_s12, 2  ;;  %p158_p2 = scmp.lt.s32.totalorder %s3057_s11, 3 }
   0x5   : > { %s5037_s12 = smov (%p33_p1, %s31_s12), 0  ;;  %p159_p3 = pnand %p2607_p0, %p158_p2 }
   0x7   : > { %162 = sbr.rel (%p159_p3) target bundleno = 752 (0x2f0), region = 28 }
   0xc   : > { %v2933_v0 = vld [vmem:[%s4675_s1 + $0xf8] sm:$0xff]  ;;  %s2608_s15 = sshll.u32 %s3049_s9, 5  ;;  %v2932_v1 = vld [vmem:[%s4675_s1 + $0xf0] sm:$0xff]  ;;  %v2931_v2 = vld [vmem:[%s4675_s1 + $0xe8] sm:$0xff] }
   0xd   : > { %p198_p4 = scmp.lt.s32.totalorder %s2608_s15, 63  ;;  %1251 = vmatpush.bf16.msra.mxu0 %v2933_v0  ;;  %2974 = vmatpush.bf16.msra.mxu1 %v2933_v0  ;;  %v2930_v10 = vld [vmem:[%s4675_s1 + $0xe0] sm:$0xff]  ;;  %v2929_v24 = vld [vmem:[%s4675_s1 + $0xd8] sm:$0xff]  ;;  %v2928_v41 = vld [vmem:[%s4675_s1 + $0xd0] sm:$0xff] }
   0xe   : > { %2975 = vmatpush.bf16.msra.mxu2 %v2933_v0  ;;  %2976 = vmatpush.bf16.msra.mxu3 %v2933_v0  ;;  %v2927_v59 = vld [vmem:[%s4675_s1 + $0xc8] sm:$0xff] }
   0xf   : > { %s5039_s15 = smov (!%p198_p4, %s2608_s15), 63 }
  0x10   : > { %s2998_s18 = smul.u32 12, %s5039_s15 }
  0x11   : > { %1252 = vmatpush.bf16.msra.mxu0 %v2932_v1  ;;  %2977 = vmatpush.bf16.msra.mxu1 %v2932_v1 }
  0x12   : > { %2978 = vmatpush.bf16.msra.mxu2 %v2932_v1  ;;  %2979 = vmatpush.bf16.msra.mxu3 %v2932_v1  ;;  %s3108_s23 = scalar_lea.vmem %s4674_s0, %s2998_s18 }
  0x13   : > { %v3111_v3 = vld [vmem:[%s3108_s23] sm:$0xff]  ;;  %v3114_v4 = vld [vmem:[%s3108_s23 + $0xc] sm:$0xff]  ;;  %v3157_v33 = vld [vmem:[%s3108_s23 + $0x18] sm:$0xff] }
  0x14   : > { %v3117_v5 = vld [vmem:[%s3108_s23 + $0x60] sm:$0xff]  ;;  %v291_v6 = vunpack.c.l.bf16 %v3111_v3  ;;  %v294_v7 = vunpack.c.l.bf16 %v3114_v4  ;;  %v3122_v8 = vld [vmem:[%s3108_s23 + $0x6c] sm:$0xff]  ;;  %v297_v45 = vunpack.c.l.bf16 %v3157_v33  ;;  %v3179_v46 = vld [vmem:[%s3108_s23 + $0x78] sm:$0xff] }
  0x15   : > { %v259_v9 = vld [vmem:[%s3108_s23 + $0xc0] sm:$0xff]  ;;  %1253 = vmatpush.bf16.msra.mxu0 %v2931_v2  ;;  %2980 = vmatpush.bf16.msra.mxu1 %v2931_v2  ;;  %v315_v11 = vunpack.c.l.bf16 %v3117_v5  ;;  %v318_v12 = vunpack.c.l.bf16 %v3122_v8  ;;  %v261_v15 = vld [vmem:[%s3108_s23 + $0xcc] sm:$0xff]  ;;  %v321_v56 = vunpack.c.l.bf16 %v3179_v46  ;;  %v263_v58 = vld [vmem:[%s3108_s23 + $0xd8] sm:$0xff] }
  0x16   : > { %2981 = vmatpush.bf16.msra.mxu2 %v2931_v2  ;;  %2982 = vmatpush.bf16.msra.mxu3 %v2931_v2  ;;  %v3130_v13 = vmul.f32 0.5, %v291_v6  ;;  %v579_v14 = vmul.f32 1.5, %v291_v6  ;;  %v339_v16 = vunpack.c.l.bf16 %v259_v9  ;;  %v3133_v17 = vmul.f32 0.5, %v294_v7  ;;  %v275_v27 = vld [vmem:[%s3108_s23 + $0x120] sm:$0xff]  ;;  %v277_v28 = vld [vmem:[%s3108_s23 + $0x12c] sm:$0xff]  ;;  %v279_v9 = vld [vmem:[%s3108_s23 + $0x138] sm:$0xff] }
  0x17   : > { %v582_v18 = vmul.f32 1.5, %v294_v7  ;;  %v3135_v19 = vmul.f32 0.5, %v315_v11  ;;  %v3138_v21 = vmul.f32 0.5, %v318_v12  ;;  %v603_v22 = vmul.f32 1.5, %v315_v11  ;;  %v3164_v40 = vld [vmem:[%s3108_s23 + $0x24] sm:$0xff] }
  0x18   : > { %v771_v20 = vmul.f32 %v579_v14, %v3130_v13  ;;  %v606_v23 = vmul.f32 1.5, %v318_v12  ;;  %v342_v26 = vunpack.c.l.bf16 %v261_v15  ;;  %v3154_v32 = vmul.f32 0.5, %v339_v16  ;;  %v3182_v47 = vld [vmem:[%s3108_s23 + $0x84] sm:$0xff] }
  0x19   : > { %1254 = vmatpush.bf16.msra.mxu0 %v2930_v10  ;;  %2983 = vmatpush.bf16.msra.mxu1 %v2930_v10  ;;  %v774_v25 = vmul.f32 %v582_v18, %v3133_v17  ;;  %v3149_v30 = vmul.f32 %v603_v22, %v3135_v19  ;;  %v627_v36 = vmul.f32 1.5, %v339_v16  ;;  %v363_v38 = vunpack.c.l.bf16 %v275_v27  ;;  %v3209_v0 = vld [vmem:[%s3108_s23 + $0xe4] sm:$0xff]  ;;  %v2949_v22 = vld [vmem:[%s4675_s1 + $0x178] sm:$0xff] }
  0x1a   : > { %2984 = vmatpush.bf16.msra.mxu2 %v2930_v10  ;;  %2985 = vmatpush.bf16.msra.mxu3 %v2930_v10  ;;  %v3146_v29 = vadd.f32 -0.375, %v771_v20  ;;  %v3152_v31 = vmul.f32 %v606_v23, %v3138_v21  ;;  %v3161_v35 = vmul.f32 0.5, %v342_v26  ;;  %v630_v37 = vmul.f32 1.5, %v342_v26  ;;  %4762 = vst [vmem:[#allocation8_spill] sm:$0xff] %v3209_v0  ;;  %v281_v12 = vld [vmem:[%s3108_s23 + $0x144] sm:$0xff] }
  0x1b   : > { %4756 = vst [vmem:[#allocation2_spill] sm:$0xff] %v3149_v30  ;;  %v3159_v34 = vadd.f32 -0.375, %v774_v25  ;;  %v366_v39 = vunpack.c.l.bf16 %v277_v28  ;;  %v3172_v43 = vmul.f32 %v627_v36, %v3154_v32  ;;  %v3184_v48 = vmul.f32 0.5, %v363_v38  ;;  %v2926_v18 = vld [vmem:[%s4675_s1 + $0xc0] sm:$0xff]  ;;  %v3339_v42 = vld [vmem:[%s3108_s23 + $0x48] sm:$0xff] }
  0x1c   : > { %4757 = vst [vmem:[#allocation3_spill] sm:$0xff] %v3152_v31  ;;  %v3175_v44 = vmul.f32 %v630_v37, %v3161_v35  ;;  %v651_v50 = vmul.f32 1.5, %v363_v38  ;;  %v300_v52 = vunpack.c.l.bf16 %v3164_v40  ;;  %v3189_v53 = vmul.f32 0.5, %v297_v45  ;;  %v3248_v37 = vld [vmem:[%s3108_s23 + $0x90] sm:$0xff] }
  0x1d   : > { %1255 = vmatpush.bf16.msra.mxu0 %v2929_v24  ;;  %2986 = vmatpush.bf16.msra.mxu1 %v2929_v24  ;;  %4758 = vst [vmem:[#allocation4_spill] sm:$0xff] %v3172_v43  ;;  %v3186_v49 = vmul.f32 0.5, %v366_v39  ;;  %v654_v51 = vmul.f32 1.5, %v366_v39  ;;  %v585_v54 = vmul.f32 1.5, %v297_v45  ;;  %v324_v57 = vunpack.c.l.bf16 %v3182_v47  ;;  %v2909_v39 = vld [vmem:[%s4675_s1 + $0x38] sm:$0xff] }
  0x1e   : > { %4759 = vst [vmem:[#allocation5_spill] sm:$0xff] %v3175_v44  ;;  %2987 = vmatpush.bf16.msra.mxu2 %v2929_v24  ;;  %2988 = vmatpush.bf16.msra.mxu3 %v2929_v24  ;;  %v3192_v55 = vmul.f32 %v651_v50, %v3184_v48  ;;  %v3203_v61 = vmul.f32 0.5, %v300_v52  ;;  %v588_v62 = vmul.f32 1.5, %v300_v52  ;;  %v3211_v1 = vmul.f32 0.5, %v321_v56  ;;  %v3261_v45 = vld [vmem:[%s3108_s23 + $0x9c] sm:$0xff]  ;;  %v3264_v50 = vld [vmem:[%s3108_s23 + $0xf0] sm:$0xff] }
  0x1f   : > { %v3201_v60 = vmul.f32 %v654_v51, %v3186_v49  ;;  %v3206_v63 = vmul.f32 %v585_v54, %v3189_v53  ;;  %v3213_v2 = vmul.f32 0.5, %v324_v57  ;;  %v609_v6 = vmul.f32 1.5, %v321_v56  ;;  %4766 = vst [vmem:[#allocation12_spill] sm:$0xff] %v3264_v50 }
  0x20   : > { %4760 = vst [vmem:[#allocation6_spill] sm:$0xff] %v3192_v55  ;;  %v612_v7 = vmul.f32 1.5, %v324_v57  ;;  %v3217_v10 = vmul.f32 %v588_v62, %v3203_v61  ;;  %v345_v11 = vunpack.c.l.bf16 %v263_v58  ;;  %v348_v16 = vunpack.c.l.bf16 %v3209_v0 }
  0x21   : > { %1256 = vmatpush.bf16.msra.mxu0 %v2928_v41  ;;  %2989 = vmatpush.bf16.msra.mxu1 %v2928_v41  ;;  %4761 = vst [vmem:[#allocation7_spill] sm:$0xff] %v3201_v60  ;;  %v3221_v14 = vmul.f32 %v609_v6, %v3211_v1  ;;  %v1011_v20 = vpack.c.bf16 %v3133_v17, %v3130_v13  ;;  %v369_v25 = vunpack.c.l.bf16 %v279_v9  ;;  %v372_v36 = vunpack.c.l.bf16 %v281_v12  ;;  %v3242_v13 = vld [vmem:[%s3108_s23 + $0x30] sm:$0xff]  ;;  %v3245_v17 = vld [vmem:[%s3108_s23 + $0x3c] sm:$0xff] }
  0x22   : > { %2990 = vmatpush.bf16.msra.mxu2 %v2928_v41  ;;  %2991 = vmatpush.bf16.msra.mxu3 %v2928_v41  ;;  %v3224_v15 = vmul.f32 %v612_v7, %v3213_v2  ;;  %v3235_v23 = vmul.f32 0.5, %v345_v11  ;;  %v633_v24 = vmul.f32 1.5, %v345_v11  ;;  %v1023_v26 = vpack.c.bf16 %v3138_v21, %v3135_v19  ;;  %v2908_v9 = vld [vmem:[%s4675_s1 + $0x30] sm:$0xff]  ;;  %v2945_v60 = vld [vmem:[%s4675_s1 + $0x158] sm:$0xff] }
  0x23   : > { %4763 = vst [vmem:[#allocation9_spill] sm:$0xff] %v3221_v14  ;;  %v3239_v27 = vmul.f32 0.5, %v348_v16  ;;  %v636_v28 = vmul.f32 1.5, %v348_v16  ;;  %v1035_v38 = vpack.c.bf16 %v3161_v35, %v3154_v32  ;;  %v3258_v19 = vmul.f32 0.5, %v369_v25 }
  0x24   : > { %4764 = vst [vmem:[#allocation10_spill] sm:$0xff] %v3224_v15  ;;  %v3256_v41 = vmul.f32 %v633_v24, %v3235_v23  ;;  %v657_v21 = vmul.f32 1.5, %v369_v25  ;;  %v1047_v51 = vpack.c.bf16 %v3186_v49, %v3184_v48  ;;  %v3271_v32 = vmul.f32 0.5, %v372_v36  ;;  %v2941_v48 = vld [vmem:[%s4675_s1 + $0x138] sm:$0xff]  ;;  %v2948_v49 = vld [vmem:[%s4675_s1 + $0x170] sm:$0xff] }
  0x25   : > { %1257 = vmatpush.bf16.msra.mxu0 %v2927_v59  ;;  %2992 = vmatpush.bf16.msra.mxu1 %v2927_v59  ;;  %v3269_v52 = vmul.f32 %v636_v28, %v3239_v27  ;;  %v660_v35 = vmul.f32 1.5, %v372_v36  ;;  %v303_v56 = vunpack.c.l.bf16 %v3242_v13  ;;  %v306_v57 = vunpack.c.l.bf16 %v3245_v17  ;;  %v3301_v24 = vld [vmem:[%s3108_s23 + $0xfc] sm:$0xff] }
  0x26   : > { %2993 = vmatpush.bf16.msra.mxu2 %v2927_v59  ;;  %2994 = vmatpush.bf16.msra.mxu3 %v2927_v59  ;;  %4765 = vst [vmem:[#allocation11_spill] sm:$0xff] %v3256_v41  ;;  %v3274_v54 = vmul.f32 %v657_v21, %v3258_v19  ;;  %v327_v58 = vunpack.c.l.bf16 %v3248_v37  ;;  %v2917_v59 = vld [vmem:[%s4675_s1 + $0x78] sm:$0xff]  ;;  %v330_v6 = vunpack.c.l.bf16 %v3261_v45  ;;  %v351_v7 = vunpack.c.l.bf16 %v3264_v50  ;;  %v3397_v41 = vld [vmem:[%s3108_s23 + $0x108] sm:$0xff] }
  0x27   : > { %4767 = vst [vmem:[#allocation13_spill] sm:$0xff] %v3269_v52  ;;  %v3289_v62 = vmul.f32 %v660_v35, %v3271_v32  ;;  %v3296_v11 = vmul.f32 0.5, %v303_v56  ;;  %v3298_v12 = vmul.f32 0.5, %v306_v57  ;;  %v591_v16 = vmul.f32 1.5, %v303_v56  ;;  %v285_v56 = vld [vmem:[%s3108_s23 + $0x15c] sm:$0xff]  ;;  %v3394_v52 = vld [vmem:[%s3108_s23 + $0xb4] sm:$0xff] }
  0x28   : > { %4768 = vst [vmem:[#allocation14_spill] sm:$0xff] %v3274_v54  ;;  %v3303_v25 = vmul.f32 0.5, %v327_v58  ;;  %v3305_v28 = vmul.f32 0.5, %v330_v6  ;;  %v618_v36 = vmul.f32 1.5, %v330_v6  ;;  %v639_v6 = vmul.f32 1.5, %v351_v7 }
  0x29   : > { %1258 = vmatpush.bf16.msra.mxu0 %v2926_v18  ;;  %2995 = vmatpush.bf16.msra.mxu1 %v2926_v18  ;;  %4769 = vst [vmem:[#allocation15_spill] sm:$0xff] %v3289_v62  ;;  %v3309_v21 = vmul.f32 %v591_v16, %v3296_v11  ;;  %v292_v44 = vunpack.c.h.bf16 %v3111_v3  ;;  %v295_v43 = vunpack.c.h.bf16 %v3114_v4  ;;  %v1026_v3 = vpack.c.bf16 %v3213_v2, %v3211_v1 }
  0x2a   : > { %2996 = vmatpush.bf16.msra.mxu2 %v2926_v18  ;;  %2997 = vmatpush.bf16.msra.mxu3 %v2926_v18  ;;  %v594_v18 = vmul.f32 1.5, %v306_v57  ;;  %4770 = vst [vmem:[#allocation16_spill] sm:$0xff] %v3301_v24  ;;  %v354_v57 = vunpack.c.l.bf16 %v3301_v24 }
  0x2b   : > { %4777 = vst [vmem:[#allocation23_spill] sm:$0xff] %v3397_v41 }
  0x2c   : > { %1259 = vmatmul.bf16.vlgmr.msra.gmra.mxu0 %v1011_v20  ;;  %1279 = vmatmul.bf16.vlgmr.msra.gmra.mxu1 %v1023_v26  ;;  %v3312_v35 = vmul.f32 %v594_v18, %v3298_v12  ;;  %v2940_v20 = vld [vmem:[%s4675_s1 + $0x130] sm:$0xff]  ;;  %v3336_v18 = vmul.f32 0.5, %v354_v57 }
  0x2d   : > { %1299 = vmatmul.bf16.vlgmr.msra.gmra.mxu2 %v1035_v38  ;;  %1319 = vmatmul.bf16.vlgmr.msra.gmra.mxu3 %v1047_v51  ;;  %v2916_v26 = vld [vmem:[%s4675_s1 + $0x70] sm:$0xff]  ;;  %v3325_v51 = vmul.f32 %v618_v36, %v3305_v28  ;;  %v378_v36 = vunpack.c.l.bf16 %v285_v56 }
  0x2e   : > { %1429 = vmatpush.bf16.msrb.mxu2 %v2949_v22  ;;  %1662 = vmatpush.bf16.msrb.mxu3 %v2909_v39  ;;  %v615_v22 = vmul.f32 1.5, %v327_v58  ;;  %v283_v39 = vld [vmem:[%s3108_s23 + $0x150] sm:$0xff]  ;;  %v2947_v58 = vld [vmem:[%s4675_s1 + $0x168] sm:$0xff] }
  0x2f   : > { %1340 = vmatpush.bf16.msrb.mxu1 %v2941_v48  ;;  %1751 = vmatpush.bf16.msrb.mxu0 %v2917_v59  ;;  %4772 = vst [vmem:[#allocation18_spill] sm:$0xff] %v3325_v51  ;;  %v2907_v48 = vld [vmem:[%s4675_s1 + $0x28] sm:$0xff]  ;;  %v3334_v59 = vmul.f32 0.5, %v351_v7  ;;  %v375_v16 = vunpack.c.l.bf16 %v283_v39 }
  0x30   : > { %v3322_v38 = vmul.f32 %v615_v22, %v3303_v25  ;;  %v642_v22 = vmul.f32 1.5, %v354_v57  ;;  %v2939_v7 = vld [vmem:[%s4675_s1 + $0x128] sm:$0xff]  ;;  %v3358_v57 = vmul.f32 0.5, %v378_v36 }
  0x31   : > { %v3347_v62 = vmul.f32 0.5, %v375_v16  ;;  %v663_v54 = vmul.f32 1.5, %v375_v16  ;;  %v2915_v39 = vld [vmem:[%s4675_s1 + $0x68] sm:$0xff] }
  0x32   : > { %4771 = vst [vmem:[#allocation17_spill] sm:$0xff] %v3322_v38  ;;  %1430 = vmatpush.bf16.msrb.mxu2 %v2948_v49  ;;  %1663 = vmatpush.bf16.msrb.mxu3 %v2908_v9  ;;  %v3342_v49 = vld [vmem:[%s3108_s23 + $0x54] sm:$0xff]  ;;  %v3345_v9 = vmul.f32 %v639_v6, %v3334_v59  ;;  %v3356_v56 = vmul.f32 %v642_v22, %v3336_v18  ;;  %v666_v6 = vmul.f32 1.5, %v378_v36  ;;  %v309_v22 = vunpack.c.l.bf16 %v3339_v42 }
  0x33   : > { %1341 = vmatpush.bf16.msrb.mxu1 %v2940_v20  ;;  %1752 = vmatpush.bf16.msrb.mxu0 %v2916_v26  ;;  %v2946_v20 = vld [vmem:[%s4675_s1 + $0x160] sm:$0xff]  ;;  %v3367_v16 = vmul.f32 %v663_v54, %v3347_v62  ;;  %v312_v36 = vunpack.c.l.bf16 %v3342_v49  ;;  %v2905_v54 = vld [vmem:[%s4675_s1 + $0x18] sm:$0xff]  ;;  %v1014_v38 = vpack.c.bf16 %v3203_v61, %v3189_v53 }
  0x34   : > { %4773 = vst [vmem:[#allocation19_spill] sm:$0xff] %v3345_v9  ;;  %v2906_v26 = vld [vmem:[%s4675_s1 + $0x20] sm:$0xff]  ;;  %v3386_v55 = vmul.f32 0.5, %v309_v22  ;;  %v3391_v9 = vld [vmem:[%s3108_s23 + $0xa8] sm:$0xff]  ;;  %v2937_v53 = vld [vmem:[%s4675_s1 + $0x118] sm:$0xff] }
  0x35   : > { %4774 = vst [vmem:[#allocation20_spill] sm:$0xff] %v3356_v56  ;;  %v600_v56 = vmul.f32 1.5, %v312_v36  ;;  %v333_v4 = vunpack.c.l.bf16 %v3391_v9  ;;  %v2913_v61 = vld [vmem:[%s4675_s1 + $0x58] sm:$0xff] }
  0x36   : > { %1431 = vmatpush.bf16.msrb.mxu2 %v2947_v58  ;;  %1664 = vmatpush.bf16.msrb.mxu3 %v2907_v48  ;;  %4775 = vst [vmem:[#allocation21_spill] sm:$0xff] %v3367_v16  ;;  %v3372_v58 = vmul.f32 %v666_v6, %v3358_v57  ;;  %v2938_v48 = vld [vmem:[%s4675_s1 + $0x120] sm:$0xff]  ;;  %v3388_v6 = vmul.f32 0.5, %v312_v36  ;;  %v289_v36 = vld [vmem:[%s3108_s23 + $0x174] sm:$0xff] }
  0x37   : > { %v2914_v16 = vld [vmem:[%s4675_s1 + $0x60] sm:$0xff]  ;;  %1342 = vmatpush.bf16.msrb.mxu1 %v2939_v7  ;;  %1753 = vmatpush.bf16.msrb.mxu0 %v2915_v39  ;;  %v3408_v7 = vld [vmem:[%s3108_s23 + $0x114] sm:$0xff]  ;;  %v287_v39 = vld [vmem:[%s3108_s23 + $0x168] sm:$0xff]  ;;  %v384_v2 = vunpack.c.l.bf16 %v289_v36 }
  0x38   : > { %4776 = vst [vmem:[#allocation22_spill] sm:$0xff] %v3372_v58  ;;  %v597_v58 = vmul.f32 1.5, %v309_v22  ;;  %v3405_v22 = vmul.f32 %v600_v56, %v3388_v6  ;;  %v1050_v56 = vpack.c.bf16 %v3271_v32, %v3258_v19  ;;  %v360_v15 = vunpack.c.l.bf16 %v3408_v7  ;;  %v2944_v19 = vld [vmem:[%s4675_s1 + $0x150] sm:$0xff] }
  0x39   : > { %4778 = vst [vmem:[#allocation24_spill] sm:$0xff] %v3408_v7  ;;  %v381_v1 = vunpack.c.l.bf16 %v287_v39  ;;  %v2904_v32 = vld [vmem:[%s4675_s1 + $0x10] sm:$0xff]  ;;  %v621_v39 = vmul.f32 1.5, %v333_v4 }
  0x3a   : > { %1432 = vmatpush.bf16.msrb.mxu2 %v2946_v20  ;;  %1665 = vmatpush.bf16.msrb.mxu3 %v2906_v26  ;;  %v3402_v51 = vmul.f32 %v597_v58, %v3386_v55  ;;  %v336_v20 = vunpack.c.l.bf16 %v3394_v52  ;;  %v1038_v26 = vpack.c.bf16 %v3239_v27, %v3235_v23  ;;  %v357_v58 = vunpack.c.l.bf16 %v3397_v41 }
  0x3b   : > { %1343 = vmatpush.bf16.msrb.mxu1 %v2938_v48  ;;  %1754 = vmatpush.bf16.msrb.mxu0 %v2914_v16  ;;  %v580_v23 = vmul.f32 1.5, %v292_v44  ;;  %v583_v27 = vmul.f32 1.5, %v295_v43  ;;  %v3436_v16 = vmul.f32 0.5, %v333_v4  ;;  %v648_v31 = vmul.f32 1.5, %v360_v15 }
  0x3c   : > { %1264 = vmatmul.bf16.gmra.mxu0 %v1014_v38  ;;  %1284 = vmatmul.bf16.gmra.mxu1 %v1026_v3  ;;  %v3438_v48 = vmul.f32 0.5, %v336_v20  ;;  %v624_v36 = vmul.f32 1.5, %v336_v20  ;;  %v645_v14 = vmul.f32 1.5, %v357_v58  ;;  %v3450_v3 = vmul.f32 0.5, %v381_v1  ;;  %v2936_v20 = vld [vmem:[%s4675_s1 + $0x110] sm:$0xff] }
  0x3d   : > { %1304 = vmatmul.bf16.gmra.mxu2 %v1038_v26  ;;  %1324 = vmatmul.bf16.gmra.mxu3 %v1050_v56  ;;  %v3445_v30 = vmul.f32 %v621_v39, %v3436_v16  ;;  %v3452_v4 = vmul.f32 0.5, %v384_v2  ;;  %v2903_v39 = vld [vmem:[%s4675_s1 + $0x8] sm:$0xff] }
  0x3e   : > { %1433 = vmatpush.bf16.msrb.mxu2 %v2945_v60  ;;  %1666 = vmatpush.bf16.msrb.mxu3 %v2905_v54  ;;  %v3440_v60 = vmul.f32 0.5, %v357_v58  ;;  %v3442_v54 = vmul.f32 0.5, %v360_v15  ;;  %v3448_v38 = vmul.f32 %v624_v36, %v3438_v48  ;;  %v2912_v15 = vld [vmem:[%s4675_s1 + $0x50] sm:$0xff]  ;;  %v669_v58 = vmul.f32 1.5, %v381_v1  ;;  %v2935_v1 = vld [vmem:[%s4675_s1 + $0x108] sm:$0xff] }
  0x3f   : > { %1344 = vmatpush.bf16.msrb.mxu1 %v2937_v53  ;;  %1755 = vmatpush.bf16.msrb.mxu0 %v2913_v61  ;;  %4779 = vst [vmem:[#allocation25_spill] sm:$0xff] %v3445_v30  ;;  %v672_v53 = vmul.f32 1.5, %v384_v2  ;;  %v2943_v61 = vld [vmem:[%s4675_s1 + $0x148] sm:$0xff]  ;;  %v3472_v36 = vmul.f32 0.5, %v292_v44 }
  0x40   : > { %4780 = vst [vmem:[#allocation26_spill] sm:$0xff] %v3448_v38  ;;  %v3461_v26 = vmul.f32 %v645_v14, %v3440_v60  ;;  %v3464_v56 = vmul.f32 %v648_v31, %v3442_v54  ;;  %v3477_v14 = vmul.f32 %v669_v58, %v3450_v3  ;;  %v2911_v44 = vld [vmem:[%s4675_s1 + $0x48] sm:$0xff]  ;;  %v2934_v58 = vld [vmem:[%s4675_s1 + $0x100] sm:$0xff] }
  0x41   : > { %v3480_v31 = vmul.f32 %v672_v53, %v3452_v4  ;;  %v230_v53 = vld [vmem:[%s3108_s23 + $0x14] sm:$0xf] }
  0x42   : > { %1434 = vmatpush.bf16.msrb.mxu2 %v2944_v19  ;;  %1667 = vmatpush.bf16.msrb.mxu3 %v2904_v32  ;;  %4781 = vst [vmem:[#allocation27_spill] sm:$0xff] %v3461_v26  ;;  %v3474_v19 = vmul.f32 0.5, %v295_v43  ;;  %v772_v43 = vmul.f32 %v580_v23, %v3472_v36  ;;  %v2910_v23 = vld [vmem:[%s4675_s1 + $0x40] sm:$0xff]  ;;  %v1029_v32 = vpack.c.bf16 %v3305_v28, %v3303_v25 }
  0x43   : > { %4782 = vst [vmem:[#allocation28_spill] sm:$0xff] %v3464_v56  ;;  %1345 = vmatpush.bf16.msrb.mxu1 %v2936_v20  ;;  %1756 = vmatpush.bf16.msrb.mxu0 %v2912_v15  ;;  %v2942_v20 = vld [vmem:[%s4675_s1 + $0x140] sm:$0xff]  ;;  %v1053_v56 = vpack.c.bf16 %v3358_v57, %v3347_v62  ;;  %v2965_v62 = vld [vmem:[%s4675_s1 + $0x1f8] sm:$0xff]  ;;  %v298_v57 = vunpack.c.h.bf16 %v3157_v33 }
  0x44   : > { %4783 = vst [vmem:[#allocation29_spill] sm:$0xff] %v3477_v14  ;;  %v775_v2 = vmul.f32 %v583_v27, %v3474_v19  ;;  %v2902_v15 = vld [vmem:[%s4675_s1] sm:$0xff]  ;;  %v228_v27 = vld [vmem:[%s3108_s23 + $0x8] sm:$0xf] }
  0x45   : > { %4784 = vst [vmem:[#allocation30_spill] sm:$0xff] %v3480_v31  ;;  %v3510_v31 = vadd.f32 -0.375, %v772_v43 }
  0x46   : > { %1435 = vmatpush.bf16.msrb.mxu2 %v2943_v61  ;;  %1668 = vmatpush.bf16.msrb.mxu3 %v2903_v39  ;;  %v1017_v61 = vpack.c.bf16 %v3298_v12, %v3296_v11  ;;  %v293_v39 = vunpack.c.l.bf16 %v228_v27  ;;  %v3512_v14 = vadd.f32 -0.375, %v775_v2  ;;  %v301_v2 = vunpack.c.h.bf16 %v3164_v40 }
  0x47   : > { %1346 = vmatpush.bf16.msrb.mxu1 %v2935_v1  ;;  %1757 = vmatpush.bf16.msrb.mxu0 %v2911_v44  ;;  %v296_v1 = vunpack.c.l.bf16 %v230_v53  ;;  %v1041_v44 = vpack.c.bf16 %v3336_v18, %v3334_v59  ;;  %v2957_v59 = vld [vmem:[%s4675_s1 + $0x1b8] sm:$0xff] }
  0x48   : > { %v3518_v11 = vmul.f32 0.5, %v293_v39  ;;  %v581_v28 = vmul.f32 1.5, %v293_v39  ;;  %v2925_v18 = vld [vmem:[%s4675_s1 + $0xb8] sm:$0xff]  ;;  %v589_v33 = vmul.f32 1.5, %v301_v2 }
  0x49   : > { %v3522_v25 = vmul.f32 0.5, %v296_v1  ;;  %v584_v43 = vmul.f32 1.5, %v296_v1 }
  0x4a   : > { %1436 = vmatpush.bf16.msrb.mxu2 %v2942_v20  ;;  %1669 = vmatpush.bf16.msrb.mxu3 %v2902_v15  ;;  %v2973_v20 = vld [vmem:[%s4675_s1 + $0x238] sm:$0xff]  ;;  %v3540_v15 = vmul.f32 0.5, %v298_v57 }
  0x4b   : > { %1347 = vmatpush.bf16.msrb.mxu1 %v2934_v58  ;;  %1758 = vmatpush.bf16.msrb.mxu0 %v2910_v23  ;;  %v3542_v58 = vmul.f32 0.5, %v301_v2  ;;  %v586_v23 = vmul.f32 1.5, %v298_v57  ;;  %v1044_v57 = vpack.c.bf16 %v3442_v54, %v3440_v60  ;;  %v1056_v2 = vpack.c.bf16 %v3452_v4, %v3450_v3 }
  0x4c   : > { %1269 = vmatmul.bf16.gmra.mxu0 %v1017_v61  ;;  %1289 = vmatmul.bf16.gmra.mxu1 %v1029_v32  ;;  %v773_v32 = vmul.f32 %v581_v28, %v3518_v11  ;;  %v234_v28 = vld [vmem:[%s3108_s23 + $0x2c] sm:$0xf] }
  0x4d   : > { %1309 = vmatmul.bf16.gmra.mxu2 %v1041_v44  ;;  %1329 = vmatmul.bf16.gmra.mxu3 %v1053_v56  ;;  %v776_v56 = vmul.f32 %v584_v43, %v3522_v25  ;;  %v3549_v53 = vmul.f32 %v586_v23, %v3540_v15  ;;  %v3552_v61 = vmul.f32 %v589_v33, %v3542_v58  ;;  %v232_v44 = vld [vmem:[%s3108_s23 + $0x20] sm:$0xf] }
  0x4e   : > { %2169 = vmatpush.bf16.msra.mxu2 %v2957_v59  ;;  %2258 = vmatpush.bf16.msra.mxu3 %v2965_v62  ;;  %v3544_v27 = vadd.f32 -0.375, %v773_v32  ;;  %v1015_v39 = vpack.c.bf16 %v3542_v58, %v3540_v15  ;;  %v1020_v43 = vpack.c.bf16 %v3388_v6, %v3386_v55  ;;  %v1032_v59 = vpack.c.bf16 %v3438_v48, %v3436_v16 }
  0x4f   : > { %v3546_v40 = vadd.f32 -0.375, %v776_v56  ;;  %1840 = vmatpush.bf16.msra.mxu1 %v2925_v18  ;;  %2347 = vmatpush.bf16.msra.mxu0 %v2973_v20  ;;  %v299_v62 = vunpack.c.l.bf16 %v232_v44  ;;  %v302_v18 = vunpack.c.l.bf16 %v234_v28  ;;  %v304_v55 = vunpack.c.h.bf16 %v3242_v13  ;;  %v238_v28 = vld [vmem:[%s3108_s23 + $0x44] sm:$0xf] }
  0x50   : > { %v307_v6 = vunpack.c.h.bf16 %v3245_v17  ;;  %v236_v17 = vld [vmem:[%s3108_s23 + $0x38] sm:$0xf]  ;;  %v319_v15 = vunpack.c.h.bf16 %v3122_v8 }
  0x51   : > { %v395_v32 = vmul.f32 0.5, %v299_v62  ;;  %v398_v56 = vmul.f32 0.5, %v302_v18  ;;  %v587_v20 = vmul.f32 1.5, %v299_v62  ;;  %v590_v23 = vmul.f32 1.5, %v302_v18 }
  0x52   : > { %v3574_v60 = vmul.f32 0.5, %v304_v55  ;;  %v3576_v54 = vmul.f32 0.5, %v307_v6  ;;  %v592_v3 = vmul.f32 1.5, %v304_v55  ;;  %v595_v4 = vmul.f32 1.5, %v307_v6  ;;  %v2956_v6 = vld [vmem:[%s4675_s1 + $0x1b0] sm:$0xff] }
  0x53   : > { %v3570_v16 = vmul.f32 %v587_v20, %v395_v32  ;;  %v3572_v48 = vmul.f32 %v590_v23, %v398_v56  ;;  %v1013_v62 = vpack.c.bf16 %v3522_v25, %v3518_v11  ;;  %v4785_v18 = vpack.c.bf16 %v3474_v19, %v3472_v36  ;;  %v2964_v11 = vld [vmem:[%s4675_s1 + $0x1f0] sm:$0xff]  ;;  %2170 = vmatpush.bf16.msra.mxu2 %v2956_v6 }
  0x54   : > { %v3579_v33 = vmul.f32 %v592_v3, %v3574_v60  ;;  %v3582_v44 = vmul.f32 %v595_v4, %v3576_v54  ;;  %v1018_v13 = vpack.c.bf16 %v3576_v54, %v3574_v60  ;;  %v2924_v36 = vld [vmem:[%s4675_s1 + $0xb0] sm:$0xff]  ;;  %v310_v19 = vunpack.c.h.bf16 %v3339_v42  ;;  %2259 = vmatpush.bf16.msra.mxu3 %v2964_v11 }
  0x55   : > { %v313_v25 = vunpack.c.h.bf16 %v3342_v49  ;;  %v2972_v3 = vld [vmem:[%s4675_s1 + $0x230] sm:$0xff]  ;;  %1841 = vmatpush.bf16.msra.mxu1 %v2924_v36  ;;  %v1016_v6 = vpack.c.bf16 %v398_v56, %v395_v32  ;;  %v316_v32 = vunpack.c.h.bf16 %v3117_v5 }
  0x56   : > { %v3613_v4 = vmul.f32 0.5, %v310_v19  ;;  %2348 = vmatpush.bf16.msra.mxu0 %v2972_v3 }
  0x57   : > { %v601_v42 = vmul.f32 1.5, %v313_v25 }
  0x5c   : > { %1274 = vmatmul.bf16.gmra.mxu0 %v1020_v43  ;;  %1294 = vmatmul.bf16.gmra.mxu1 %v1032_v59  ;;  %v305_v43 = vunpack.c.l.bf16 %v236_v17  ;;  %v308_v59 = vunpack.c.l.bf16 %v238_v28  ;;  %v3615_v17 = vmul.f32 0.5, %v313_v25  ;;  %v598_v28 = vmul.f32 1.5, %v310_v19 }
  0x5d   : > { %1314 = vmatmul.bf16.gmra.mxu2 %v1044_v57  ;;  %1334 = vmatmul.bf16.gmra.mxu3 %v1056_v2  ;;  %v4677_v57 = vmov 1065369472  }
  0x5e   : > { %v401_v2 = vmul.f32 0.5, %v305_v43  ;;  %v404_v20 = vmul.f32 0.5, %v308_v59  ;;  %v593_v23 = vmul.f32 1.5, %v305_v43  ;;  %v596_v55 = vmul.f32 1.5, %v308_v59 }
  0x5f   : > { %v3618_v49 = vmul.f32 %v598_v28, %v3613_v4  ;;  %v3621_v43 = vmul.f32 %v601_v42, %v3615_v17  ;;  %v1021_v59 = vpack.c.bf16 %v3615_v17, %v3613_v4  ;;  %v244_v17 = vld [vmem:[%s3108_s23 + $0x68] sm:$0xf]  ;;  %v246_v28 = vld [vmem:[%s3108_s23 + $0x74] sm:$0xf]  ;;  %v3640_v42 = vmul.f32 0.5, %v316_v32 }
  0x60   : > { %v3606_v60 = vmul.f32 %v593_v23, %v401_v2  ;;  %v3608_v54 = vmul.f32 %v596_v55, %v404_v20  ;;  %v1019_v58 = vpack.c.bf16 %v404_v20, %v401_v2  ;;  %v320_v56 = vunpack.c.l.bf16 %v246_v28  ;;  %v2955_v20 = vld [vmem:[%s4675_s1 + $0x1a8] sm:$0xff] }
  0x61   : > { %2171 = vmatpush.bf16.msra.mxu2 %v2955_v20  ;;  %v2923_v28 = vld [vmem:[%s4675_s1 + $0xa8] sm:$0xff] }
  0x62   : > { %v416_v5 = vmul.f32 0.5, %v320_v56  ;;  %v608_v2 = vmul.f32 1.5, %v320_v56  ;;  %1842 = vmatpush.bf16.msra.mxu1 %v2923_v28  ;;  %v325_v56 = vunpack.c.h.bf16 %v3182_v47 }
  0x64   : > { %v3671_v20 = vmul.f32 0.5, %v325_v56  ;;  %v613_v12 = vmul.f32 1.5, %v325_v56  ;;  %v331_v56 = vunpack.c.h.bf16 %v3261_v45  ;;  %v4797_v45 = vmov 1065369472  }
  0x66   : > { %v3702_v26 = vmul.f32 0.5, %v331_v56  ;;  %v619_v38 = vmul.f32 1.5, %v331_v56 }
  0x6c   : > { %1348 = vmatmul.bf16.vlgmr.msrb.gmra.mxu1 %v4785_v18  ;;  %1759 = vmatmul.bf16.vlgmr.msrb.gmra.mxu0 %v4677_v57  ;;  %v242_v18 = vld [vmem:[%s3108_s23 + $0x5c] sm:$0xf] }
  0x6d   : > { %1437 = vmatmul.bf16.vlgmr.msrb.gmra.mxu2 %v1013_v62  ;;  %1670 = vmatmul.bf16.vlgmr.msrb.gmra.mxu3 %v4677_v57  ;;  %v240_v62 = vld [vmem:[%s3108_s23 + $0x50] sm:$0xf]  ;;  %v314_v55 = vunpack.c.l.bf16 %v242_v18  ;;  %v604_v18 = vmul.f32 1.5, %v316_v32  ;;  %v2971_v32 = vld [vmem:[%s4675_s1 + $0x228] sm:$0xff] }
  0x6e   : > { %v311_v23 = vunpack.c.l.bf16 %v240_v62  ;;  %v415_v62 = vmul.f32 0.5, %v319_v15  ;;  %2349 = vmatpush.bf16.msra.mxu0 %v2971_v32  ;;  %v3677_v32 = vmul.f32 %v613_v12, %v3671_v20  ;;  %v252_v12 = vld [vmem:[%s3108_s23 + $0x98] sm:$0xf] }
  0x6f   : > { %v410_v36 = vmul.f32 0.5, %v314_v55  ;;  %v602_v25 = vmul.f32 1.5, %v314_v55  ;;  %v3643_v55 = vmul.f32 %v604_v18, %v3640_v42 }
  0x70   : > { %v407_v11 = vmul.f32 0.5, %v311_v23  ;;  %v599_v19 = vmul.f32 1.5, %v311_v23  ;;  %v607_v23 = vmul.f32 1.5, %v319_v15  ;;  %v248_v15 = vld [vmem:[%s3108_s23 + $0x80] sm:$0xf]  ;;  %4792 = vst [vmem:[#allocation37_spill] sm:$0xff] %v3677_v32 }
  0x71   : > { %v3634_v4 = vmul.f32 %v602_v25, %v410_v36  ;;  %4787 = vst [vmem:[#allocation32_spill] sm:$0xff] %v3643_v55  ;;  %v2963_v25 = vld [vmem:[%s4675_s1 + $0x1e8] sm:$0xff] }
  0x72   : > { %v3632_v3 = vmul.f32 %v599_v19, %v407_v11  ;;  %2260 = vmatpush.bf16.msra.mxu3 %v2963_v25  ;;  %v1022_v18 = vpack.c.bf16 %v410_v36, %v407_v11 }
  0x73   : > { %4786 = vst [vmem:[#allocation31_spill] sm:$0xff] %v3634_v4 }
  0x7c   : > { %1353 = vmatmul.bf16.gmra.mxu1 %v1015_v39  ;;  %1764 = vmatmul.bf16.gmra.mxu0 %v4677_v57  ;;  %v317_v39 = vunpack.c.l.bf16 %v244_v17  ;;  %v3657_v17 = vmul.f32 %v608_v2, %v416_v5 }
  0x7d   : > { %1442 = vmatmul.bf16.gmra.mxu2 %v1016_v6  ;;  %1675 = vmatmul.bf16.gmra.mxu3 %v4677_v57  ;;  %v3645_v6 = vmul.f32 %v607_v23, %v415_v62  ;;  %v323_v23 = vunpack.c.l.bf16 %v248_v15 }
  0x7e   : > { %v413_v19 = vmul.f32 0.5, %v317_v39  ;;  %v605_v8 = vmul.f32 1.5, %v317_v39  ;;  %4790 = vst [vmem:[#allocation35_spill] sm:$0xff] %v3657_v17  ;;  %v322_v39 = vunpack.c.h.bf16 %v3179_v46 }
  0x7f   : > { %4788 = vst [vmem:[#allocation33_spill] sm:$0xff] %v3645_v6  ;;  %v3680_v46 = vmul.f32 0.5, %v323_v23  ;;  %v611_v11 = vmul.f32 1.5, %v323_v23  ;;  %v329_v23 = vunpack.c.l.bf16 %v252_v12  ;;  %v2954_v12 = vld [vmem:[%s4675_s1 + $0x1a0] sm:$0xff] }
  0x80   : > { %v3669_v2 = vmul.f32 0.5, %v322_v39  ;;  %v610_v25 = vmul.f32 1.5, %v322_v39  ;;  %v254_v39 = vld [vmem:[%s3108_s23 + $0xa4] sm:$0xf]  ;;  %v1025_v1 = vpack.c.bf16 %v416_v5, %v413_v19  ;;  %2172 = vmatpush.bf16.msra.mxu2 %v2954_v12  ;;  %v334_v12 = vunpack.c.h.bf16 %v3391_v9 }
  0x81   : > { %v3686_v15 = vmul.f32 %v611_v11, %v3680_v46 }
  0x82   : > { %v3674_v28 = vmul.f32 %v610_v25, %v3669_v2  ;;  %v1024_v25 = vpack.c.bf16 %v415_v62, %v3640_v42  ;;  %v425_v42 = vmul.f32 0.5, %v329_v23  ;;  %v622_v32 = vmul.f32 1.5, %v334_v12 }
  0x83   : > { %4793 = vst [vmem:[#allocation38_spill] sm:$0xff] %v3686_v15  ;;  %v430_v15 = vmul.f32 0.5, %v334_v12 }
  0x84   : > { %4791 = vst [vmem:[#allocation36_spill] sm:$0xff] %v3674_v28 }
  0x85   : > { %v3752_v28 = vmul.f32 %v622_v32, %v430_v15 }
  0x87   : > { %4802 = vst [vmem:[#allocation46_spill] sm:$0xff] %v3752_v28  ;;  %v3813_v28 = vld [vmem:[%s3108_s23 + $0xc8] sm:$0xf] }
  0x88   : > { %4814 = vst [vmem:[#allocation58_spill] sm:$0xff] %v3813_v28 }
  0x8c   : > { %1358 = vmatmul.bf16.gmra.mxu1 %v1018_v13  ;;  %1769 = vmatmul.bf16.gmra.mxu0 %v4677_v57  ;;  %v3655_v13 = vmul.f32 %v605_v8, %v413_v19  ;;  %v617_v19 = vmul.f32 1.5, %v329_v23 }
  0x8d   : > { %1447 = vmatmul.bf16.gmra.mxu2 %v1019_v58  ;;  %1680 = vmatmul.bf16.gmra.mxu3 %v4677_v57  ;;  %v250_v58 = vld [vmem:[%s3108_s23 + $0x8c] sm:$0xf] }
  0x8e   : > { %4789 = vst [vmem:[#allocation34_spill] sm:$0xff] %v3655_v13  ;;  %v326_v8 = vunpack.c.l.bf16 %v250_v58 }
  0x90   : > { %v3682_v47 = vmul.f32 0.5, %v326_v8  ;;  %v614_v36 = vmul.f32 1.5, %v326_v8  ;;  %v332_v8 = vunpack.c.l.bf16 %v254_v39  ;;  %v3718_v39 = vmul.f32 %v617_v19, %v425_v42  ;;  %v256_v19 = vld [vmem:[%s3108_s23 + $0xb0] sm:$0xf] }
  0x92   : > { %v3689_v58 = vmul.f32 %v614_v36, %v3682_v47  ;;  %v428_v62 = vmul.f32 0.5, %v332_v8  ;;  %v620_v5 = vmul.f32 1.5, %v332_v8  ;;  %4798 = vst [vmem:[#allocation42_spill] sm:$0xff] %v3718_v39  ;;  %v2922_v8 = vld [vmem:[%s4675_s1 + $0xa0] sm:$0xff]  ;;  %v1027_v39 = vpack.c.bf16 %v3671_v20, %v3669_v2 }
  0x93   : > { %1843 = vmatpush.bf16.msra.mxu1 %v2922_v8 }
  0x94   : > { %4794 = vst [vmem:[#allocation39_spill] sm:$0xff] %v3689_v58 }
  0x9c   : > { %1363 = vmatmul.bf16.gmra.mxu1 %v1021_v59  ;;  %1774 = vmatmul.bf16.gmra.mxu0 %v4677_v57  ;;  %v328_v59 = vunpack.c.h.bf16 %v3248_v37  ;;  %v3708_v37 = vmul.f32 %v619_v38, %v3702_v26  ;;  %v2962_v38 = vld [vmem:[%s4675_s1 + $0x1e0] sm:$0xff] }
  0x9d   : > { %1452 = vmatmul.bf16.gmra.mxu2 %v1022_v18  ;;  %1685 = vmatmul.bf16.gmra.mxu3 %v4677_v57 }
  0x9e   : > { %v3700_v11 = vmul.f32 0.5, %v328_v59  ;;  %v616_v36 = vmul.f32 1.5, %v328_v59  ;;  %4796 = vst [vmem:[#allocation41_spill] sm:$0xff] %v3708_v37  ;;  %v3720_v59 = vmul.f32 %v620_v5, %v428_v62  ;;  %2261 = vmatpush.bf16.msra.mxu3 %v2962_v38  ;;  %v258_v5 = vld [vmem:[%s3108_s23 + $0xbc] sm:$0xf]  ;;  %v337_v38 = vunpack.c.h.bf16 %v3394_v52 }
  0x9f   : > { %v1028_v37 = vpack.c.bf16 %v3682_v47, %v3680_v46  ;;  %v338_v58 = vunpack.c.l.bf16 %v258_v5 }
  0xa0   : > { %v3705_v30 = vmul.f32 %v616_v36, %v3700_v11  ;;  %4799 = vst [vmem:[#allocation43_spill] sm:$0xff] %v3720_v59  ;;  %v2970_v36 = vld [vmem:[%s4675_s1 + $0x220] sm:$0xff]  ;;  %v433_v9 = vmul.f32 0.5, %v337_v38  ;;  %v625_v52 = vmul.f32 1.5, %v337_v38 }
  0xa1   : > { %2350 = vmatpush.bf16.msra.mxu0 %v2970_v36  ;;  %v434_v20 = vmul.f32 0.5, %v338_v58  ;;  %v626_v47 = vmul.f32 1.5, %v338_v58 }
  0xa2   : > { %4795 = vst [vmem:[#allocation40_spill] sm:$0xff] %v3705_v30  ;;  %v335_v30 = vunpack.c.l.bf16 %v256_v19  ;;  %v3754_v17 = vmul.f32 %v625_v52, %v433_v9 }
  0xa3   : > { %v3760_v5 = vmul.f32 %v626_v47, %v434_v20  ;;  %v2953_v47 = vld [vmem:[%s4675_s1 + $0x198] sm:$0xff] }
  0xa4   : > { %4803 = vst [vmem:[#allocation47_spill] sm:$0xff] %v3754_v17  ;;  %v431_v2 = vmul.f32 0.5, %v335_v30  ;;  %v623_v46 = vmul.f32 1.5, %v335_v30  ;;  %v1030_v30 = vpack.c.bf16 %v3702_v26, %v3700_v11  ;;  %2173 = vmatpush.bf16.msra.mxu2 %v2953_v47 }
  0xa5   : > { %4805 = vst [vmem:[#allocation49_spill] sm:$0xff] %v3760_v5 }
  0xa6   : > { %v3758_v19 = vmul.f32 %v623_v46, %v431_v2  ;;  %v1031_v46 = vpack.c.bf16 %v428_v62, %v425_v42 }
  0xa8   : > { %4804 = vst [vmem:[#allocation48_spill] sm:$0xff] %v3758_v19  ;;  %v1034_v19 = vpack.c.bf16 %v434_v20, %v431_v2 }
  0xa9   : > { %v3696_v18 = vpop.f32.mrf.mxu0  ;;  %v3698_v57 = vpop.f32.mrf.mxu1 }
  0xac   : > { %1368 = vmatmul.bf16.gmra.mxu1 %v1024_v25  ;;  %1779 = vmatmul.bf16.gmra.mxu0 %v4797_v45 }
  0xad   : > { %1457 = vmatmul.bf16.gmra.mxu2 %v1025_v1  ;;  %1690 = vmatmul.bf16.gmra.mxu3 %v4797_v45 }
  0xb0   : > { %v3722_v56 = vpop.f32.mrf.mxu2  ;;  %v3724_v1 = vpop.f32.mrf.mxu3 }
  0xb1   : > { %4800 = vst [vmem:[#allocation44_spill] sm:$0xff] %v3724_v1  ;;  %v3726_v25 = vpop.f32.mrf.mxu0  ;;  %v3728_v23 = vpop.f32.mrf.mxu1 }
  0xb8   : > { %v3740_v1 = vpop.f32.mrf.mxu2  ;;  %v3742_v59 = vpop.f32.mrf.mxu3 }
  0xb9   : > { %4801 = vst [vmem:[#allocation45_spill] sm:$0xff] %v3742_v59  ;;  %v3748_v8 = vpop.f32.mrf.mxu0  ;;  %v3750_v36 = vpop.f32.mrf.mxu1 }
  0xbc   : > { %1373 = vmatmul.bf16.gmra.mxu1 %v1027_v39  ;;  %1784 = vmatmul.bf16.gmra.mxu0 %v4797_v45 }
  0xbd   : > { %1462 = vmatmul.bf16.gmra.mxu2 %v1028_v37  ;;  %1695 = vmatmul.bf16.gmra.mxu3 %v4797_v45 }
  0xc0   : > { %v3762_v12 = vpop.f32.mrf.mxu2  ;;  %v3764_v32 = vpop.f32.mrf.mxu3 }
  0xc1   : > { %4806 = vst [vmem:[#allocation50_spill] sm:$0xff] %v3762_v12  ;;  %v3766_v38 = vpop.f32.mrf.mxu0  ;;  %v3768_v39 = vpop.f32.mrf.mxu1 }
  0xc2   : > { %4807 = vst [vmem:[#allocation51_spill] sm:$0xff] %v3764_v32 }
  0xc8   : > { %v3770_v52 = vpop.f32.mrf.mxu2  ;;  %v3772_v17 = vpop.f32.mrf.mxu3 }
  0xc9   : > { %4808 = vst [vmem:[#allocation52_spill] sm:$0xff] %v3770_v52  ;;  %v3776_v58 = vpop.f32.mrf.mxu0  ;;  %v3778_v37 = vpop.f32.mrf.mxu1 }
  0xca   : > { %4809 = vst [vmem:[#allocation53_spill] sm:$0xff] %v3772_v17  ;;  %v2961_v17 = vld [vmem:[%s4675_s1 + $0x1d8] sm:$0xff] }
  0xcb   : > { %2262 = vmatpush.bf16.msra.mxu3 %v2961_v17 }
  0xcc   : > { %1378 = vmatmul.bf16.gmra.mxu1 %v1030_v30  ;;  %1789 = vmatmul.bf16.gmra.mxu0 %v4797_v45  ;;  %v2921_v30 = vld [vmem:[%s4675_s1 + $0x98] sm:$0xff] }
  0xcd   : > { %1467 = vmatmul.bf16.gmra.mxu2 %v1031_v46  ;;  %1700 = vmatmul.bf16.gmra.mxu3 %v4797_v45  ;;  %v2969_v46 = vld [vmem:[%s4675_s1 + $0x218] sm:$0xff] }
  0xce   : > { %1844 = vmatpush.bf16.msra.mxu1 %v2921_v30  ;;  %2351 = vmatpush.bf16.msra.mxu0 %v2969_v46  ;;  %v3816_v30 = vld [vmem:[%s3108_s23 + $0xd4] sm:$0xf]  ;;  %v3819_v46 = vld [vmem:[%s3108_s23 + $0xc0] sm:$0xff] }
  0xcf   : > { %4815 = vst [vmem:[#allocation59_spill] sm:$0xff] %v3816_v30 }
  0xd0   : > { %v3788_v26 = vpop.f32.mrf.mxu2  ;;  %v3790_v11 = vpop.f32.mrf.mxu3  ;;  %4816 = vst [vmem:[#allocation60_spill] sm:$0xff] %v3819_v46 }
  0xd1   : > { %4810 = vst [vmem:[#allocation54_spill] sm:$0xff] %v3788_v26  ;;  %v3792_v42 = vpop.f32.mrf.mxu0  ;;  %v3794_v62 = vpop.f32.mrf.mxu1 }
  0xd2   : > { %4811 = vst [vmem:[#allocation55_spill] sm:$0xff] %v3790_v11  ;;  %v1033_v11 = vpack.c.bf16 %v433_v9, %v430_v15  ;;  %v3823_v15 = vld [vmem:[%s3108_s23 + $0xcc] sm:$0xff] }
  0xd3   : > { %4817 = vst [vmem:[#allocation61_spill] sm:$0xff] %v3823_v15  ;;  %v4680_v9 = vunpack.c.h.bf16 %v3823_v15 }
  0xd5   : > { %v3842_v13 = vmul.f32 0.5, %v4680_v9 }
  0xd7   : > { %4821 = vst [vmem:[#allocation65_spill] sm:$0xff] %v3842_v13 }
  0xd8   : > { %v3802_v17 = vpop.f32.mrf.mxu2  ;;  %v3804_v47 = vpop.f32.mrf.mxu3 }
  0xd9   : > { %4812 = vst [vmem:[#allocation56_spill] sm:$0xff] %v3802_v17  ;;  %v3806_v32 = vpop.f32.mrf.mxu0  ;;  %v3808_v5 = vpop.f32.mrf.mxu1  ;;  %v4684_v17 = vunpack.c.l.bf16 %v3816_v30 }
  0xda   : > { %4813 = vst [vmem:[#allocation57_spill] sm:$0xff] %v3804_v47  ;;  %v4679_v47 = vunpack.c.h.bf16 %v3819_v46 }
  0xdc   : > { %1383 = vmatmul.bf16.gmra.mxu1 %v1033_v11  ;;  %1794 = vmatmul.bf16.gmra.mxu0 %v4797_v45  ;;  %v4683_v11 = vunpack.c.l.bf16 %v3813_v28  ;;  %v3838_v26 = vmul.f32 0.5, %v4679_v47 }
  0xdd   : > { %1472 = vmatmul.bf16.gmra.mxu2 %v1034_v19  ;;  %1705 = vmatmul.bf16.gmra.mxu3 %v4797_v45 }
  0xde   : > { %4820 = vst [vmem:[#allocation64_spill] sm:$0xff] %v3838_v26  ;;  %v1036_v47 = vpack.c.bf16 %v3842_v13, %v3838_v26  ;;  %v3870_v13 = vld [vmem:[%s3108_s23 + $0xe0] sm:$0xf]  ;;  %v3873_v26 = vld [vmem:[%s3108_s23 + $0xec] sm:$0xf] }
  0xdf   : > { %4826 = vst [vmem:[#allocation70_spill] sm:$0xff] %v3870_v13  ;;  %v4697_v52 = vunpack.c.l.bf16 %v3873_v26 }
  0xe0   : > { %v3826_v59 = vpop.f32.mrf.mxu2  ;;  %v3828_v2 = vpop.f32.mrf.mxu3  ;;  %4827 = vst [vmem:[#allocation71_spill] sm:$0xff] %v3873_v26 }
  0xe1   : > { %4818 = vst [vmem:[#allocation62_spill] sm:$0xff] %v3826_v59  ;;  %v3830_v20 = vpop.f32.mrf.mxu0  ;;  %v3832_v19 = vpop.f32.mrf.mxu1  ;;  %v3850_v59 = vmul.f32 0.5, %v4684_v17  ;;  %v2952_v17 = vld [vmem:[%s4675_s1 + $0x190] sm:$0xff] }
  0xe2   : > { %4819 = vst [vmem:[#allocation63_spill] sm:$0xff] %v3828_v2  ;;  %v3846_v2 = vmul.f32 0.5, %v4683_v11  ;;  %2174 = vmatpush.bf16.msra.mxu2 %v2952_v17  ;;  %v2968_v17 = vld [vmem:[%s4675_s1 + $0x210] sm:$0xff] }
  0xe3   : > { %4823 = vst [vmem:[#allocation67_spill] sm:$0xff] %v3850_v59  ;;  %2352 = vmatpush.bf16.msra.mxu0 %v2968_v17  ;;  %v4700_v17 = vunpack.c.h.bf16 %v3301_v24 }
  0xe4   : > { %4822 = vst [vmem:[#allocation66_spill] sm:$0xff] %v3846_v2  ;;  %v1037_v46 = vpack.c.bf16 %v3850_v59, %v3846_v2 }
  0xe8   : > { %v3852_v6 = vpop.f32.mrf.mxu2  ;;  %v3854_v55 = vpop.f32.mrf.mxu3 }
  0xe9   : > { %4824 = vst [vmem:[#allocation68_spill] sm:$0xff] %v3852_v6  ;;  %v1349_v9 = vpop.f32.mrf.mxu1  ;;  %v1760_v15 = vpop.f32.mrf.mxu0  ;;  %v4696_v6 = vunpack.c.l.bf16 %v3870_v13 }
  0xea   : > { %4825 = vst [vmem:[#allocation69_spill] sm:$0xff] %v3854_v55  ;;  %v1350_v11 = vadd.f32 %v1349_v9, %v3696_v18  ;;  %v2960_v55 = vld [vmem:[%s4675_s1 + $0x1d0] sm:$0xff]  ;;  %v3876_v18 = vld [vmem:[%s3108_s23 + $0xd8] sm:$0xff] }
  0xeb   : > { %2263 = vmatpush.bf16.msra.mxu3 %v2960_v55  ;;  %4828 = vst [vmem:[#allocation72_spill] sm:$0xff] %v3876_v18  ;;  %v2920_v55 = vld [vmem:[%s4675_s1 + $0x90] sm:$0xff] }
  0xec   : > { %1388 = vmatmul.bf16.gmra.mxu1 %v1036_v47  ;;  %1799 = vmatmul.bf16.gmra.mxu0 %v4797_v45  ;;  %v4691_v47 = vunpack.c.h.bf16 %v3876_v18 }
  0xed   : > { %1477 = vmatmul.bf16.gmra.mxu2 %v1037_v46  ;;  %1710 = vmatmul.bf16.gmra.mxu3 %v4797_v45  ;;  %v4692_v46 = vunpack.c.h.bf16 %v3209_v0 }
  0xee   : > { %1845 = vmatpush.bf16.msra.mxu1 %v2920_v55  ;;  %v3920_v55 = vld [vmem:[%s3108_s23 + $0x104] sm:$0xf] }
  0xf0   : > { %v1438_v9 = vpop.f32.mrf.mxu2  ;;  %v1671_v59 = vpop.f32.mrf.mxu3 }
  0xf1   : > { %v1439_v2 = vadd.f32 %v1438_v9, %v1350_v11  ;;  %v1351_v30 = vpop.f32.mrf.mxu1  ;;  %v1762_v28 = vpop.f32.mrf.mxu0  ;;  %v3891_v11 = vmul.f32 0.5, %v4691_v47  ;;  %v3895_v9 = vmul.f32 0.5, %v4692_v46 }
  0xf2   : > { %v1352_v12 = vadd.f32 %v1351_v30, %v3726_v25  ;;  %v3899_v25 = vmul.f32 0.5, %v4696_v6 }
  0xf3   : > { %v1672_v4 = vadd.f32 %v1671_v59, %v1439_v2  ;;  %4829 = vst [vmem:[#allocation73_spill] sm:$0xff] %v3895_v9  ;;  %v3903_v59 = vmul.f32 0.5, %v4697_v52  ;;  %v1039_v46 = vpack.c.bf16 %v3895_v9, %v3891_v11 }
  0xf5   : > { %v3905_v30 = vadd.f32 %v1760_v15, %v1672_v4  ;;  %v1040_v6 = vpack.c.bf16 %v3903_v59, %v3899_v25  ;;  %v3917_v15 = vld [vmem:[%s3108_s23 + $0xf8] sm:$0xf] }
  0xf7   : > { %4830 = vst [vmem:[#allocation74_spill] sm:$0xff] %v3905_v30 }
  0xf8   : > { %v1440_v2 = vpop.f32.mrf.mxu2  ;;  %v1673_v47 = vpop.f32.mrf.mxu3 }
  0xf9   : > { %v1441_v0 = vadd.f32 %v1440_v2, %v1352_v12  ;;  %v1354_v18 = vpop.f32.mrf.mxu1  ;;  %v1765_v13 = vpop.f32.mrf.mxu0  ;;  %v4701_v12 = vunpack.c.h.bf16 %v3264_v50 }
  0xfa   : > { %v1355_v52 = vadd.f32 %v1354_v18, %v3748_v8 }
  0xfb   : > { %v1674_v26 = vadd.f32 %v1673_v47, %v1441_v0  ;;  %v4702_v47 = vunpack.c.l.bf16 %v3917_v15 }
  0xfc   : > { %1393 = vmatmul.bf16.gmra.mxu1 %v1039_v46  ;;  %1804 = vmatmul.bf16.gmra.mxu0 %v4797_v45  ;;  %v3929_v46 = vmul.f32 0.5, %v4701_v12 }
  0xfd   : > { %1482 = vmatmul.bf16.gmra.mxu2 %v1040_v6  ;;  %1715 = vmatmul.bf16.gmra.mxu3 %v4797_v45  ;;  %v3914_v4 = vadd.f32 %v1762_v28, %v1674_v26  ;;  %v4705_v6 = vunpack.c.l.bf16 %v3920_v55 }
  0xff   : > { %4831 = vst [vmem:[#allocation75_spill] sm:$0xff] %v3914_v4  ;;  %v3933_v4 = vmul.f32 0.5, %v4700_v17 }
 0x100   : > { %v1443_v2 = vpop.f32.mrf.mxu2  ;;  %v1676_v30 = vpop.f32.mrf.mxu3 }
 0x101   : > { %v1444_v8 = vadd.f32 %v1443_v2, %v1355_v52  ;;  %v1356_v0 = vpop.f32.mrf.mxu1  ;;  %v1767_v18 = vpop.f32.mrf.mxu0  ;;  %4832 = vst [vmem:[#allocation76_spill] sm:$0xff] %v3933_v4  ;;  %v3937_v52 = vmul.f32 0.5, %v4702_v47  ;;  %v3941_v2 = vmul.f32 0.5, %v4705_v6 }
 0x102   : > { %v1357_v28 = vadd.f32 %v1356_v0, %v3766_v38 }
 0x103   : > { %v1677_v26 = vadd.f32 %v1676_v30, %v1444_v8  ;;  %v1042_v8 = vpack.c.bf16 %v3933_v4, %v3929_v46  ;;  %v1043_v47 = vpack.c.bf16 %v3941_v2, %v3937_v52 }
 0x105   : > { %v3943_v9 = vadd.f32 %v1765_v13, %v1677_v26  ;;  %v2951_v13 = vld [vmem:[%s4675_s1 + $0x188] sm:$0xff] }
 0x106   : > { %2175 = vmatpush.bf16.msra.mxu2 %v2951_v13  ;;  %v2919_v13 = vld [vmem:[%s4675_s1 + $0x88] sm:$0xff] }
 0x107   : > { %4833 = vst [vmem:[#allocation77_spill] sm:$0xff] %v3943_v9  ;;  %1846 = vmatpush.bf16.msra.mxu1 %v2919_v13 }
 0x108   : > { %v1445_v38 = vpop.f32.mrf.mxu2  ;;  %v1678_v30 = vpop.f32.mrf.mxu3 }
 0x109   : > { %v1446_v0 = vadd.f32 %v1445_v38, %v1357_v28  ;;  %v1359_v17 = vpop.f32.mrf.mxu1  ;;  %v1770_v12 = vpop.f32.mrf.mxu0  ;;  %v2959_v28 = vld [vmem:[%s4675_s1 + $0x1c8] sm:$0xff]  ;;  %v3961_v38 = vld [vmem:[%s3108_s23 + $0x110] sm:$0xf] }
 0x10a   : > { %v1360_v24 = vadd.f32 %v1359_v17, %v3776_v58  ;;  %v3964_v58 = vld [vmem:[%s3108_s23 + $0x11c] sm:$0xf]  ;;  %2264 = vmatpush.bf16.msra.mxu3 %v2959_v28  ;;  %v4707_v17 = vunpack.c.h.bf16 %v3397_v41  ;;  %v4710_v4 = vunpack.c.l.bf16 %v3961_v38  ;;  %v2967_v28 = vld [vmem:[%s4675_s1 + $0x208] sm:$0xff] }
 0x10b   : > { %v1679_v50 = vadd.f32 %v1678_v30, %v1446_v0  ;;  %4835 = vst [vmem:[#allocation79_spill] sm:$0xff] %v3964_v58  ;;  %2353 = vmatpush.bf16.msra.mxu0 %v2967_v28 }
 0x10c   : > { %1398 = vmatmul.bf16.gmra.mxu1 %v1042_v8  ;;  %1809 = vmatmul.bf16.gmra.mxu0 %v4797_v45 }
 0x10d   : > { %1487 = vmatmul.bf16.gmra.mxu2 %v1043_v47  ;;  %1720 = vmatmul.bf16.gmra.mxu3 %v4797_v45  ;;  %v3958_v26 = vadd.f32 %v1767_v18, %v1679_v50  ;;  %v4708_v47 = vunpack.c.h.bf16 %v3408_v7  ;;  %v4712_v50 = vunpack.c.l.bf16 %v3964_v58 }
 0x10f   : > { %4834 = vst [vmem:[#allocation78_spill] sm:$0xff] %v3958_v26 }
 0x110   : > { %v1448_v30 = vpop.f32.mrf.mxu2  ;;  %v1681_v8 = vpop.f32.mrf.mxu3 }
 0x111   : > { %v1449_v0 = vadd.f32 %v1448_v30, %v1360_v24  ;;  %v1361_v6 = vpop.f32.mrf.mxu1  ;;  %v1772_v9 = vpop.f32.mrf.mxu0  ;;  %v3979_v24 = vmul.f32 0.5, %v4707_v17  ;;  %v3983_v30 = vmul.f32 0.5, %v4708_v47 }
 0x112   : > { %v1362_v18 = vadd.f32 %v1361_v6, %v3792_v42  ;;  %v3987_v42 = vmul.f32 0.5, %v4710_v4  ;;  %v3991_v6 = vmul.f32 0.5, %v4712_v50 }
 0x113   : > { %v1682_v26 = vadd.f32 %v1681_v8, %v1449_v0  ;;  %4836 = vst [vmem:[#allocation80_spill] sm:$0xff] %v3979_v24  ;;  %v1045_v47 = vpack.c.bf16 %v3983_v30, %v3979_v24 }
 0x114   : > { %4837 = vst [vmem:[#allocation81_spill] sm:$0xff] %v3983_v30  ;;  %v1046_v50 = vpack.c.bf16 %v3991_v6, %v3987_v42  ;;  %v4015_v30 = vld [vmem:[%s3108_s23 + $0x12c] sm:$0xff] }
 0x115   : > { %4838 = vst [vmem:[#allocation82_spill] sm:$0xff] %v3987_v42  ;;  %v3993_v8 = vadd.f32 %v1770_v12, %v1682_v26  ;;  %v4005_v26 = vld [vmem:[%s3108_s23 + $0x128] sm:$0xf] }
 0x116   : > { %4839 = vst [vmem:[#allocation83_spill] sm:$0xff] %v3991_v6 }
 0x117   : > { %4840 = vst [vmem:[#allocation84_spill] sm:$0xff] %v3993_v8  ;;  %v4008_v8 = vld [vmem:[%s3108_s23 + $0x134] sm:$0xf] }
 0x118   : > { %v1450_v0 = vpop.f32.mrf.mxu2  ;;  %v1683_v17 = vpop.f32.mrf.mxu3  ;;  %4842 = vst [vmem:[#allocation86_spill] sm:$0xff] %v4015_v30 }
 0x119   : > { %v1451_v7 = vadd.f32 %v1450_v0, %v1362_v18  ;;  %v1364_v4 = vpop.f32.mrf.mxu1  ;;  %v1775_v41 = vpop.f32.mrf.mxu0  ;;  %v4011_v18 = vld [vmem:[%s3108_s23 + $0x120] sm:$0xff] }
 0x11a   : > { %v1365_v13 = vadd.f32 %v1364_v4, %v3806_v32  ;;  %v4719_v0 = vunpack.c.h.bf16 %v4011_v18 }
 0x11b   : > { %v1684_v28 = vadd.f32 %v1683_v17, %v1451_v7  ;;  %v4718_v7 = vunpack.c.h.bf16 %v4015_v30 }
 0x11c   : > { %1403 = vmatmul.bf16.gmra.mxu1 %v1045_v47  ;;  %1814 = vmatmul.bf16.gmra.mxu0 %v4797_v45  ;;  %v4023_v6 = vmul.f32 0.5, %v4719_v0 }
 0x11d   : > { %1492 = vmatmul.bf16.gmra.mxu2 %v1046_v50  ;;  %1725 = vmatmul.bf16.gmra.mxu3 %v4797_v45  ;;  %v4002_v12 = vadd.f32 %v1772_v9, %v1684_v28  ;;  %v4720_v9 = vunpack.c.l.bf16 %v4005_v26  ;;  %v4722_v28 = vunpack.c.l.bf16 %v4008_v8  ;;  %v4027_v42 = vmul.f32 0.5, %v4718_v7 }
 0x11e   : > { %4843 = vst [vmem:[#allocation87_spill] sm:$0xff] %v4023_v6 }
 0x11f   : > { %4841 = vst [vmem:[#allocation85_spill] sm:$0xff] %v4002_v12 }
 0x120   : > { %v1453_v32 = vpop.f32.mrf.mxu2  ;;  %v1686_v4 = vpop.f32.mrf.mxu3  ;;  %4844 = vst [vmem:[#allocation88_spill] sm:$0xff] %v4027_v42 }
 0x121   : > { %v1454_v17 = vadd.f32 %v1453_v32, %v1365_v13  ;;  %v1366_v47 = vpop.f32.mrf.mxu1  ;;  %v1777_v50 = vpop.f32.mrf.mxu0  ;;  %v4031_v13 = vmul.f32 0.5, %v4720_v9  ;;  %v4035_v32 = vmul.f32 0.5, %v4722_v28  ;;  %v4057_v28 = vld [vmem:[%s3108_s23 + $0x14c] sm:$0xf] }
 0x122   : > { %v1367_v12 = vadd.f32 %v1366_v47, %v3830_v20  ;;  %4850 = vst [vmem:[#allocation94_spill] sm:$0xff] %v4057_v28 }
 0x123   : > { %v1687_v24 = vadd.f32 %v1686_v4, %v1454_v17  ;;  %4845 = vst [vmem:[#allocation89_spill] sm:$0xff] %v4031_v13  ;;  %v1048_v17 = vpack.c.bf16 %v4027_v42, %v4023_v6  ;;  %v1049_v9 = vpack.c.bf16 %v4035_v32, %v4031_v13  ;;  %v4734_v13 = vunpack.c.l.bf16 %v4057_v28 }
 0x124   : > { %4846 = vst [vmem:[#allocation90_spill] sm:$0xff] %v4035_v32 }
 0x125   : > { %v4037_v58 = vadd.f32 %v1775_v41, %v1687_v24  ;;  %v2950_v41 = vld [vmem:[%s4675_s1 + $0x180] sm:$0xff] }
 0x126   : > { %v2958_v24 = vld [vmem:[%s4675_s1 + $0x1c0] sm:$0xff]  ;;  %2176 = vmatpush.bf16.msra.mxu2 %v2950_v41 }
 0x127   : > { %4847 = vst [vmem:[#allocation91_spill] sm:$0xff] %v4037_v58  ;;  %2265 = vmatpush.bf16.msra.mxu3 %v2958_v24  ;;  %v2966_v41 = vld [vmem:[%s4675_s1 + $0x200] sm:$0xff] }
 0x128   : > { %v1455_v20 = vpop.f32.mrf.mxu2  ;;  %v1688_v4 = vpop.f32.mrf.mxu3  ;;  %2354 = vmatpush.bf16.msra.mxu0 %v2966_v41 }
 0x129   : > { %v1456_v47 = vadd.f32 %v1455_v20, %v1367_v12  ;;  %v1369_v7 = vpop.f32.mrf.mxu1  ;;  %v1780_v0 = vpop.f32.mrf.mxu0  ;;  %v4054_v20 = vld [vmem:[%s3108_s23 + $0x140] sm:$0xf] }
 0x12a   : > { %4849 = vst [vmem:[#allocation93_spill] sm:$0xff] %v4054_v20  ;;  %v4731_v32 = vunpack.c.l.bf16 %v4054_v20 }
 0x12b   : > { %v1689_v30 = vadd.f32 %v1688_v4, %v1456_v47  ;;  %v1370_v4 = vadd.f32 %v1369_v7, %v3698_v57  ;;  %v4065_v47 = vld [vmem:[%s3108_s23 + $0x144] sm:$0xff] }
 0x12c   : > { %1408 = vmatmul.bf16.gmra.mxu1 %v1048_v17  ;;  %1819 = vmatmul.bf16.gmra.mxu0 %v4797_v45  ;;  %4852 = vst [vmem:[#allocation96_spill] sm:$0xff] %v4065_v47  ;;  %v4729_v58 = vunpack.c.h.bf16 %v4065_v47  ;;  %v2918_v7 = vld [vmem:[%s4675_s1 + $0x80] sm:$0xff] }
 0x12d   : > { %1497 = vmatmul.bf16.gmra.mxu2 %v1049_v9  ;;  %1730 = vmatmul.bf16.gmra.mxu3 %v4797_v45  ;;  %v4051_v12 = vadd.f32 %v1777_v50, %v1689_v30  ;;  %v4061_v9 = vld [vmem:[%s3108_s23 + $0x138] sm:$0xff] }
 0x12e   : > { %4851 = vst [vmem:[#allocation95_spill] sm:$0xff] %v4061_v9  ;;  %v4727_v17 = vunpack.c.h.bf16 %v4061_v9  ;;  %1847 = vmatpush.bf16.msra.mxu1 %v2918_v7 }
 0x12f   : > { %4848 = vst [vmem:[#allocation92_spill] sm:$0xff] %v4051_v12 }
 0x130   : > { %v1458_v42 = vpop.f32.mrf.mxu2  ;;  %v1691_v6 = vpop.f32.mrf.mxu3  ;;  %v4078_v24 = vmul.f32 0.5, %v4727_v17 }
 0x131   : > { %v1459_v30 = vadd.f32 %v1458_v42, %v1370_v4  ;;  %v1371_v50 = vpop.f32.mrf.mxu1  ;;  %v1782_v12 = vpop.f32.mrf.mxu0  ;;  %v4082_v42 = vmul.f32 0.5, %v4729_v58  ;;  %v4086_v4 = vmul.f32 0.5, %v4731_v32 }
 0x132   : > { %4853 = vst [vmem:[#allocation97_spill] sm:$0xff] %v4078_v24  ;;  %v1372_v17 = vadd.f32 %v1371_v50, %v3728_v23  ;;  %v4107_v50 = vld [vmem:[%s3108_s23 + $0x164] sm:$0xf] }
 0x133   : > { %v1692_v57 = vadd.f32 %v1691_v6, %v1459_v30  ;;  %4854 = vst [vmem:[#allocation98_spill] sm:$0xff] %v4082_v42  ;;  %v4090_v6 = vmul.f32 0.5, %v4734_v13  ;;  %v1051_v47 = vpack.c.bf16 %v4082_v42, %v4078_v24  ;;  %v4115_v13 = vld [vmem:[%s3108_s23 + $0x15c] sm:$0xff] }
 0x134   : > { %4857 = vst [vmem:[#allocation101_spill] sm:$0xff] %v4107_v50 }
 0x135   : > { %v4092_v30 = vadd.f32 %v1780_v0, %v1692_v57  ;;  %v1052_v7 = vpack.c.bf16 %v4090_v6, %v4086_v4  ;;  %v4104_v0 = vld [vmem:[%s3108_s23 + $0x158] sm:$0xf]  ;;  %4859 = vst [vmem:[#allocation103_spill] sm:$0xff] %v4115_v13 }
 0x137   : > { %4855 = vst [vmem:[#allocation99_spill] sm:$0xff] %v4092_v30 }
 0x138   : > { %v1460_v9 = vpop.f32.mrf.mxu2  ;;  %v1693_v58 = vpop.f32.mrf.mxu3 }
 0x139   : > { %v1461_v32 = vadd.f32 %v1460_v9, %v1372_v17  ;;  %v1374_v20 = vpop.f32.mrf.mxu1  ;;  %v1785_v28 = vpop.f32.mrf.mxu0  ;;  %v4111_v17 = vld [vmem:[%s3108_s23 + $0x150] sm:$0xff] }
 0x13a   : > { %v1375_v9 = vadd.f32 %v1374_v20, %v3750_v36  ;;  %4858 = vst [vmem:[#allocation102_spill] sm:$0xff] %v4111_v17  ;;  %v4737_v57 = vunpack.c.h.bf16 %v4111_v17 }
 0x13b   : > { %v1694_v41 = vadd.f32 %v1693_v58, %v1461_v32  ;;  %v4738_v58 = vunpack.c.h.bf16 %v4115_v13 }
 0x13c   : > { %1413 = vmatmul.bf16.gmra.mxu1 %v1051_v47  ;;  %1824 = vmatmul.bf16.gmra.mxu0 %v4797_v45  ;;  %v4122_v36 = vmul.f32 0.5, %v4737_v57 }
 0x13d   : > { %1502 = vmatmul.bf16.gmra.mxu2 %v1052_v7  ;;  %1735 = vmatmul.bf16.gmra.mxu3 %v4797_v45  ;;  %v4101_v23 = vadd.f32 %v1782_v12, %v1694_v41  ;;  %v4740_v41 = vunpack.c.l.bf16 %v4104_v0  ;;  %v4126_v20 = vmul.f32 0.5, %v4738_v58 }
 0x13e   : > { %4860 = vst [vmem:[#allocation104_spill] sm:$0xff] %v4122_v36 }
 0x13f   : > { %4856 = vst [vmem:[#allocation100_spill] sm:$0xff] %v4101_v23  ;;  %v4743_v23 = vunpack.c.l.bf16 %v4107_v50  ;;  %v4130_v24 = vmul.f32 0.5, %v4740_v41  ;;  %v1054_v58 = vpack.c.bf16 %v4126_v20, %v4122_v36 }
 0x140   : > { %v1463_v32 = vpop.f32.mrf.mxu2  ;;  %v1696_v47 = vpop.f32.mrf.mxu3  ;;  %4861 = vst [vmem:[#allocation105_spill] sm:$0xff] %v4126_v20 }
 0x141   : > { %v1464_v7 = vadd.f32 %v1463_v32, %v1375_v9  ;;  %v1376_v30 = vpop.f32.mrf.mxu1  ;;  %v1787_v12 = vpop.f32.mrf.mxu0  ;;  %4862 = vst [vmem:[#allocation106_spill] sm:$0xff] %v4130_v24  ;;  %v4134_v9 = vmul.f32 0.5, %v4743_v23 }
 0x143   : > { %v1697_v42 = vadd.f32 %v1696_v47, %v1464_v7  ;;  %4863 = vst [vmem:[#allocation107_spill] sm:$0xff] %v4134_v9  ;;  %v1377_v47 = vadd.f32 %v1376_v30, %v3768_v39  ;;  %v1055_v50 = vpack.c.bf16 %v4134_v9, %v4130_v24  ;;  %v4146_v39 = vld [vmem:[%s3108_s23 + $0x170] sm:$0xf] }
 0x144   : > { %4865 = vst [vmem:[#allocation109_spill] sm:$0xff] %v4146_v39 }
 0x145   : > { %v4136_v32 = vadd.f32 %v1785_v28, %v1697_v42  ;;  %v4149_v28 = vld [vmem:[%s3108_s23 + $0x17c] sm:$0xf] }
 0x146   : > { %v4754_v20 = vunpack.c.l.bf16 %v4149_v28 }
 0x147   : > { %4864 = vst [vmem:[#allocation108_spill] sm:$0xff] %v4136_v32  ;;  %v4159_v32 = vld [vmem:[%s3108_s23 + $0x174] sm:$0xff] }
 0x148   : > { %v1465_v7 = vpop.f32.mrf.mxu2  ;;  %v1698_v57 = vpop.f32.mrf.mxu3  ;;  %4868 = vst [vmem:[#allocation112_spill] sm:$0xff] %v4159_v32  ;;  %v4178_v24 = vmul.f32 0.5, %v4754_v20  ;;  %v4191_v20 = vadd.f32 -0.375, %v3217_v10 }
 0x149   : > { %v1466_v13 = vadd.f32 %v1465_v7, %v1377_v47  ;;  %v1379_v41 = vpop.f32.mrf.mxu1  ;;  %v1790_v17 = vpop.f32.mrf.mxu0  ;;  %v4155_v47 = vld [vmem:[%s3108_s23 + $0x168] sm:$0xff]  ;;  %s2611_s23 = sshll.u32 %s5039_s15, 3 }
 0x14a   : > { %v1380_v30 = vadd.f32 %v1379_v41, %v3778_v37  ;;  %4867 = vst [vmem:[#allocation111_spill] sm:$0xff] %v4155_v47  ;;  %v4748_v7 = vunpack.c.h.bf16 %v4155_v47  ;;  %s4460_s26 = scalar_lea.vmem %s4676_s2, %s2611_s23 }
 0x14b   : > { %v1699_v23 = vadd.f32 %v1698_v57, %v1466_v13  ;;  %v4749_v13 = vunpack.c.h.bf16 %v4159_v32 }
 0x14c   : > { %1418 = vmatmul.bf16.gmra.mxu1 %v1054_v58  ;;  %1829 = vmatmul.bf16.gmra.mxu0 %v4797_v45  ;;  %v4752_v58 = vunpack.c.l.bf16 %v4146_v39  ;;  %v4166_v37 = vmul.f32 0.5, %v4748_v7  ;;  %v4188_v39 = vadd.f32 -0.375, %v3206_v63 }
 0x14d   : > { %1507 = vmatmul.bf16.gmra.mxu2 %v1055_v50  ;;  %1740 = vmatmul.bf16.gmra.mxu3 %v4797_v45  ;;  %v4151_v42 = vadd.f32 %v1787_v12, %v1699_v23  ;;  %v4170_v41 = vmul.f32 0.5, %v4749_v13 }
 0x14f   : > { %4866 = vst [vmem:[#allocation110_spill] sm:$0xff] %v4151_v42  ;;  %v4174_v42 = vmul.f32 0.5, %v4752_v58  ;;  %v1057_v7 = vpack.c.bf16 %v4170_v41, %v4166_v37 }
 0x150   : > { %v1468_v57 = vpop.f32.mrf.mxu2  ;;  %v1701_v50 = vpop.f32.mrf.mxu3  ;;  %4869 = vst [vmem:[#allocation113_spill] sm:$0xff] %v4170_v41 }
 0x151   : > { %v1469_v36 = vadd.f32 %v1468_v57, %v1380_v30  ;;  %v1381_v9 = vpop.f32.mrf.mxu1  ;;  %v1792_v23 = vpop.f32.mrf.mxu0  ;;  %v1058_v13 = vpack.c.bf16 %v4178_v24, %v4174_v42 }
 0x153   : > { %v1702_v12 = vadd.f32 %v1701_v50, %v1469_v36  ;;  %v1382_v36 = vadd.f32 %v1381_v9, %v3794_v62  ;;  %v4197_v62 = vadd.f32 -0.375, %v3552_v61  ;;  %v4200_v9 = vadd.f32 -0.375, %v3570_v16 }
 0x155   : > { %v4180_v30 = vadd.f32 %v1790_v17, %v1702_v12  ;;  %v4194_v17 = vadd.f32 -0.375, %v3549_v53  ;;  %v878_v12 = vadd.f32 -0.375, %v3572_v48 }
 0x157   : > { %4870 = vst [vmem:[#allocation114_spill] sm:$0xff] %v4180_v30  ;;  %v1933_v63 = vpack.c.bf16 %v4197_v62, %v4194_v17  ;;  %v1934_v10 = vpack.c.bf16 %v878_v12, %v4200_v9 }
 0x158   : > { %v1470_v57 = vpop.f32.mrf.mxu2  ;;  %v1703_v50 = vpop.f32.mrf.mxu3 }
 0x159   : > { %v1471_v32 = vadd.f32 %v1470_v57, %v1382_v36  ;;  %v1384_v47 = vpop.f32.mrf.mxu1  ;;  %v1795_v58 = vpop.f32.mrf.mxu0 }
 0x15a   : > { %v1385_v61 = vadd.f32 %v1384_v47, %v3808_v5  ;;  %v4220_v5 = vadd.f32 -0.375, %v3312_v35  ;;  %v4223_v47 = vadd.f32 -0.375, %v3579_v33 }
 0x15b   : > { %v1704_v36 = vadd.f32 %v1703_v50, %v1471_v32 }
 0x15c   : > { %1423 = vmatmul.bf16.gmra.mxu1 %v1057_v7  ;;  %1834 = vmatmul.bf16.gmra.mxu0 %v4797_v45 }
 0x15d   : > { %1512 = vmatmul.bf16.gmra.mxu2 %v1058_v13  ;;  %1745 = vmatmul.bf16.gmra.mxu3 %v4797_v45  ;;  %v4210_v53 = vadd.f32 %v1792_v23, %v1704_v36  ;;  %v4217_v23 = vadd.f32 -0.375, %v3309_v21  ;;  %v4226_v36 = vadd.f32 -0.375, %v3582_v44  ;;  %v4871_v21 = vpack.c.bf16 %v3546_v40, %v3544_v27 }
 0x15e   : > { %v4872_v44 = vpack.c.bf16 %v3159_v34, %v3146_v29 }
 0x15f   : > { %v1936_v35 = vpack.c.bf16 %v4226_v36, %v4223_v47 }
 0x160   : > { %v1473_v16 = vpop.f32.mrf.mxu2  ;;  %v1706_v48 = vpop.f32.mrf.mxu3 }
 0x161   : > { %v1474_v32 = vadd.f32 %v1473_v16, %v1385_v61  ;;  %v1386_v50 = vpop.f32.mrf.mxu1  ;;  %v1797_v57 = vpop.f32.mrf.mxu0  ;;  %v1935_v61 = vpack.c.bf16 %v4220_v5, %v4217_v23 }
 0x162   : > { %v1387_v41 = vadd.f32 %v1386_v50, %v3832_v19  ;;  %v884_v19 = vadd.f32 -0.375, %v3608_v54 }
 0x163   : > { %v1707_v7 = vadd.f32 %v1706_v48, %v1474_v32 }
 0x165   : > { %v4213_v30 = vadd.f32 %v1795_v58, %v1707_v7  ;;  %v4229_v58 = vadd.f32 -0.375, %v3606_v60  ;;  %v4873_v60 = vpack.c.bf16 %v3512_v14, %v3510_v31  ;;  %v4254_v31 = vadd.f32 -0.375, %v3402_v51 }
 0x167   : > { %v1937_v33 = vpack.c.bf16 %v884_v19, %v4229_v58 }
 0x168   : > { %v1475_v17 = vpop.f32.mrf.mxu2  ;;  %v1708_v62 = vpop.f32.mrf.mxu3 }
 0x169   : > { %v1476_v9 = vadd.f32 %v1475_v17, %v1387_v41  ;;  %v1389_v13 = vpop.f32.mrf.mxu1  ;;  %v1800_v12 = vpop.f32.mrf.mxu0 }
 0x16a   : > { %v1390_v16 = vadd.f32 %v1389_v13, %v3722_v56  ;;  %v4257_v56 = vadd.f32 -0.375, %v3405_v22  ;;  %v4263_v13 = vadd.f32 -0.375, %v3621_v43 }
 0x16b   : > { %v1709_v41 = vadd.f32 %v1708_v62, %v1476_v9 }
 0x16c   : > { %1848 = vmatmul.bf16.vlgmr.msra.gmra.mxu1 %v4797_v45  ;;  %2355 = vmatmul.bf16.vlgmr.msra.gmra.mxu0 %v4871_v21  ;;  %v1938_v19 = vpack.c.bf16 %v4257_v56, %v4254_v31 }
 0x16d   : > { %2177 = vmatmul.bf16.vlgmr.msra.gmra.mxu2 %v4872_v44  ;;  %2266 = vmatmul.bf16.vlgmr.msra.gmra.mxu3 %v4873_v60  ;;  %v4247_v54 = vadd.f32 %v1797_v57, %v1709_v41  ;;  %v4260_v57 = vadd.f32 -0.375, %v3618_v49  ;;  %v4875_v49 = vpack.c.bf16 %v4191_v20, %v4188_v39 }
 0x16f   : > { %v1939_v51 = vpack.c.bf16 %v4263_v13, %v4260_v57  ;;  %v4881_v13 = vld [vmem:[#allocation33_spill] sm:$0xff] }
 0x170   : > { %v1478_v48 = vpop.f32.mrf.mxu2  ;;  %v1711_v27 = vpop.f32.mrf.mxu3 }
 0x171   : > { %v1479_v40 = vadd.f32 %v1478_v48, %v1390_v16  ;;  %v1391_v32 = vpop.f32.mrf.mxu1  ;;  %v1802_v50 = vpop.f32.mrf.mxu0 }
 0x172   : > { %v1392_v62 = vadd.f32 %v1391_v32, %v3740_v1  ;;  %v4874_v1 = vld [vmem:[#allocation31_spill] sm:$0xff] }
 0x173   : > { %v1712_v7 = vadd.f32 %v1711_v27, %v1479_v40  ;;  %v890_v36 = vadd.f32 -0.375, %v4874_v1  ;;  %v4877_v40 = vld [vmem:[#allocation52_spill] sm:$0xff] }
 0x175   : > { %v4250_v17 = vadd.f32 %v1800_v12, %v1712_v7  ;;  %v4266_v12 = vadd.f32 -0.375, %v3632_v3  ;;  %v4876_v3 = vld [vmem:[#allocation50_spill] sm:$0xff] }
 0x177   : > { %v1940_v22 = vpack.c.bf16 %v890_v36, %v4266_v12  ;;  %v4294_v12 = vadd.f32 -0.375, %v4881_v13  ;;  %v4883_v36 = vld [vmem:[#allocation35_spill] sm:$0xff] }
 0x178   : > { %v1480_v29 = vpop.f32.mrf.mxu2  ;;  %v1713_v34 = vpop.f32.mrf.mxu3 }
 0x179   : > { %v1481_v9 = vadd.f32 %v1480_v29, %v1392_v62  ;;  %v1394_v47 = vpop.f32.mrf.mxu1  ;;  %v1805_v14 = vpop.f32.mrf.mxu0 }
 0x17a   : > { %v1395_v41 = vadd.f32 %v1394_v47, %v4876_v3  ;;  %v4880_v47 = vld [vmem:[#allocation32_spill] sm:$0xff] }
 0x17b   : > { %v1714_v58 = vadd.f32 %v1713_v34, %v1481_v9  ;;  %v4879_v34 = vld [vmem:[#allocation3_spill] sm:$0xff]  ;;  %v4291_v57 = vadd.f32 -0.375, %v4880_v47 }
 0x17c   : > { %1853 = vmatmul.bf16.gmra.mxu1 %v4797_v45  ;;  %2360 = vmatmul.bf16.gmra.mxu0 %v1934_v10  ;;  %v4288_v9 = vadd.f32 -0.375, %v4879_v34 }
 0x17d   : > { %2182 = vmatmul.bf16.gmra.mxu2 %v4875_v49  ;;  %2271 = vmatmul.bf16.gmra.mxu3 %v1933_v63  ;;  %v4278_v43 = vadd.f32 %v1802_v50, %v1714_v58  ;;  %v4878_v63 = vld [vmem:[#allocation2_spill] sm:$0xff]  ;;  %v896_v58 = vadd.f32 -0.375, %v4883_v36 }
 0x17e   : > { %v4285_v50 = vadd.f32 -0.375, %v4878_v63  ;;  %v4885_v63 = vld [vmem:[#allocation56_spill] sm:$0xff] }
 0x180   : > { %v1483_v21 = vpop.f32.mrf.mxu2  ;;  %v1716_v44 = vpop.f32.mrf.mxu3  ;;  %v1941_v3 = vpack.c.bf16 %v4288_v9, %v4285_v50 }
 0x181   : > { %v1484_v60 = vadd.f32 %v1483_v21, %v1395_v41  ;;  %v1396_v16 = vpop.f32.mrf.mxu1  ;;  %v1807_v48 = vpop.f32.mrf.mxu0  ;;  %v1942_v41 = vpack.c.bf16 %v4294_v12, %v4291_v57  ;;  %v4888_v12 = vld [vmem:[#allocation36_spill] sm:$0xff] }
 0x182   : > { %v1397_v32 = vadd.f32 %v1396_v16, %v4877_v40 }
 0x183   : > { %v1717_v10 = vadd.f32 %v1716_v44, %v1484_v60  ;;  %v4884_v60 = vld [vmem:[#allocation54_spill] sm:$0xff] }
 0x185   : > { %v4281_v27 = vadd.f32 %v1805_v14, %v1717_v10  ;;  %v4882_v14 = vld [vmem:[#allocation34_spill] sm:$0xff] }
 0x186   : > { %v4297_v1 = vadd.f32 -0.375, %v4882_v14  ;;  %v4322_v14 = vadd.f32 -0.375, %v4888_v12  ;;  %v4893_v12 = vld [vmem:[#allocation68_spill] sm:$0xff] }
 0x188   : > { %v1485_v7 = vpop.f32.mrf.mxu2  ;;  %v1718_v62 = vpop.f32.mrf.mxu3  ;;  %v1943_v21 = vpack.c.bf16 %v896_v58, %v4297_v1  ;;  %v4889_v1 = vld [vmem:[#allocation37_spill] sm:$0xff] }
 0x189   : > { %v1486_v29 = vadd.f32 %v1485_v7, %v1397_v32  ;;  %v1399_v20 = vpop.f32.mrf.mxu1  ;;  %v1810_v39 = vpop.f32.mrf.mxu0  ;;  %v4325_v36 = vadd.f32 -0.375, %v4889_v1 }
 0x18a   : > { %v1400_v16 = vadd.f32 %v1399_v20, %v4884_v60 }
 0x18b   : > { %v1719_v49 = vadd.f32 %v1718_v62, %v1486_v29 }
 0x18c   : > { %1858 = vmatmul.bf16.gmra.mxu1 %v4797_v45  ;;  %2365 = vmatmul.bf16.gmra.mxu0 %v1937_v33 }
 0x18d   : > { %2187 = vmatmul.bf16.gmra.mxu2 %v1935_v61  ;;  %2276 = vmatmul.bf16.gmra.mxu3 %v1936_v35  ;;  %v4309_v44 = vadd.f32 %v1807_v48, %v1719_v49  ;;  %v4886_v61 = vld [vmem:[#allocation9_spill] sm:$0xff]  ;;  %v4887_v48 = vld [vmem:[#allocation10_spill] sm:$0xff]  ;;  %v4891_v49 = vld [vmem:[#allocation39_spill] sm:$0xff] }
 0x18e   : > { %v4316_v35 = vadd.f32 -0.375, %v4886_v61  ;;  %v4319_v20 = vadd.f32 -0.375, %v4887_v48  ;;  %v902_v60 = vadd.f32 -0.375, %v4891_v49 }
 0x190   : > { %v1488_v10 = vpop.f32.mrf.mxu2  ;;  %v1721_v40 = vpop.f32.mrf.mxu3 }
 0x191   : > { %v1489_v32 = vadd.f32 %v1488_v10, %v1400_v16  ;;  %v1401_v7 = vpop.f32.mrf.mxu1  ;;  %v1812_v62 = vpop.f32.mrf.mxu0  ;;  %v1944_v10 = vpack.c.bf16 %v4319_v20, %v4316_v35 }
 0x192   : > { %v1402_v34 = vadd.f32 %v1401_v7, %v4885_v63 }
 0x193   : > { %v1722_v33 = vadd.f32 %v1721_v40, %v1489_v32  ;;  %v1945_v40 = vpack.c.bf16 %v4325_v36, %v4322_v14 }
 0x195   : > { %v4312_v29 = vadd.f32 %v1810_v39, %v1722_v33  ;;  %v4890_v39 = vld [vmem:[#allocation38_spill] sm:$0xff] }
 0x196   : > { %v4328_v58 = vadd.f32 -0.375, %v4890_v39  ;;  %v4892_v33 = vld [vmem:[#allocation62_spill] sm:$0xff] }
 0x198   : > { %v1490_v47 = vpop.f32.mrf.mxu2  ;;  %v1723_v57 = vpop.f32.mrf.mxu3  ;;  %v1946_v32 = vpack.c.bf16 %v902_v60, %v4328_v58  ;;  %v4896_v58 = vld [vmem:[#allocation40_spill] sm:$0xff]  ;;  %v4897_v60 = vld [vmem:[#allocation41_spill] sm:$0xff] }
 0x199   : > { %v1491_v13 = vadd.f32 %v1490_v47, %v1402_v34  ;;  %v1404_v23 = vpop.f32.mrf.mxu1  ;;  %v1815_v5 = vpop.f32.mrf.mxu0  ;;  %v4353_v49 = vadd.f32 -0.375, %v4896_v58 }
 0x19a   : > { %v1405_v63 = vadd.f32 %v1404_v23, %v4892_v33 }
 0x19b   : > { %v1724_v16 = vadd.f32 %v1723_v57, %v1491_v13 }
 0x19c   : > { %1863 = vmatmul.bf16.gmra.mxu1 %v4797_v45  ;;  %2370 = vmatmul.bf16.gmra.mxu0 %v1940_v22 }
 0x19d   : > { %2192 = vmatmul.bf16.gmra.mxu2 %v1938_v19  ;;  %2281 = vmatmul.bf16.gmra.mxu3 %v1939_v51  ;;  %v4340_v7 = vadd.f32 %v1812_v62, %v1724_v16  ;;  %v4894_v19 = vld [vmem:[#allocation17_spill] sm:$0xff]  ;;  %v4895_v62 = vld [vmem:[#allocation18_spill] sm:$0xff]  ;;  %v907_v16 = vadd.f32 -0.375, %v4897_v60 }
 0x19e   : > { %v4347_v51 = vadd.f32 -0.375, %v4894_v19  ;;  %v4350_v23 = vadd.f32 -0.375, %v4895_v62 }
 0x1a0   : > { %v1493_v34 = vpop.f32.mrf.mxu2  ;;  %v1726_v47 = vpop.f32.mrf.mxu3 }
 0x1a1   : > { %v1494_v57 = vadd.f32 %v1493_v34, %v1405_v63  ;;  %v1406_v13 = vpop.f32.mrf.mxu1  ;;  %v1817_v61 = vpop.f32.mrf.mxu0  ;;  %v4899_v63 = vld [vmem:[#allocation43_spill] sm:$0xff] }
 0x1a2   : > { %v1407_v14 = vadd.f32 %v1406_v13, %v4893_v12  ;;  %v908_v34 = vadd.f32 -0.375, %v4899_v63  ;;  %v1948_v13 = vpack.c.bf16 %v907_v16, %v4353_v49 }
 0x1a3   : > { %v1727_v22 = vadd.f32 %v1726_v47, %v1494_v57  ;;  %v1947_v57 = vpack.c.bf16 %v4350_v23, %v4347_v51 }
 0x1a5   : > { %v4343_v48 = vadd.f32 %v1815_v5, %v1727_v22  ;;  %v4898_v5 = vld [vmem:[#allocation42_spill] sm:$0xff] }
 0x1a6   : > { %v905_v33 = vadd.f32 -0.375, %v4898_v5 }
 0x1a8   : > { %v1495_v1 = vpop.f32.mrf.mxu2  ;;  %v1728_v36 = vpop.f32.mrf.mxu3  ;;  %v1949_v22 = vpack.c.bf16 %v908_v34, %v905_v33  ;;  %v4906_v34 = vld [vmem:[#allocation47_spill] sm:$0xff] }
 0x1a9   : > { %v1496_v39 = vadd.f32 %v1495_v1, %v1407_v14  ;;  %v1409_v31 = vpop.f32.mrf.mxu1  ;;  %v1820_v56 = vpop.f32.mrf.mxu0  ;;  %v4900_v14 = vld [vmem:[#allocation44_spill] sm:$0xff] }
 0x1aa   : > { %v1410_v1 = vadd.f32 %v1409_v31, %v4900_v14  ;;  %v4905_v31 = vld [vmem:[#allocation46_spill] sm:$0xff]  ;;  %v4907_v14 = vld [vmem:[#allocation48_spill] sm:$0xff] }
 0x1ab   : > { %v1729_v47 = vadd.f32 %v1728_v36, %v1496_v39  ;;  %v910_v63 = vadd.f32 -0.375, %v4905_v31 }
 0x1ac   : > { %1868 = vmatmul.bf16.gmra.mxu1 %v4797_v45  ;;  %2375 = vmatmul.bf16.gmra.mxu0 %v1943_v21  ;;  %v4902_v21 = vld [vmem:[#allocation45_spill] sm:$0xff] }
 0x1ad   : > { %2197 = vmatmul.bf16.gmra.mxu2 %v1941_v3  ;;  %2286 = vmatmul.bf16.gmra.mxu3 %v1942_v41  ;;  %v4365_v12 = vadd.f32 %v1817_v61, %v1729_v47  ;;  %v4903_v3 = vld [vmem:[#allocation25_spill] sm:$0xff]  ;;  %v4904_v61 = vld [vmem:[#allocation26_spill] sm:$0xff]  ;;  %v913_v47 = vadd.f32 -0.375, %v4906_v34 }
 0x1ae   : > { %v909_v41 = vadd.f32 -0.375, %v4903_v3  ;;  %v912_v33 = vadd.f32 -0.375, %v4904_v61 }
 0x1b0   : > { %v1498_v19 = vpop.f32.mrf.mxu2  ;;  %v1731_v36 = vpop.f32.mrf.mxu3 }
 0x1b1   : > { %v1499_v39 = vadd.f32 %v1498_v19, %v1410_v1  ;;  %v1411_v62 = vpop.f32.mrf.mxu1  ;;  %v1822_v51 = vpop.f32.mrf.mxu0  ;;  %v911_v1 = vadd.f32 -0.375, %v4907_v14  ;;  %v4908_v19 = vld [vmem:[#allocation49_spill] sm:$0xff] }
 0x1b2   : > { %v1412_v49 = vadd.f32 %v1411_v62, %v4902_v21  ;;  %v1951_v62 = vpack.c.bf16 %v913_v47, %v910_v63 }
 0x1b3   : > { %v1732_v23 = vadd.f32 %v1731_v36, %v1499_v39  ;;  %v1950_v39 = vpack.c.bf16 %v912_v33, %v909_v41 }
 0x1b5   : > { %v4368_v58 = vadd.f32 %v1820_v56, %v1732_v23  ;;  %v914_v56 = vadd.f32 -0.375, %v4908_v19  ;;  %v4931_v19 = vld [vmem:[#allocation66_spill] sm:$0xff] }
 0x1b7   : > { %4901 = vst [vmem:[#allocation31_spill] sm:$0xff] %v4368_v58  ;;  %v1952_v23 = vpack.c.bf16 %v914_v56, %v911_v1  ;;  %v4916_v56 = vld [vmem:[#allocation55_spill] sm:$0xff] }
 0x1b8   : > { %v1500_v60 = vpop.f32.mrf.mxu2  ;;  %v1733_v16 = vpop.f32.mrf.mxu3  ;;  %v4936_v58 = vld [vmem:[#allocation19_spill] sm:$0xff] }
 0x1b9   : > { %v1501_v5 = vadd.f32 %v1500_v60, %v1412_v49  ;;  %v1414_v50 = vpop.f32.mrf.mxu1  ;;  %v1825_v9 = vpop.f32.mrf.mxu0  ;;  %v4910_v49 = vld [vmem:[#allocation51_spill] sm:$0xff] }
 0x1ba   : > { %v1415_v60 = vadd.f32 %v1414_v50, %v4910_v49 }
 0x1bb   : > { %v1734_v36 = vadd.f32 %v1733_v16, %v1501_v5 }
 0x1bc   : > { %1873 = vmatmul.bf16.gmra.mxu1 %v4797_v45  ;;  %2380 = vmatmul.bf16.gmra.mxu0 %v1946_v32  ;;  %v4912_v32 = vld [vmem:[#allocation53_spill] sm:$0xff] }
 0x1bd   : > { %2202 = vmatmul.bf16.gmra.mxu2 %v1944_v10  ;;  %2291 = vmatmul.bf16.gmra.mxu3 %v1945_v40  ;;  %v4381_v21 = vadd.f32 %v1822_v51, %v1734_v36  ;;  %v4913_v10 = vld [vmem:[#allocation4_spill] sm:$0xff]  ;;  %v4914_v51 = vld [vmem:[#allocation5_spill] sm:$0xff] }
 0x1be   : > { %v4388_v40 = vadd.f32 -0.375, %v4913_v10  ;;  %v4391_v50 = vadd.f32 -0.375, %v4914_v51  ;;  %v4920_v10 = vld [vmem:[#allocation13_spill] sm:$0xff] }
 0x1bf   : > { %4909 = vst [vmem:[#allocation50_spill] sm:$0xff] %v4381_v21 }
 0x1c0   : > { %v1503_v3 = vpop.f32.mrf.mxu2  ;;  %v1736_v61 = vpop.f32.mrf.mxu3 }
 0x1c1   : > { %v1504_v31 = vadd.f32 %v1503_v3, %v1415_v60  ;;  %v1416_v34 = vpop.f32.mrf.mxu1  ;;  %v1827_v16 = vpop.f32.mrf.mxu0 }
 0x1c2   : > { %v1417_v33 = vadd.f32 %v1416_v34, %v4912_v32  ;;  %v4918_v32 = vld [vmem:[#allocation57_spill] sm:$0xff] }
 0x1c3   : > { %v1737_v5 = vadd.f32 %v1736_v61, %v1504_v31 }
 0x1c5   : > { %v4384_v41 = vadd.f32 %v1825_v9, %v1737_v5 }
 0x1c7   : > { %4911 = vst [vmem:[#allocation52_spill] sm:$0xff] %v4384_v41 }
 0x1c8   : > { %v1505_v63 = vpop.f32.mrf.mxu2  ;;  %v1738_v47 = vpop.f32.mrf.mxu3 }
 0x1c9   : > { %v1506_v14 = vadd.f32 %v1505_v63, %v1417_v33  ;;  %v1419_v35 = vpop.f32.mrf.mxu1  ;;  %v1830_v20 = vpop.f32.mrf.mxu0 }
 0x1ca   : > { %v1420_v36 = vadd.f32 %v1419_v35, %v4916_v56  ;;  %v4406_v35 = vadd.f32 -0.375, %v4920_v10 }
 0x1cb   : > { %v1739_v1 = vadd.f32 %v1738_v47, %v1506_v14 }
 0x1cc   : > { %1878 = vmatmul.bf16.gmra.mxu1 %v4797_v45  ;;  %2385 = vmatmul.bf16.gmra.mxu0 %v1949_v22 }
 0x1cd   : > { %2207 = vmatmul.bf16.gmra.mxu2 %v1947_v57  ;;  %2296 = vmatmul.bf16.gmra.mxu3 %v1948_v13  ;;  %v4396_v9 = vadd.f32 %v1827_v16, %v1739_v1  ;;  %v4919_v13 = vld [vmem:[#allocation11_spill] sm:$0xff] }
 0x1ce   : > { %v4403_v16 = vadd.f32 -0.375, %v4919_v13  ;;  %v4930_v13 = vld [vmem:[#allocation63_spill] sm:$0xff] }
 0x1cf   : > { %4915 = vst [vmem:[#allocation2_spill] sm:$0xff] %v4396_v9 }
 0x1d0   : > { %v1508_v49 = vpop.f32.mrf.mxu2  ;;  %v1741_v60 = vpop.f32.mrf.mxu3 }
 0x1d1   : > { %v1509_v3 = vadd.f32 %v1508_v49, %v1420_v36  ;;  %v1421_v61 = vpop.f32.mrf.mxu1  ;;  %v1832_v31 = vpop.f32.mrf.mxu0  ;;  %v4923_v49 = vld [vmem:[#allocation59_spill] sm:$0xff] }
 0x1d2   : > { %v1422_v33 = vadd.f32 %v1421_v61, %v4918_v32  ;;  %v4925_v61 = vld [vmem:[#allocation60_spill] sm:$0xff] }
 0x1d3   : > { %v1742_v34 = vadd.f32 %v1741_v60, %v1509_v3  ;;  %v4924_v60 = vunpack.c.l.bf16 %v4923_v49 }
 0x1d5   : > { %v4399_v5 = vadd.f32 %v1830_v20, %v1742_v34  ;;  %v4921_v20 = vld [vmem:[#allocation58_spill] sm:$0xff]  ;;  %v632_v3 = vmul.f32 1.5, %v4924_v60  ;;  %v4926_v34 = vunpack.c.h.bf16 %v4925_v61  ;;  %v4934_v61 = vld [vmem:[#allocation65_spill] sm:$0xff] }
 0x1d6   : > { %v4922_v56 = vunpack.c.l.bf16 %v4921_v20 }
 0x1d7   : > { %4917 = vst [vmem:[#allocation3_spill] sm:$0xff] %v4399_v5  ;;  %v628_v32 = vmul.f32 1.5, %v4926_v34 }
 0x1d8   : > { %v1510_v63 = vpop.f32.mrf.mxu2  ;;  %v1743_v47 = vpop.f32.mrf.mxu3  ;;  %v629_v36 = vmul.f32 1.5, %v4922_v56  ;;  %v4932_v56 = vld [vmem:[#allocation67_spill] sm:$0xff] }
 0x1d9   : > { %v1511_v14 = vadd.f32 %v1510_v63, %v1422_v33  ;;  %v1424_v22 = vpop.f32.mrf.mxu1  ;;  %v1835_v57 = vpop.f32.mrf.mxu0  ;;  %v4927_v33 = vld [vmem:[#allocation61_spill] sm:$0xff]  ;;  %v824_v5 = vmul.f32 %v632_v3, %v4932_v56 }
 0x1da   : > { %v4928_v63 = vunpack.c.h.bf16 %v4927_v33  ;;  %v1425_v10 = vadd.f32 %v1424_v22, %v4930_v13  ;;  %v821_v20 = vmul.f32 %v629_v36, %v4931_v19  ;;  %v4935_v22 = vld [vmem:[#allocation69_spill] sm:$0xff] }
 0x1db   : > { %v1744_v51 = vadd.f32 %v1743_v47, %v1511_v14 }
 0x1dc   : > { %1883 = vmatmul.bf16.gmra.mxu1 %v4797_v45  ;;  %2390 = vmatmul.bf16.gmra.mxu0 %v1952_v23  ;;  %v631_v47 = vmul.f32 1.5, %v4928_v63  ;;  %v917_v33 = vadd.f32 -0.375, %v821_v20  ;;  %v920_v63 = vadd.f32 -0.375, %v824_v5  ;;  %v4938_v5 = vld [vmem:[#allocation70_spill] sm:$0xff]  ;;  %v4940_v20 = vld [vmem:[#allocation71_spill] sm:$0xff] }
 0x1dd   : > { %2212 = vmatmul.bf16.gmra.mxu2 %v1950_v39  ;;  %2301 = vmatmul.bf16.gmra.mxu3 %v1951_v62  ;;  %v4419_v14 = vadd.f32 %v1832_v31, %v1744_v51  ;;  %v4933_v62 = vld [vmem:[#allocation64_spill] sm:$0xff] }
 0x1de   : > { %v820_v9 = vmul.f32 %v628_v32, %v4933_v62  ;;  %v823_v34 = vmul.f32 %v631_v47, %v4934_v61  ;;  %v1955_v36 = vpack.c.bf16 %v920_v63, %v917_v33  ;;  %v4430_v32 = vadd.f32 -0.375, %v4936_v58  ;;  %v4937_v47 = vld [vmem:[#allocation20_spill] sm:$0xff] }
 0x1df   : > { %4929 = vst [vmem:[#allocation32_spill] sm:$0xff] %v4419_v14  ;;  %v4942_v58 = vpack.c.bf16 %v4391_v50, %v4388_v40  ;;  %v4943_v62 = vld [vmem:[#allocation72_spill] sm:$0xff] }
 0x1e0   : > { %v1513_v1 = vpop.f32.mrf.mxu2  ;;  %v1746_v23 = vpop.f32.mrf.mxu3  ;;  %v916_v31 = vadd.f32 -0.375, %v820_v9  ;;  %v919_v51 = vadd.f32 -0.375, %v823_v34  ;;  %v4944_v61 = vunpack.c.h.bf16 %v4943_v62  ;;  %v4945_v33 = vld [vmem:[#allocation8_spill] sm:$0xff] }
 0x1e1   : > { %v1514_v49 = vadd.f32 %v1513_v1, %v1425_v10  ;;  %v1426_v60 = vpop.f32.mrf.mxu1  ;;  %v1837_v39 = vpop.f32.mrf.mxu0  ;;  %v4946_v63 = vunpack.c.h.bf16 %v4945_v33 }
 0x1e2   : > { %v1427_v13 = vadd.f32 %v1426_v60, %v4935_v22  ;;  %v1954_v56 = vpack.c.bf16 %v919_v51, %v916_v31  ;;  %v634_v34 = vmul.f32 1.5, %v4944_v61 }
 0x1e3   : > { %v1747_v41 = vadd.f32 %v1746_v23, %v1514_v49  ;;  %v4433_v23 = vadd.f32 -0.375, %v4937_v47  ;;  %v4941_v49 = vunpack.c.l.bf16 %v4940_v20  ;;  %v637_v31 = vmul.f32 1.5, %v4946_v63  ;;  %v4950_v63 = vld [vmem:[#allocation28_spill] sm:$0xff] }
 0x1e4   : > { %v826_v50 = vmul.f32 %v634_v34, %v3891_v11 }
 0x1e5   : > { %v4426_v14 = vadd.f32 %v1835_v57, %v1747_v41  ;;  %v1959_v41 = vpack.c.bf16 %v4433_v23, %v4430_v32  ;;  %v4939_v57 = vunpack.c.l.bf16 %v4938_v5  ;;  %v638_v60 = vmul.f32 1.5, %v4941_v49  ;;  %v4973_v32 = vld [vmem:[#allocation80_spill] sm:$0xff] }
 0x1e8   : > { %v1515_v21 = vpop.f32.mrf.mxu2  ;;  %v1748_v19 = vpop.f32.mrf.mxu3 }
 0x1e9   : > { %v1516_v3 = vadd.f32 %v1515_v21, %v1427_v13  ;;  %v1849_v1 = vpop.f32.mrf.mxu1  ;;  %v2356_v10 = vpop.f32.mrf.mxu0  ;;  %v635_v21 = vmul.f32 1.5, %v4939_v57  ;;  %v4948_v57 = vld [vmem:[#allocation74_spill] sm:$0xff] }
 0x1ea   : > { %v1850_v20 = vadd.f32 %v1849_v1, %v4948_v57 }
 0x1eb   : > { %v1749_v9 = vadd.f32 %v1748_v19, %v1516_v3  ;;  %v827_v19 = vmul.f32 %v635_v21, %v3899_v25 }
 0x1ec   : > { %1888 = vmatmul.bf16.gmra.mxu1 %v4797_v45  ;;  %2395 = vmatmul.bf16.gmra.mxu0 %v1955_v36  ;;  %v830_v36 = vmul.f32 %v638_v60, %v3903_v59 }
 0x1ed   : > { %2217 = vmatmul.bf16.gmra.mxu2 %v4942_v58  ;;  %2306 = vmatmul.bf16.gmra.mxu3 %v1954_v56  ;;  %v4449_v51 = vadd.f32 %v1837_v39, %v1749_v9  ;;  %v4947_v56 = vld [vmem:[#allocation73_spill] sm:$0xff]  ;;  %v923_v25 = vadd.f32 -0.375, %v827_v19  ;;  %v922_v9 = vadd.f32 -0.375, %v826_v50 }
 0x1ee   : > { %v829_v5 = vmul.f32 %v637_v31, %v4947_v56  ;;  %v926_v39 = vadd.f32 -0.375, %v830_v36  ;;  %v4467_v31 = vadd.f32 -0.375, %v4950_v63  ;;  %v4953_v56 = vunpack.c.l.bf16 %v3920_v55 }
 0x1f0   : > { %v2178_v22 = vpop.f32.mrf.mxu2  ;;  %v2267_v13 = vpop.f32.mrf.mxu3  ;;  %v925_v21 = vadd.f32 -0.375, %v829_v5  ;;  %v1958_v11 = vpack.c.bf16 %v926_v39, %v923_v25  ;;  %v644_v5 = vmul.f32 1.5, %v4953_v56  ;;  %v4957_v25 = vld [vmem:[#allocation16_spill] sm:$0xff] }
 0x1f1   : > { %v2268_v3 = vadd.f32 %v2267_v13, %v2178_v22  ;;  %v1851_v47 = vpop.f32.mrf.mxu1  ;;  %v2358_v40 = vpop.f32.mrf.mxu0  ;;  %v4951_v22 = vld [vmem:[#allocation75_spill] sm:$0xff]  ;;  %v4958_v39 = vunpack.c.h.bf16 %v4957_v25 }
 0x1f2   : > { %v1957_v1 = vpack.c.bf16 %v925_v21, %v922_v9  ;;  %v1852_v13 = vadd.f32 %v1851_v47, %v4951_v22  ;;  %v4955_v47 = vld [vmem:[#allocation12_spill] sm:$0xff]  ;;  %v836_v55 = vmul.f32 %v644_v5, %v3941_v2 }
 0x1f3   : > { %v2357_v49 = vadd.f32 %v2356_v10, %v2268_v3  ;;  %v4949_v10 = vld [vmem:[#allocation27_spill] sm:$0xff]  ;;  %v4952_v3 = vunpack.c.l.bf16 %v3917_v15 }
 0x1f4   : > { %v4464_v33 = vadd.f32 -0.375, %v4949_v10 }
 0x1f5   : > { %v2436_v59 = vadd.f32 %v2357_v49, %v1850_v20  ;;  %v641_v50 = vmul.f32 1.5, %v4952_v3  ;;  %v4954_v20 = vpack.c.bf16 %v4406_v35, %v4403_v16  ;;  %v4959_v35 = vld [vmem:[#allocation76_spill] sm:$0xff] }
 0x1f6   : > { %v1962_v36 = vpack.c.bf16 %v4467_v31, %v4464_v33  ;;  %v4986_v33 = vld [vmem:[#allocation87_spill] sm:$0xff] }
 0x1f7   : > { %2468 = vst [vmem:[%s4460_s26] sm:$0xff] %v2436_v59  ;;  %v643_v59 = vmul.f32 1.5, %v4958_v39  ;;  %v833_v21 = vmul.f32 %v641_v50, %v3937_v52 }
 0x1f8   : > { %v2180_v60 = vpop.f32.mrf.mxu2  ;;  %v2269_v58 = vpop.f32.mrf.mxu3 }
 0x1f9   : > { %v2270_v62 = vadd.f32 %v2269_v58, %v2180_v60  ;;  %v1854_v61 = vpop.f32.mrf.mxu1  ;;  %v2361_v34 = vpop.f32.mrf.mxu0  ;;  %v929_v22 = vadd.f32 -0.375, %v833_v21  ;;  %v4965_v21 = vld [vmem:[#allocation79_spill] sm:$0xff] }
 0x1fb   : > { %v2359_v19 = vadd.f32 %v2358_v40, %v2270_v62  ;;  %v4956_v40 = vunpack.c.h.bf16 %v4955_v47  ;;  %v835_v62 = vmul.f32 %v643_v59, %v4959_v35 }
 0x1fc   : > { %1893 = vmatmul.bf16.gmra.mxu1 %v4797_v45  ;;  %2400 = vmatmul.bf16.gmra.mxu0 %v1958_v11 }
 0x1fd   : > { %v2437_v57 = vadd.f32 %v2359_v19, %v1852_v13  ;;  %2222 = vmatmul.bf16.gmra.mxu2 %v4954_v20  ;;  %2311 = vmatmul.bf16.gmra.mxu3 %v1957_v1  ;;  %v640_v49 = vmul.f32 1.5, %v4956_v40  ;;  %v4960_v1 = vld [vmem:[#allocation77_spill] sm:$0xff]  ;;  %v932_v13 = vadd.f32 -0.375, %v836_v55  ;;  %v931_v56 = vadd.f32 -0.375, %v835_v62  ;;  %v4969_v62 = vld [vmem:[#allocation24_spill] sm:$0xff] }
 0x1fe   : > { %v1855_v10 = vadd.f32 %v1854_v61, %v4960_v1  ;;  %v4966_v55 = vunpack.c.l.bf16 %v4965_v21  ;;  %v4970_v1 = vunpack.c.h.bf16 %v4969_v62 }
 0x1ff   : > { %2469 = vst [vmem:[%s4460_s26 + $0x8] sm:$0xff] %v2437_v57  ;;  %v832_v16 = vmul.f32 %v640_v49, %v3929_v46  ;;  %v1961_v50 = vpack.c.bf16 %v932_v13, %v929_v22  ;;  %v4961_v46 = vld [vmem:[#allocation6_spill] sm:$0xff]  ;;  %v4962_v49 = vld [vmem:[#allocation7_spill] sm:$0xff] }
 0x200   : > { %v2183_v9 = vpop.f32.mrf.mxu2  ;;  %v2272_v15 = vpop.f32.mrf.mxu3  ;;  %v4492_v40 = vadd.f32 -0.375, %v4961_v46  ;;  %v4495_v61 = vadd.f32 -0.375, %v4962_v49  ;;  %v4971_v22 = vld [vmem:[#allocation82_spill] sm:$0xff] }
 0x201   : > { %v2273_v60 = vadd.f32 %v2272_v15, %v2183_v9  ;;  %v1856_v58 = vpop.f32.mrf.mxu1  ;;  %v2363_v11 = vpop.f32.mrf.mxu0  ;;  %v928_v3 = vadd.f32 -0.375, %v832_v16  ;;  %v4964_v9 = vunpack.c.l.bf16 %v3961_v38 }
 0x202   : > { %v1965_v59 = vpack.c.bf16 %v4495_v61, %v4492_v40  ;;  %v5000_v40 = vld [vmem:[#allocation97_spill] sm:$0xff] }
 0x203   : > { %v2362_v63 = vadd.f32 %v2361_v34, %v2273_v60  ;;  %v1960_v47 = vpack.c.bf16 %v931_v56, %v928_v3  ;;  %v4963_v34 = vld [vmem:[#allocation78_spill] sm:$0xff]  ;;  %v647_v15 = vmul.f32 1.5, %v4964_v9  ;;  %v650_v60 = vmul.f32 1.5, %v4966_v55 }
 0x204   : > { %v1857_v25 = vadd.f32 %v1856_v58, %v4963_v34  ;;  %v4967_v58 = vld [vmem:[#allocation23_spill] sm:$0xff] }
 0x205   : > { %v2438_v19 = vadd.f32 %v2362_v63, %v1855_v10  ;;  %v649_v10 = vmul.f32 1.5, %v4970_v1  ;;  %v839_v13 = vmul.f32 %v647_v15, %v4971_v22  ;;  %v4977_v1 = vld [vmem:[#allocation15_spill] sm:$0xff]  ;;  %v4979_v22 = vunpack.c.l.bf16 %v4005_v26 }
 0x207   : > { %2470 = vst [vmem:[%s4460_s26 + $0x10] sm:$0xff] %v2438_v19  ;;  %v4972_v19 = vld [vmem:[#allocation83_spill] sm:$0xff]  ;;  %v935_v49 = vadd.f32 -0.375, %v839_v13  ;;  %v653_v13 = vmul.f32 1.5, %v4979_v22 }
 0x208   : > { %v2185_v57 = vpop.f32.mrf.mxu2  ;;  %v2274_v52 = vpop.f32.mrf.mxu3  ;;  %v842_v3 = vmul.f32 %v650_v60, %v4972_v19  ;;  %v4980_v19 = vunpack.c.l.bf16 %v4008_v8  ;;  %v4985_v8 = vld [vmem:[#allocation90_spill] sm:$0xff] }
 0x209   : > { %v2275_v2 = vadd.f32 %v2274_v52, %v2185_v57  ;;  %v1859_v5 = vpop.f32.mrf.mxu1  ;;  %v2366_v20 = vpop.f32.mrf.mxu0 }
 0x20a   : > { %v938_v34 = vadd.f32 -0.375, %v842_v3  ;;  %v656_v3 = vmul.f32 1.5, %v4980_v19 }
 0x20b   : > { %v2364_v39 = vadd.f32 %v2363_v11, %v2275_v2  ;;  %v4968_v11 = vunpack.c.h.bf16 %v4967_v58  ;;  %v4975_v2 = vld [vmem:[#allocation84_spill] sm:$0xff] }
 0x20c   : > { %1898 = vmatmul.bf16.gmra.mxu1 %v4797_v45  ;;  %2405 = vmatmul.bf16.gmra.mxu0 %v1961_v50  ;;  %v1964_v55 = vpack.c.bf16 %v938_v34, %v935_v49 }
 0x20d   : > { %v2439_v16 = vadd.f32 %v2364_v39, %v1857_v25  ;;  %2227 = vmatmul.bf16.gmra.mxu2 %v1959_v41  ;;  %2316 = vmatmul.bf16.gmra.mxu3 %v1960_v47  ;;  %v646_v35 = vmul.f32 1.5, %v4968_v11  ;;  %v4974_v41 = vld [vmem:[#allocation81_spill] sm:$0xff]  ;;  %v1860_v47 = vadd.f32 %v1859_v5, %v4975_v2  ;;  %v4523_v5 = vadd.f32 -0.375, %v4977_v1 }
 0x20e   : > { %v841_v50 = vmul.f32 %v649_v10, %v4974_v41  ;;  %v4984_v2 = vld [vmem:[#allocation89_spill] sm:$0xff] }
 0x20f   : > { %2471 = vst [vmem:[%s4460_s26 + $0x18] sm:$0xff] %v2439_v16  ;;  %v838_v23 = vmul.f32 %v646_v35, %v4973_v32  ;;  %v4976_v35 = vld [vmem:[#allocation14_spill] sm:$0xff] }
 0x210   : > { %v2188_v63 = vpop.f32.mrf.mxu2  ;;  %v2277_v38 = vpop.f32.mrf.mxu3  ;;  %v937_v9 = vadd.f32 -0.375, %v841_v50  ;;  %v4520_v62 = vadd.f32 -0.375, %v4976_v35  ;;  %v4982_v32 = vld [vmem:[#allocation86_spill] sm:$0xff] }
 0x211   : > { %v2278_v56 = vadd.f32 %v2277_v38, %v2188_v63  ;;  %v1861_v57 = vpop.f32.mrf.mxu1  ;;  %v2368_v52 = vpop.f32.mrf.mxu0  ;;  %v934_v39 = vadd.f32 -0.375, %v838_v23  ;;  %v4983_v23 = vunpack.c.h.bf16 %v4982_v32 }
 0x212   : > { %v1968_v38 = vpack.c.bf16 %v4523_v5, %v4520_v62  ;;  %v5015_v62 = vld [vmem:[#allocation104_spill] sm:$0xff] }
 0x213   : > { %v2367_v46 = vadd.f32 %v2366_v20, %v2278_v56  ;;  %v1963_v11 = vpack.c.bf16 %v937_v9, %v934_v39  ;;  %v4978_v20 = vld [vmem:[#allocation85_spill] sm:$0xff]  ;;  %v655_v41 = vmul.f32 1.5, %v4983_v23 }
 0x214   : > { %v1862_v10 = vadd.f32 %v1861_v57, %v4978_v20  ;;  %v4981_v57 = vunpack.c.h.bf16 %v4011_v18  ;;  %v4988_v18 = vld [vmem:[#allocation91_spill] sm:$0xff] }
 0x215   : > { %v2440_v25 = vadd.f32 %v2367_v46, %v1860_v47  ;;  %v845_v47 = vmul.f32 %v653_v13, %v4984_v2  ;;  %v848_v46 = vmul.f32 %v656_v3, %v4985_v8  ;;  %v4989_v3 = vld [vmem:[#allocation21_spill] sm:$0xff]  ;;  %v4994_v2 = vld [vmem:[#allocation94_spill] sm:$0xff] }
 0x217   : > { %2472 = vst [vmem:[%s4460_s26 + $0x20] sm:$0xff] %v2440_v25 }
 0x218   : > { %v2190_v21 = vpop.f32.mrf.mxu2  ;;  %v2279_v15 = vpop.f32.mrf.mxu3 }
 0x219   : > { %v2280_v60 = vadd.f32 %v2279_v15, %v2190_v21  ;;  %v1864_v16 = vpop.f32.mrf.mxu1  ;;  %v2371_v58 = vpop.f32.mrf.mxu0  ;;  %v941_v15 = vadd.f32 -0.375, %v845_v47  ;;  %v4995_v47 = vunpack.c.l.bf16 %v4994_v2 }
 0x21a   : > { %v1865_v9 = vadd.f32 %v1864_v16, %v4988_v18 }
 0x21b   : > { %v2369_v63 = vadd.f32 %v2368_v52, %v2280_v60  ;;  %v652_v52 = vmul.f32 1.5, %v4981_v57  ;;  %v4990_v57 = vld [vmem:[#allocation22_spill] sm:$0xff]  ;;  %v662_v8 = vmul.f32 1.5, %v4995_v47 }
 0x21c   : > { %1903 = vmatmul.bf16.gmra.mxu1 %v4797_v45  ;;  %2410 = vmatmul.bf16.gmra.mxu0 %v1964_v55  ;;  %v944_v55 = vadd.f32 -0.375, %v848_v46  ;;  %v4551_v16 = vadd.f32 -0.375, %v4990_v57  ;;  %v5004_v47 = vld [vmem:[#allocation30_spill] sm:$0xff] }
 0x21d   : > { %v2441_v56 = vadd.f32 %v2369_v63, %v1862_v10  ;;  %2232 = vmatmul.bf16.gmra.mxu2 %v1962_v36  ;;  %2321 = vmatmul.bf16.gmra.mxu3 %v1963_v11  ;;  %v844_v31 = vmul.f32 %v652_v52, %v4986_v33  ;;  %v4987_v36 = vld [vmem:[#allocation88_spill] sm:$0xff] }
 0x21e   : > { %v847_v39 = vmul.f32 %v655_v41, %v4987_v36  ;;  %v1967_v10 = vpack.c.bf16 %v944_v55, %v941_v15  ;;  %v4992_v41 = vld [vmem:[#allocation93_spill] sm:$0xff]  ;;  %v4998_v33 = vld [vmem:[#allocation96_spill] sm:$0xff] }
 0x21f   : > { %2473 = vst [vmem:[%s4460_s26 + $0x28] sm:$0xff] %v2441_v56  ;;  %v940_v11 = vadd.f32 -0.375, %v844_v31  ;;  %v4548_v56 = vadd.f32 -0.375, %v4989_v3  ;;  %v4999_v31 = vunpack.c.h.bf16 %v4998_v33  ;;  %v5007_v33 = vld [vmem:[#allocation101_spill] sm:$0xff] }
 0x220   : > { %v2193_v50 = vpop.f32.mrf.mxu2  ;;  %v2282_v26 = vpop.f32.mrf.mxu3  ;;  %v943_v35 = vadd.f32 -0.375, %v847_v39 }
 0x221   : > { %v2283_v49 = vadd.f32 %v2282_v26, %v2193_v50  ;;  %v1866_v34 = vpop.f32.mrf.mxu1  ;;  %v2373_v25 = vpop.f32.mrf.mxu0  ;;  %v1971_v23 = vpack.c.bf16 %v4551_v16, %v4548_v56  ;;  %v4993_v50 = vunpack.c.l.bf16 %v4992_v41  ;;  %v661_v36 = vmul.f32 1.5, %v4999_v31  ;;  %v5026_v16 = vld [vmem:[#allocation113_spill] sm:$0xff] }
 0x222   : > { %v1966_v19 = vpack.c.bf16 %v943_v35, %v940_v11  ;;  %v5002_v35 = vld [vmem:[#allocation99_spill] sm:$0xff]  ;;  %v5008_v31 = vunpack.c.l.bf16 %v5007_v33  ;;  %v5018_v33 = vld [vmem:[#allocation110_spill] sm:$0xff] }
 0x223   : > { %v2372_v21 = vadd.f32 %v2371_v58, %v2283_v49  ;;  %v4991_v58 = vld [vmem:[#allocation92_spill] sm:$0xff]  ;;  %v659_v26 = vmul.f32 1.5, %v4993_v50  ;;  %v4996_v49 = vld [vmem:[#allocation95_spill] sm:$0xff] }
 0x224   : > { %v1867_v52 = vadd.f32 %v1866_v34, %v4991_v58  ;;  %v4997_v34 = vunpack.c.h.bf16 %v4996_v49 }
 0x225   : > { %v2442_v60 = vadd.f32 %v2372_v21, %v1865_v9  ;;  %v851_v9 = vmul.f32 %v659_v26, %v4086_v4  ;;  %v854_v21 = vmul.f32 %v662_v8, %v4090_v6  ;;  %v5003_v26 = vld [vmem:[#allocation29_spill] sm:$0xff] }
 0x226   : > { %v4576_v2 = vadd.f32 -0.375, %v5003_v26 }
 0x227   : > { %2474 = vst [vmem:[%s4460_s26 + $0x30] sm:$0xff] %v2442_v60 }
 0x228   : > { %v2195_v1 = vpop.f32.mrf.mxu2  ;;  %v2284_v20 = vpop.f32.mrf.mxu3 }
 0x229   : > { %v2285_v63 = vadd.f32 %v2284_v20, %v2195_v1  ;;  %v1869_v22 = vpop.f32.mrf.mxu1  ;;  %v2376_v13 = vpop.f32.mrf.mxu0 }
 0x22a   : > { %v1870_v1 = vadd.f32 %v1869_v22, %v5002_v35  ;;  %v4579_v22 = vadd.f32 -0.375, %v5004_v47 }
 0x22b   : > { %v2374_v32 = vadd.f32 %v2373_v25, %v2285_v63  ;;  %v658_v25 = vmul.f32 1.5, %v4997_v34  ;;  %v950_v63 = vadd.f32 -0.375, %v854_v21  ;;  %v5006_v34 = vunpack.c.l.bf16 %v4104_v0 }
 0x22c   : > { %1908 = vmatmul.bf16.gmra.mxu1 %v4797_v45  ;;  %2415 = vmatmul.bf16.gmra.mxu0 %v1967_v10  ;;  %v947_v10 = vadd.f32 -0.375, %v851_v9  ;;  %v1974_v49 = vpack.c.bf16 %v4579_v22, %v4576_v2 }
 0x22d   : > { %v2443_v46 = vadd.f32 %v2374_v32, %v1867_v52  ;;  %2237 = vmatmul.bf16.gmra.mxu2 %v1965_v59  ;;  %2326 = vmatmul.bf16.gmra.mxu3 %v1966_v19  ;;  %v850_v61 = vmul.f32 %v658_v25, %v5000_v40  ;;  %v5001_v59 = vld [vmem:[#allocation98_spill] sm:$0xff]  ;;  %v665_v25 = vmul.f32 1.5, %v5006_v34 }
 0x22e   : > { %v853_v11 = vmul.f32 %v661_v36, %v5001_v59  ;;  %v1970_v52 = vpack.c.bf16 %v950_v63, %v947_v10  ;;  %v668_v36 = vmul.f32 1.5, %v5008_v31 }
 0x22f   : > { %2475 = vst [vmem:[%s4460_s26 + $0x38] sm:$0xff] %v2443_v46  ;;  %v946_v3 = vadd.f32 -0.375, %v850_v61  ;;  %v5013_v61 = vld [vmem:[#allocation106_spill] sm:$0xff] }
 0x230   : > { %v2198_v39 = vpop.f32.mrf.mxu2  ;;  %v2287_v18 = vpop.f32.mrf.mxu3  ;;  %v949_v57 = vadd.f32 -0.375, %v853_v11  ;;  %v857_v59 = vmul.f32 %v665_v25, %v5013_v61  ;;  %v5014_v11 = vld [vmem:[#allocation107_spill] sm:$0xff] }
 0x231   : > { %v2288_v15 = vadd.f32 %v2287_v18, %v2198_v39  ;;  %v1871_v55 = vpop.f32.mrf.mxu1  ;;  %v2378_v60 = vpop.f32.mrf.mxu0  ;;  %v5009_v18 = vld [vmem:[#allocation102_spill] sm:$0xff]  ;;  %v860_v35 = vmul.f32 %v668_v36, %v5014_v11 }
 0x232   : > { %v1969_v50 = vpack.c.bf16 %v949_v57, %v946_v3  ;;  %v5010_v9 = vunpack.c.h.bf16 %v5009_v18  ;;  %v5021_v18 = vunpack.c.l.bf16 %v4149_v28 }
 0x233   : > { %v2377_v20 = vadd.f32 %v2376_v13, %v2288_v15  ;;  %v5005_v13 = vld [vmem:[#allocation100_spill] sm:$0xff]  ;;  %v5011_v15 = vld [vmem:[#allocation103_spill] sm:$0xff] }
 0x234   : > { %v1872_v8 = vadd.f32 %v1871_v55, %v5005_v13  ;;  %v664_v21 = vmul.f32 1.5, %v5010_v9  ;;  %v5012_v55 = vunpack.c.h.bf16 %v5011_v15  ;;  %v674_v9 = vmul.f32 1.5, %v5021_v18  ;;  %v5022_v15 = vld [vmem:[#allocation111_spill] sm:$0xff] }
 0x235   : > { %v2444_v19 = vadd.f32 %v2377_v20, %v1870_v1 }
 0x236   : > { %v856_v5 = vmul.f32 %v664_v21, %v5015_v62  ;;  %v866_v28 = vmul.f32 %v674_v9, %v4178_v24  ;;  %v5027_v62 = vld [vmem:[#allocation114_spill] sm:$0xff] }
 0x237   : > { %2476 = vst [vmem:[%s4460_s26 + $0x40] sm:$0xff] %v2444_v19  ;;  %v5017_v19 = vld [vmem:[#allocation108_spill] sm:$0xff] }
 0x238   : > { %v2200_v58 = vpop.f32.mrf.mxu2  ;;  %v2289_v4 = vpop.f32.mrf.mxu3 }
 0x239   : > { %v2290_v6 = vadd.f32 %v2289_v4, %v2200_v58  ;;  %v1874_v32 = vpop.f32.mrf.mxu1  ;;  %v2381_v41 = vpop.f32.mrf.mxu0  ;;  %v953_v58 = vadd.f32 -0.375, %v857_v59  ;;  %v956_v4 = vadd.f32 -0.375, %v860_v35 }
 0x23a   : > { %v1875_v3 = vadd.f32 %v1874_v32, %v5017_v19  ;;  %v5019_v32 = vld [vmem:[#allocation109_spill] sm:$0xff]  ;;  %v962_v19 = vadd.f32 -0.375, %v866_v28 }
 0x23b   : > { %v2379_v46 = vadd.f32 %v2378_v60, %v2290_v6  ;;  %v667_v60 = vmul.f32 1.5, %v5012_v55  ;;  %v952_v6 = vadd.f32 -0.375, %v856_v5  ;;  %v1973_v13 = vpack.c.bf16 %v956_v4, %v953_v58 }
 0x23c   : > { %1913 = vmatmul.bf16.gmra.mxu1 %v4797_v45  ;;  %2420 = vmatmul.bf16.gmra.mxu0 %v1970_v52  ;;  %v5023_v55 = vunpack.c.h.bf16 %v5022_v15 }
 0x23d   : > { %v2445_v39 = vadd.f32 %v2379_v46, %v1872_v8  ;;  %2242 = vmatmul.bf16.gmra.mxu2 %v1968_v38  ;;  %2331 = vmatmul.bf16.gmra.mxu3 %v1969_v50  ;;  %v5016_v38 = vld [vmem:[#allocation105_spill] sm:$0xff] }
 0x23e   : > { %v859_v63 = vmul.f32 %v667_v60, %v5016_v38  ;;  %v670_v60 = vmul.f32 1.5, %v5023_v55 }
 0x23f   : > { %2477 = vst [vmem:[%s4460_s26 + $0x48] sm:$0xff] %v2445_v39 }
 0x240   : > { %v2203_v40 = vpop.f32.mrf.mxu2  ;;  %v2292_v0 = vpop.f32.mrf.mxu3  ;;  %v955_v50 = vadd.f32 -0.375, %v859_v63  ;;  %v862_v56 = vmul.f32 %v670_v60, %v4166_v37 }
 0x241   : > { %v2293_v1 = vadd.f32 %v2292_v0, %v2203_v40  ;;  %v1876_v20 = vpop.f32.mrf.mxu1  ;;  %v2383_v10 = vpop.f32.mrf.mxu0  ;;  %v5024_v40 = vld [vmem:[#allocation112_spill] sm:$0xff] }
 0x242   : > { %v1972_v25 = vpack.c.bf16 %v955_v50, %v952_v6  ;;  %v1877_v31 = vadd.f32 %v1876_v20, %v5018_v33  ;;  %v5025_v0 = vunpack.c.h.bf16 %v5024_v40 }
 0x243   : > { %v2382_v57 = vadd.f32 %v2381_v41, %v2293_v1  ;;  %v5020_v41 = vunpack.c.l.bf16 %v5019_v32 }
 0x244   : > { %v673_v61 = vmul.f32 1.5, %v5025_v0 }
 0x245   : > { %v2446_v52 = vadd.f32 %v2382_v57, %v1875_v3  ;;  %v671_v39 = vmul.f32 1.5, %v5020_v41  ;;  %v958_v57 = vadd.f32 -0.375, %v862_v56 }
 0x247   : > { %2478 = vst [vmem:[%s4460_s26 + $0x50] sm:$0xff] %v2446_v52  ;;  %v863_v35 = vmul.f32 %v671_v39, %v4174_v42 }
 0x248   : > { %v2205_v26 = vpop.f32.mrf.mxu2  ;;  %v2294_v47 = vpop.f32.mrf.mxu3 }
 0x249   : > { %v2295_v8 = vadd.f32 %v2294_v47, %v2205_v26  ;;  %v1879_v46 = vpop.f32.mrf.mxu1  ;;  %v2386_v34 = vpop.f32.mrf.mxu0  ;;  %v959_v63 = vadd.f32 -0.375, %v863_v35 }
 0x24a   : > { %v1880_v5 = vadd.f32 %v1879_v46, %v5027_v62 }
 0x24b   : > { %v2384_v36 = vadd.f32 %v2383_v10, %v2295_v8  ;;  %v1976_v24 = vpack.c.bf16 %v962_v19, %v959_v63 }
 0x24c   : > { %1918 = vmatmul.bf16.gmra.mxu1 %v4797_v45  ;;  %2425 = vmatmul.bf16.gmra.mxu0 %v1973_v13 }
 0x24d   : > { %v2447_v21 = vadd.f32 %v2384_v36, %v1877_v31  ;;  %2247 = vmatmul.bf16.gmra.mxu2 %v1971_v23  ;;  %2336 = vmatmul.bf16.gmra.mxu3 %v1972_v25  ;;  %v865_v23 = vmul.f32 %v673_v61, %v5026_v16 }
 0x24f   : > { %2479 = vst [vmem:[%s4460_s26 + $0x58] sm:$0xff] %v2447_v21  ;;  %v961_v58 = vadd.f32 -0.375, %v865_v23 }
 0x250   : > { %v2208_v59 = vpop.f32.mrf.mxu2  ;;  %v2297_v11 = vpop.f32.mrf.mxu3 }
 0x251   : > { %v2298_v1 = vadd.f32 %v2297_v11, %v2208_v59  ;;  %v1881_v20 = vpop.f32.mrf.mxu1  ;;  %v2388_v10 = vpop.f32.mrf.mxu0  ;;  %v1975_v26 = vpack.c.bf16 %v961_v58, %v958_v57 }
 0x252   : > { %v1882_v37 = vadd.f32 %v1881_v20, %v4210_v53 }
 0x253   : > { %v2387_v38 = vadd.f32 %v2386_v34, %v2298_v1 }
 0x255   : > { %v2448_v3 = vadd.f32 %v2387_v38, %v1880_v5 }
 0x257   : > { %2480 = vst [vmem:[%s4460_s26 + $0x60] sm:$0xff] %v2448_v3 }
 0x258   : > { %v2210_v42 = vpop.f32.mrf.mxu2  ;;  %v2299_v4 = vpop.f32.mrf.mxu3 }
 0x259   : > { %v2300_v52 = vadd.f32 %v2299_v4, %v2210_v42  ;;  %v1884_v6 = vpop.f32.mrf.mxu1  ;;  %v2391_v50 = vpop.f32.mrf.mxu0 }
 0x25a   : > { %v1885_v53 = vadd.f32 %v1884_v6, %v4213_v30 }
 0x25b   : > { %v2389_v47 = vadd.f32 %v2388_v10, %v2300_v52 }
 0x25c   : > { %1923 = vmatmul.bf16.gmra.mxu1 %v4797_v45  ;;  %2430 = vmatmul.bf16.gmra.mxu0 %v1976_v24 }
 0x25d   : > { %v2449_v13 = vadd.f32 %v2389_v47, %v1882_v37  ;;  %2252 = vmatmul.bf16.gmra.mxu2 %v1974_v49  ;;  %2341 = vmatmul.bf16.gmra.mxu3 %v1975_v26 }
 0x25f   : > { %2481 = vst [vmem:[%s4460_s26 + $0x68] sm:$0xff] %v2449_v13 }
 0x260   : > { %v2213_v8 = vpop.f32.mrf.mxu2  ;;  %v2302_v46 = vpop.f32.mrf.mxu3 }
 0x261   : > { %v2303_v34 = vadd.f32 %v2302_v46, %v2213_v8  ;;  %v1886_v25 = vpop.f32.mrf.mxu1  ;;  %v2393_v33 = vpop.f32.mrf.mxu0 }
 0x262   : > { %v1887_v22 = vadd.f32 %v1886_v25, %v4247_v54 }
 0x263   : > { %v2392_v31 = vadd.f32 %v2391_v50, %v2303_v34 }
 0x265   : > { %v2450_v36 = vadd.f32 %v2392_v31, %v1885_v53 }
 0x267   : > { %2482 = vst [vmem:[%s4460_s26 + $0x70] sm:$0xff] %v2450_v36 }
 0x268   : > { %v2215_v45 = vpop.f32.mrf.mxu2  ;;  %v2304_v32 = vpop.f32.mrf.mxu3 }
 0x269   : > { %v2305_v41 = vadd.f32 %v2304_v32, %v2215_v45  ;;  %v1889_v39 = vpop.f32.mrf.mxu1  ;;  %v2396_v2 = vpop.f32.mrf.mxu0 }
 0x26a   : > { %v1890_v60 = vadd.f32 %v1889_v39, %v4250_v17 }
 0x26b   : > { %v2394_v49 = vadd.f32 %v2393_v33, %v2305_v41 }
 0x26d   : > { %v2451_v18 = vadd.f32 %v2394_v49, %v1887_v22 }
 0x26f   : > { %2483 = vst [vmem:[%s4460_s26 + $0x78] sm:$0xff] %v2451_v18 }
 0x270   : > { %v2218_v9 = vpop.f32.mrf.mxu2  ;;  %v2307_v21 = vpop.f32.mrf.mxu3 }
 0x271   : > { %v2308_v15 = vadd.f32 %v2307_v21, %v2218_v9  ;;  %v1891_v55 = vpop.f32.mrf.mxu1  ;;  %v2398_v30 = vpop.f32.mrf.mxu0 }
 0x272   : > { %v1892_v28 = vadd.f32 %v1891_v55, %v4278_v43 }
 0x273   : > { %v2397_v40 = vadd.f32 %v2396_v2, %v2308_v15 }
 0x275   : > { %v2452_v0 = vadd.f32 %v2397_v40, %v1890_v60 }
 0x277   : > { %2484 = vst [vmem:[%s4460_s26 + $0x80] sm:$0xff] %v2452_v0 }
 0x278   : > { %v2220_v61 = vpop.f32.mrf.mxu2  ;;  %v2309_v59 = vpop.f32.mrf.mxu3 }
 0x279   : > { %v2310_v11 = vadd.f32 %v2309_v59, %v2220_v61  ;;  %v1894_v35 = vpop.f32.mrf.mxu1  ;;  %v2401_v54 = vpop.f32.mrf.mxu0  ;;  %v5028_v61 = vld [vmem:[#allocation31_spill] sm:$0xff] }
 0x27a   : > { %v1895_v62 = vadd.f32 %v1894_v35, %v4281_v27 }
 0x27b   : > { %v2399_v1 = vadd.f32 %v2398_v30, %v2310_v11 }
 0x27d   : > { %v2453_v20 = vadd.f32 %v2399_v1, %v1892_v28 }
 0x27f   : > { %2485 = vst [vmem:[%s4460_s26 + $0x88] sm:$0xff] %v2453_v20 }
 0x280   : > { %v2223_v10 = vpop.f32.mrf.mxu2  ;;  %v2312_v56 = vpop.f32.mrf.mxu3 }
 0x281   : > { %v2313_v16 = vadd.f32 %v2312_v56, %v2223_v10  ;;  %v1896_v23 = vpop.f32.mrf.mxu1  ;;  %v2403_v17 = vpop.f32.mrf.mxu0  ;;  %v5029_v10 = vld [vmem:[#allocation50_spill] sm:$0xff] }
 0x282   : > { %v1897_v58 = vadd.f32 %v1896_v23, %v4309_v44 }
 0x283   : > { %v2402_v5 = vadd.f32 %v2401_v54, %v2313_v16 }
 0x285   : > { %v2454_v38 = vadd.f32 %v2402_v5, %v1895_v62 }
 0x287   : > { %2486 = vst [vmem:[%s4460_s26 + $0x90] sm:$0xff] %v2454_v38 }
 0x288   : > { %v2225_v63 = vpop.f32.mrf.mxu2  ;;  %v2314_v19 = vpop.f32.mrf.mxu3 }
 0x289   : > { %v2315_v3 = vadd.f32 %v2314_v19, %v2225_v63  ;;  %v1899_v57 = vpop.f32.mrf.mxu1  ;;  %v2406_v43 = vpop.f32.mrf.mxu0  ;;  %v5030_v19 = vld [vmem:[#allocation52_spill] sm:$0xff] }
 0x28a   : > { %v1900_v26 = vadd.f32 %v1899_v57, %v4312_v29 }
 0x28b   : > { %v2404_v42 = vadd.f32 %v2403_v17, %v2315_v3 }
 0x28d   : > { %v2455_v4 = vadd.f32 %v2404_v42, %v1897_v58 }
 0x28f   : > { %2487 = vst [vmem:[%s4460_s26 + $0x98] sm:$0xff] %v2455_v4 }
 0x290   : > { %v2228_v24 = vpop.f32.mrf.mxu2  ;;  %v2317_v52 = vpop.f32.mrf.mxu3 }
 0x291   : > { %v2318_v6 = vadd.f32 %v2317_v52, %v2228_v24  ;;  %v1901_v50 = vpop.f32.mrf.mxu1  ;;  %v2408_v27 = vpop.f32.mrf.mxu0  ;;  %v5031_v52 = vld [vmem:[#allocation2_spill] sm:$0xff] }
 0x292   : > { %v1902_v25 = vadd.f32 %v1901_v50, %v4340_v7 }
 0x293   : > { %v2407_v37 = vadd.f32 %v2406_v43, %v2318_v6 }
 0x295   : > { %v2456_v47 = vadd.f32 %v2407_v37, %v1900_v26 }
 0x297   : > { %2488 = vst [vmem:[%s4460_s26 + $0xa0] sm:$0xff] %v2456_v47 }
 0x298   : > { %v2230_v13 = vpop.f32.mrf.mxu2  ;;  %v2319_v8 = vpop.f32.mrf.mxu3 }
 0x299   : > { %v2320_v46 = vadd.f32 %v2319_v8, %v2230_v13  ;;  %v1904_v34 = vpop.f32.mrf.mxu1  ;;  %v2411_v44 = vpop.f32.mrf.mxu0  ;;  %v5032_v8 = vld [vmem:[#allocation3_spill] sm:$0xff] }
 0x29a   : > { %v1905_v41 = vadd.f32 %v1904_v34, %v4343_v48 }
 0x29b   : > { %v2409_v33 = vadd.f32 %v2408_v27, %v2320_v46 }
 0x29d   : > { %v2457_v53 = vadd.f32 %v2409_v33, %v1902_v25 }
 0x29f   : > { %2489 = vst [vmem:[%s4460_s26 + $0xa8] sm:$0xff] %v2457_v53 }
 0x2a0   : > { %v2233_v31 = vpop.f32.mrf.mxu2  ;;  %v2322_v36 = vpop.f32.mrf.mxu3 }
 0x2a1   : > { %v2323_v45 = vadd.f32 %v2322_v36, %v2233_v31  ;;  %v1906_v32 = vpop.f32.mrf.mxu1  ;;  %v2413_v29 = vpop.f32.mrf.mxu0 }
 0x2a2   : > { %v1907_v21 = vadd.f32 %v1906_v32, %v4365_v12 }
 0x2a3   : > { %v2412_v39 = vadd.f32 %v2411_v44, %v2323_v45  ;;  %v5033_v45 = vld [vmem:[#allocation32_spill] sm:$0xff] }
 0x2a5   : > { %v2458_v2 = vadd.f32 %v2412_v39, %v1905_v41 }
 0x2a7   : > { %2490 = vst [vmem:[%s4460_s26 + $0xb0] sm:$0xff] %v2458_v2 }
 0x2a8   : > { %v2235_v22 = vpop.f32.mrf.mxu2  ;;  %v2324_v49 = vpop.f32.mrf.mxu3 }
 0x2a9   : > { %v2325_v18 = vadd.f32 %v2324_v49, %v2235_v22  ;;  %v1909_v9 = vpop.f32.mrf.mxu1  ;;  %v2416_v7 = vpop.f32.mrf.mxu0 }
 0x2aa   : > { %v1910_v59 = vadd.f32 %v1909_v9, %v5028_v61 }
 0x2ab   : > { %v2414_v15 = vadd.f32 %v2413_v29, %v2325_v18 }
 0x2ad   : > { %v2459_v55 = vadd.f32 %v2414_v15, %v1907_v21 }
 0x2af   : > { %2491 = vst [vmem:[%s4460_s26 + $0xb8] sm:$0xff] %v2459_v55 }
 0x2b0   : > { %v2238_v30 = vpop.f32.mrf.mxu2  ;;  %v2327_v60 = vpop.f32.mrf.mxu3 }
 0x2b1   : > { %v2328_v40 = vadd.f32 %v2327_v60, %v2238_v30  ;;  %v1911_v0 = vpop.f32.mrf.mxu1  ;;  %v2418_v48 = vpop.f32.mrf.mxu0 }
 0x2b2   : > { %v1912_v56 = vadd.f32 %v1911_v0, %v5029_v10 }
 0x2b3   : > { %v2417_v11 = vadd.f32 %v2416_v7, %v2328_v40 }
 0x2b5   : > { %v2460_v35 = vadd.f32 %v2417_v11, %v1910_v59 }
 0x2b7   : > { %2492 = vst [vmem:[%s4460_s26 + $0xc0] sm:$0xff] %v2460_v35 }
 0x2b8   : > { %v2240_v54 = vpop.f32.mrf.mxu2  ;;  %v2329_v28 = vpop.f32.mrf.mxu3 }
 0x2b9   : > { %v2330_v1 = vadd.f32 %v2329_v28, %v2240_v54  ;;  %v1914_v20 = vpop.f32.mrf.mxu1  ;;  %v2421_v12 = vpop.f32.mrf.mxu0 }
 0x2ba   : > { %v1915_v3 = vadd.f32 %v1914_v20, %v5030_v19 }
 0x2bb   : > { %v2419_v16 = vadd.f32 %v2418_v48, %v2330_v1 }
 0x2bd   : > { %v2461_v23 = vadd.f32 %v2419_v16, %v1912_v56 }
 0x2bf   : > { %2493 = vst [vmem:[%s4460_s26 + $0xc8] sm:$0xff] %v2461_v23 }
 0x2c0   : > { %v2243_v17 = vpop.f32.mrf.mxu2  ;;  %v2332_v62 = vpop.f32.mrf.mxu3 }
 0x2c1   : > { %v2333_v5 = vadd.f32 %v2332_v62, %v2243_v17  ;;  %v1916_v38 = vpop.f32.mrf.mxu1  ;;  %v2423_v63 = vpop.f32.mrf.mxu0 }
 0x2c2   : > { %v1917_v6 = vadd.f32 %v1916_v38, %v5031_v52 }
 0x2c3   : > { %v2422_v57 = vadd.f32 %v2421_v12, %v2333_v5 }
 0x2c5   : > { %v2462_v43 = vadd.f32 %v2422_v57, %v1915_v3 }
 0x2c7   : > { %2494 = vst [vmem:[%s4460_s26 + $0xd0] sm:$0xff] %v2462_v43 }
 0x2c8   : > { %v2245_v58 = vpop.f32.mrf.mxu2  ;;  %v2334_v42 = vpop.f32.mrf.mxu3 }
 0x2c9   : > { %v2335_v4 = vadd.f32 %v2334_v42, %v2245_v58  ;;  %v1919_v24 = vpop.f32.mrf.mxu1  ;;  %v2426_v27 = vpop.f32.mrf.mxu0 }
 0x2ca   : > { %v1920_v46 = vadd.f32 %v1919_v24, %v5032_v8 }
 0x2cb   : > { %v2424_v50 = vadd.f32 %v2423_v63, %v2335_v4 }
 0x2cd   : > { %v2463_v26 = vadd.f32 %v2424_v50, %v1917_v6 }
 0x2cf   : > { %2495 = vst [vmem:[%s4460_s26 + $0xd8] sm:$0xff] %v2463_v26 }
 0x2d0   : > { %v2248_v37 = vpop.f32.mrf.mxu2  ;;  %v2337_v47 = vpop.f32.mrf.mxu3 }
 0x2d1   : > { %v2338_v13 = vadd.f32 %v2337_v47, %v2248_v37  ;;  %v1921_v44 = vpop.f32.mrf.mxu1  ;;  %v2428_v33 = vpop.f32.mrf.mxu0 }
 0x2d2   : > { %v1922_v32 = vadd.f32 %v1921_v44, %v5033_v45 }
 0x2d3   : > { %v2427_v34 = vadd.f32 %v2426_v27, %v2338_v13 }
 0x2d5   : > { %v2464_v25 = vadd.f32 %v2427_v34, %v1920_v46 }
 0x2d7   : > { %2496 = vst [vmem:[%s4460_s26 + $0xe0] sm:$0xff] %v2464_v25 }
 0x2d8   : > { %v2250_v53 = vpop.f32.mrf.mxu2  ;;  %v2339_v31 = vpop.f32.mrf.mxu3 }
 0x2d9   : > { %v2340_v36 = vadd.f32 %v2339_v31, %v2250_v53  ;;  %v1924_v39 = vpop.f32.mrf.mxu1  ;;  %v2431_v2 = vpop.f32.mrf.mxu0 }
 0x2da   : > { %v1925_v9 = vadd.f32 %v1924_v39, %v4426_v14 }
 0x2db   : > { %v2429_v29 = vadd.f32 %v2428_v33, %v2340_v36 }
 0x2dd   : > { %v2465_v41 = vadd.f32 %v2429_v29, %v1922_v32 }
 0x2df   : > { %2497 = vst [vmem:[%s4460_s26 + $0xe8] sm:$0xff] %v2465_v41 }
 0x2e0   : > { %v2253_v22 = vpop.f32.mrf.mxu2  ;;  %v2342_v49 = vpop.f32.mrf.mxu3 }
 0x2e1   : > { %v2343_v18 = vadd.f32 %v2342_v49, %v2253_v22  ;;  %v1926_v15 = vpop.f32.mrf.mxu1  ;;  %v2433_v40 = vpop.f32.mrf.mxu0 }
 0x2e2   : > { %v1927_v0 = vadd.f32 %v1926_v15, %v4449_v51 }
 0x2e3   : > { %v2432_v7 = vadd.f32 %v2431_v2, %v2343_v18 }
 0x2e5   : > { %v2466_v21 = vadd.f32 %v2432_v7, %v1925_v9 }
 0x2e7   : > { %2498 = vst [vmem:[%s4460_s26 + $0xf0] sm:$0xff] %v2466_v21 }
 0x2e8   : > { %v2255_v55 = vpop.f32.mrf.mxu2  ;;  %v2344_v30 = vpop.f32.mrf.mxu3 }
 0x2e9   : > { %v2345_v60 = vadd.f32 %v2344_v30, %v2255_v55 }
 0x2eb   : > { %v2434_v48 = vadd.f32 %v2433_v40, %v2345_v60 }
 0x2ed   : > { %v2467_v61 = vadd.f32 %v2434_v48, %v1927_v0 }
 0x2ef   : > { %2499 = vst [vmem:[%s4460_s26 + $0xf8] sm:$0xff] %v2467_v61 }
 0x2f0 PF: > { %s12_s11 = sadd.s32 1, %s3057_s11   ;;  %s5034_s9 = smov %s3053_s10 }
 0x2f1   : > { %p9_p5 = scmp.ge.s32.totalorder %s12_s11, 4   ;;  %s5035_s10 = smov %s5037_s12 }
 0x2f3   :  { %11 = sbr.rel (!%p9_p5) target bundleno = 2 (0x2), region = 61 }

// kernel: pointnet_kan_forward.5
= control target key start
LH: loop header
LB: loop body
LE: loop exit
PB: predicated region body
PF: predicated region fallthrough
CT: control target
= control target key end

     0   :  { %s1429_s9 = smov 0   ;;  %s1431_s10 = smov 0   ;;  %s1771_s0 = inlined_call_operand.vmem [shape: bf16[512,128], index: 0, kind: input, shape index: {}]   ;;  %s1772_s1 = inlined_call_operand.vmem [shape: bf16[384,128], index: 1, kind: input, shape index: {}]   ;;  %s1773_s2 = inlined_call_operand.vmem [shape: f32[512,128], index: 2, kind: output, shape index: {}]  }
   0x1   :  { %s1433_s11 = smov 0  }
   0x2 LB: > { %s31_s12 = sadd.s32 1, %s1407_s10  ;;  %p1134_p0 = scmp.ge.s32.totalorder %s1411_s11, 1  ;;  %s1411_s11 = sphi %s1433_s11, %s12_s11   ;;  %s1407_s10 = sphi %s1431_s10, %s1775_s10   ;;  %s1403_s9 = sphi %s1429_s9, %s1774_s9  }
   0x3   : > { %p33_p1 = scmp.ge.s32.totalorder %s31_s12, 2  ;;  %p155_p2 = scmp.lt.s32.totalorder %s1411_s11, 3 }
   0x5   : > { %s1777_s12 = smov (%p33_p1, %s31_s12), 0  ;;  %p156_p3 = pnand %p1134_p0, %p155_p2 }
   0x6   : > { %s1135_s19 = sshll.u32 (!%p156_p3), %s1403_s9, 5 }
   0x7   : > { %159 = sbr.rel (%p156_p3) target bundleno = 365 (0x16d), region = 28  ;;  %p192_p4 = scmp.lt.s32.totalorder (!%p156_p3), %s1135_s19, 63 }
   0xc   : > { %v1252_v0 = vld [vmem:[%s1772_s1 + $0x78] sm:$0xff]  ;;  %v1251_v3 = vld [vmem:[%s1772_s1 + $0x70] sm:$0xff]  ;;  %s1779_s19 = smov (!%p192_p4, %s1135_s19), 63  ;;  %v1250_v6 = vld [vmem:[%s1772_s1 + $0x68] sm:$0xff]  ;;  %v1413_v50 = vmov 1065369472  }
   0xd   : > { %v1453_v1 = vld [vmem:[%s1772_s1 + $0x38] sm:$0xff]  ;;  %571 = vmatpush.bf16.msra.mxu0 %v1252_v0  ;;  %1340 = vmatpush.bf16.msra.mxu3 %v1252_v0  ;;  %v1468_v4 = vld [vmem:[%s1772_s1 + $0x30] sm:$0xff]  ;;  %s1136_s26 = sshll.u32 %s1779_s19, 2  ;;  %v1486_v7 = vld [vmem:[%s1772_s1 + $0x28] sm:$0xff]  ;;  %s1138_s18 = sshll.u32 %s1779_s19, 3 }
   0xe   : > { %v1458_v2 = vld [vmem:[%s1772_s1 + $0xb8] sm:$0xff]  ;;  %708 = vmatpush.bf16.msra.mxu1 %v1453_v1  ;;  %v1473_v5 = vld [vmem:[%s1772_s1 + $0xb0] sm:$0xff]  ;;  %v1491_v8 = vld [vmem:[%s1772_s1 + $0xa8] sm:$0xff]  ;;  %s1496_s7 = scalar_lea.vmem %s1771_s0, %s1136_s26  ;;  %s1672_s22 = scalar_lea.vmem %s1773_s2, %s1138_s18 }
   0xf   : > { %877 = vmatpush.bf16.msra.mxu2 %v1458_v2  ;;  %v1336_v9 = vld [vmem:[%s1496_s7 + $0x60] sm:$0xff]   ;;  %v1248_v20 = vld [vmem:[%s1772_s1 + $0x58] sm:$0xff]  ;;  %v1247_v27 = vld [vmem:[%s1772_s1 + $0x50] sm:$0xff] }
  0x10   : > { %v1311_v10 = vunpack.c.l.bf16 %v1336_v9  ;;  %v1312_v11 = vunpack.c.h.bf16 %v1336_v9  ;;  %v1249_v12 = vld [vmem:[%s1772_s1 + $0x60] sm:$0xff]  ;;  %v1527_v25 = vld [vmem:[%s1772_s1 + $0x18] sm:$0xff]  ;;  %v1542_v32 = vld [vmem:[%s1772_s1 + $0x10] sm:$0xff] }
  0x11   : > { %572 = vmatpush.bf16.msra.mxu0 %v1251_v3  ;;  %1341 = vmatpush.bf16.msra.mxu3 %v1251_v3  ;;  %v1507_v13 = vld [vmem:[%s1772_s1 + $0x20] sm:$0xff]  ;;  %v1532_v26 = vld [vmem:[%s1772_s1 + $0x98] sm:$0xff]  ;;  %v1547_v33 = vld [vmem:[%s1772_s1 + $0x90] sm:$0xff] }
  0x12   : > { %709 = vmatpush.bf16.msra.mxu1 %v1468_v4  ;;  %v1512_v14 = vld [vmem:[%s1772_s1 + $0xa0] sm:$0xff]  ;;  %v307_v16 = vmul.f32 0.5, %v1311_v10  ;;  %v308_v17 = vmul.f32 0.5, %v1312_v11  ;;  %v371_v18 = vmul.f32 1.5, %v1311_v10  ;;  %v372_v19 = vmul.f32 1.5, %v1312_v11  ;;  %v1246_v34 = vld [vmem:[%s1772_s1 + $0x48] sm:$0xff] }
  0x13   : > { %878 = vmatpush.bf16.msra.mxu2 %v1473_v5  ;;  %v1262_v15 = vld [vmem:[%s1496_s7] sm:$0xff]   ;;  %v1557_v37 = vld [vmem:[%s1772_s1 + $0x8] sm:$0xff]  ;;  %v1326_v0 = vld [vmem:[%s1496_s7 + $0x10] sm:$0xff]  }
  0x14   : > { %v1263_v21 = vunpack.c.l.bf16 %v1262_v15  ;;  %v1264_v22 = vunpack.c.h.bf16 %v1262_v15  ;;  %v1518_v23 = vmul.f32 %v371_v18, %v307_v16  ;;  %v1520_v24 = vmul.f32 %v372_v19, %v308_v17  ;;  %v1562_v38 = vld [vmem:[%s1772_s1 + $0x88] sm:$0xff]  ;;  %v1245_v39 = vld [vmem:[%s1772_s1 + $0x40] sm:$0xff]  ;;  %v1603_v11 = vld [vmem:[%s1496_s7 + $0x70] sm:$0xff]  }
  0x15   : > { %573 = vmatpush.bf16.msra.mxu0 %v1250_v6  ;;  %1342 = vmatpush.bf16.msra.mxu3 %v1250_v6  ;;  %v1237_v42 = vld [vmem:[%s1772_s1] sm:$0xff]  ;;  %v1325_v44 = vld [vmem:[%s1496_s7 + $0x8] sm:$0xff]   ;;  %v503_v46 = vpack.c.bf16 %v308_v17, %v307_v16  ;;  %v1271_v6 = vunpack.c.l.bf16 %v1326_v0  ;;  %v1319_v15 = vunpack.c.l.bf16 %v1603_v11  ;;  %v1320_v16 = vunpack.c.h.bf16 %v1603_v11 }
  0x16   : > { %710 = vmatpush.bf16.msra.mxu1 %v1486_v7  ;;  %v283_v28 = vmul.f32 0.5, %v1263_v21  ;;  %v284_v29 = vmul.f32 0.5, %v1264_v22  ;;  %v347_v30 = vmul.f32 1.5, %v1263_v21  ;;  %v348_v31 = vmul.f32 1.5, %v1264_v22  ;;  %v1575_v43 = vld [vmem:[%s1772_s1 + $0x80] sm:$0xff]  ;;  %v1582_v53 = vld [vmem:[%s1496_s7 + $0x68] sm:$0xff]  }
  0x17   : > { %879 = vmatpush.bf16.msra.mxu2 %v1491_v8  ;;  %v1267_v48 = vunpack.c.l.bf16 %v1325_v44  ;;  %v1268_v49 = vunpack.c.h.bf16 %v1325_v44  ;;  %v1315_v56 = vunpack.c.l.bf16 %v1582_v53  ;;  %v1316_v57 = vunpack.c.h.bf16 %v1582_v53 }
  0x18   : > { %v411_v35 = vmul.f32 %v347_v30, %v283_v28  ;;  %v412_v36 = vmul.f32 %v348_v31, %v284_v29  ;;  %v491_v45 = vpack.c.bf16 %v284_v29, %v283_v28  ;;  %v287_v9 = vmul.f32 0.5, %v1271_v6 }
  0x19   : > { %574 = vmatpush.bf16.msra.mxu0 %v1249_v12  ;;  %1343 = vmatpush.bf16.msra.mxu3 %v1249_v12  ;;  %v285_v51 = vmul.f32 0.5, %v1267_v48  ;;  %v286_v52 = vmul.f32 0.5, %v1268_v49  ;;  %v349_v54 = vmul.f32 1.5, %v1267_v48  ;;  %v350_v55 = vmul.f32 1.5, %v1268_v49 }
  0x1a   : > { %711 = vmatpush.bf16.msra.mxu1 %v1507_v13  ;;  %v443_v40 = vadd.f32 -0.375, %v411_v35  ;;  %v444_v41 = vadd.f32 -0.375, %v412_v36  ;;  %v1590_v60 = vmul.f32 0.5, %v1315_v56  ;;  %v1594_v61 = vmul.f32 0.5, %v1316_v57  ;;  %v1623_v35 = vld [vmem:[%s1496_s7 + $0x78] sm:$0xff]  }
  0x1b   : > { %880 = vmatpush.bf16.msra.mxu2 %v1512_v14  ;;  %v413_v58 = vmul.f32 %v349_v54, %v285_v51  ;;  %v414_v59 = vmul.f32 %v350_v55, %v286_v52  ;;  %v351_v12 = vmul.f32 1.5, %v1271_v6  ;;  %v1611_v19 = vmul.f32 0.5, %v1319_v15 }
  0x1c   : > { %v797_v47 = vpack.c.bf16 %v444_v41, %v443_v40  ;;  %v504_v3 = vpack.c.bf16 %v1594_v61, %v1590_v60 }
  0x1d   : > { %575 = vmatpush.bf16.msra.mxu0 %v1248_v20  ;;  %1344 = vmatpush.bf16.msra.mxu3 %v1248_v20  ;;  %v445_v62 = vadd.f32 -0.375, %v413_v58  ;;  %v446_v63 = vadd.f32 -0.375, %v414_v59  ;;  %v415_v17 = vmul.f32 %v351_v12, %v287_v9  ;;  %v1615_v20 = vmul.f32 0.5, %v1320_v16 }
  0x1e   : > { %712 = vmatpush.bf16.msra.mxu1 %v1527_v25 }
  0x1f   : > { %881 = vmatpush.bf16.msra.mxu2 %v1532_v26  ;;  %v447_v21 = vadd.f32 -0.375, %v415_v17  ;;  %v505_v28 = vpack.c.bf16 %v1615_v20, %v1611_v19 }
  0x21   : > { %576 = vmatpush.bf16.msra.mxu0 %v1247_v27  ;;  %1345 = vmatpush.bf16.msra.mxu3 %v1247_v27 }
  0x22   : > { %713 = vmatpush.bf16.msra.mxu1 %v1542_v32 }
  0x23   : > { %882 = vmatpush.bf16.msra.mxu2 %v1547_v33 }
  0x25   : > { %577 = vmatpush.bf16.msra.mxu0 %v1246_v34  ;;  %1346 = vmatpush.bf16.msra.mxu3 %v1246_v34 }
  0x26   : > { %714 = vmatpush.bf16.msra.mxu1 %v1557_v37 }
  0x27   : > { %883 = vmatpush.bf16.msra.mxu2 %v1562_v38 }
  0x29   : > { %578 = vmatpush.bf16.msra.mxu0 %v1245_v39  ;;  %1347 = vmatpush.bf16.msra.mxu3 %v1245_v39  ;;  %v1323_v39 = vunpack.c.l.bf16 %v1623_v35 }
  0x2a   : > { %715 = vmatpush.bf16.msra.mxu1 %v1237_v42 }
  0x2b   : > { %884 = vmatpush.bf16.msra.mxu2 %v1575_v43 }
  0x2c   : > { %579 = vmatmul.bf16.vlgmr.msra.gmra.mxu0 %v491_v45  ;;  %639 = vmatmul.bf16.vlgmr.msra.gmra.mxu3 %v503_v46 }
  0x2d   : > { %1348 = vmatpush.bf16.msrb.mxu3 %v1453_v1  ;;  %716 = vmatmul.bf16.vlgmr.msra.gmra.mxu1 %v1413_v50  ;;  %v492_v1 = vpack.c.bf16 %v286_v52, %v285_v51 }
  0x2e   : > { %885 = vmatmul.bf16.vlgmr.msra.gmra.mxu2 %v797_v47  ;;  %v1328_v47 = vld [vmem:[%s1496_s7 + $0x20] sm:$0xff]  }
  0x2f   : > { %v1279_v51 = vunpack.c.l.bf16 %v1328_v47 }
  0x31   : > { %1349 = vmatpush.bf16.msrb.mxu3 %v1468_v4  ;;  %v798_v4 = vpack.c.bf16 %v446_v63, %v445_v62  ;;  %v291_v52 = vmul.f32 0.5, %v1279_v51  ;;  %v355_v55 = vmul.f32 1.5, %v1279_v51 }
  0x35   : > { %1350 = vmatpush.bf16.msrb.mxu3 %v1486_v7  ;;  %v1272_v7 = vunpack.c.h.bf16 %v1326_v0  ;;  %v1329_v0 = vld [vmem:[%s1496_s7 + $0x28] sm:$0xff]  }
  0x37   : > { %v288_v10 = vmul.f32 0.5, %v1272_v7 }
  0x39   : > { %1351 = vmatpush.bf16.msrb.mxu3 %v1507_v13  ;;  %v352_v13 = vmul.f32 1.5, %v1272_v7  ;;  %v493_v27 = vpack.c.bf16 %v288_v10, %v287_v9 }
  0x3b   : > { %v416_v18 = vmul.f32 %v352_v13, %v288_v10 }
  0x3c   : > { %584 = vmatmul.bf16.gmra.mxu0 %v492_v1  ;;  %644 = vmatmul.bf16.gmra.mxu3 %v504_v3  ;;  %v1283_v3 = vunpack.c.l.bf16 %v1329_v0 }
  0x3d   : > { %1352 = vmatpush.bf16.msrb.mxu3 %v1527_v25  ;;  %721 = vmatmul.bf16.gmra.mxu1 %v1413_v50  ;;  %v448_v22 = vadd.f32 -0.375, %v416_v18  ;;  %v1327_v25 = vld [vmem:[%s1496_s7 + $0x18] sm:$0xff]  }
  0x3e   : > { %890 = vmatmul.bf16.gmra.mxu2 %v798_v4  ;;  %v1275_v30 = vunpack.c.l.bf16 %v1327_v25  ;;  %v1276_v31 = vunpack.c.h.bf16 %v1327_v25  ;;  %v1284_v4 = vunpack.c.h.bf16 %v1329_v0  ;;  %v357_v7 = vmul.f32 1.5, %v1283_v3 }
  0x3f   : > { %v799_v29 = vpack.c.bf16 %v448_v22, %v447_v21 }
  0x40   : > { %v290_v34 = vmul.f32 0.5, %v1276_v31  ;;  %v353_v36 = vmul.f32 1.5, %v1275_v30  ;;  %v294_v6 = vmul.f32 0.5, %v1284_v4 }
  0x41   : > { %1353 = vmatpush.bf16.msrb.mxu3 %v1542_v32  ;;  %v289_v32 = vmul.f32 0.5, %v1275_v30 }
  0x43   : > { %v417_v40 = vmul.f32 %v353_v36, %v289_v32  ;;  %v1331_v36 = vld [vmem:[%s1496_s7 + $0x38] sm:$0xff]  }
  0x45   : > { %1354 = vmatpush.bf16.msrb.mxu3 %v1557_v37  ;;  %v354_v37 = vmul.f32 1.5, %v1276_v31  ;;  %v449_v45 = vadd.f32 -0.375, %v417_v40  ;;  %v468_v40 = vadd.f32 -0.375, %v1520_v24 }
  0x47   : > { %v418_v41 = vmul.f32 %v354_v37, %v290_v34  ;;  %v467_v37 = vadd.f32 -0.375, %v1518_v23 }
  0x49   : > { %1355 = vmatpush.bf16.msrb.mxu3 %v1237_v42  ;;  %v1631_v42 = vmul.f32 0.5, %v1323_v39  ;;  %v450_v46 = vadd.f32 -0.375, %v418_v41 }
  0x4b   : > { %v800_v49 = vpack.c.bf16 %v450_v46, %v449_v45  ;;  %v1291_v46 = vunpack.c.l.bf16 %v1331_v36 }
  0x4c   : > { %589 = vmatmul.bf16.gmra.mxu0 %v493_v27  ;;  %649 = vmatmul.bf16.gmra.mxu3 %v505_v28 }
  0x4d   : > { %1356 = vmatpush.bf16.msra.mxu3 %v1458_v2  ;;  %726 = vmatmul.bf16.gmra.mxu1 %v1413_v50  ;;  %v1324_v2 = vunpack.c.h.bf16 %v1623_v35  ;;  %v361_v51 = vmul.f32 1.5, %v1291_v46 }
  0x4e   : > { %895 = vmatmul.bf16.gmra.mxu2 %v799_v29 }
  0x4f   : > { %v1635_v44 = vmul.f32 0.5, %v1324_v2 }
  0x51   : > { %1357 = vmatpush.bf16.msra.mxu3 %v1473_v5  ;;  %v494_v5 = vpack.c.bf16 %v290_v34, %v289_v32  ;;  %v506_v48 = vpack.c.bf16 %v1635_v44, %v1631_v42 }
  0x55   : > { %1358 = vmatpush.bf16.msra.mxu3 %v1491_v8  ;;  %v1280_v8 = vunpack.c.h.bf16 %v1328_v47  ;;  %v1292_v47 = vunpack.c.h.bf16 %v1331_v36 }
  0x57   : > { %v292_v54 = vmul.f32 0.5, %v1280_v8  ;;  %v356_v58 = vmul.f32 1.5, %v1280_v8  ;;  %v362_v8 = vmul.f32 1.5, %v1292_v47 }
  0x59   : > { %1359 = vmatpush.bf16.msra.mxu3 %v1512_v14  ;;  %v419_v14 = vmul.f32 %v355_v55, %v291_v52  ;;  %v420_v59 = vmul.f32 %v356_v58, %v292_v54  ;;  %v1332_v55 = vld [vmem:[%s1496_s7 + $0x40] sm:$0xff]  }
  0x5b   : > { %v451_v62 = vadd.f32 -0.375, %v419_v14  ;;  %v452_v63 = vadd.f32 -0.375, %v420_v59  ;;  %v1295_v59 = vunpack.c.l.bf16 %v1332_v55 }
  0x5c   : > { %594 = vmatmul.bf16.gmra.mxu0 %v494_v5  ;;  %654 = vmatmul.bf16.gmra.mxu3 %v506_v48  ;;  %v809_v5 = vpack.c.bf16 %v468_v40, %v467_v37  ;;  %v297_v48 = vmul.f32 0.5, %v1291_v46  ;;  %v1334_v46 = vld [vmem:[%s1496_s7 + $0x50] sm:$0xff]  }
  0x5d   : > { %1360 = vmatpush.bf16.msra.mxu3 %v1532_v26  ;;  %731 = vmatmul.bf16.gmra.mxu1 %v1413_v50  ;;  %v495_v26 = vpack.c.bf16 %v292_v54, %v291_v52  ;;  %v801_v1 = vpack.c.bf16 %v452_v63, %v451_v62  ;;  %v1296_v62 = vunpack.c.h.bf16 %v1332_v55  ;;  %v299_v63 = vmul.f32 0.5, %v1295_v59 }
  0x5e   : > { %900 = vmatmul.bf16.gmra.mxu2 %v800_v49  ;;  %v298_v49 = vmul.f32 0.5, %v1292_v47  ;;  %v425_v52 = vmul.f32 %v361_v51, %v297_v48  ;;  %v1303_v51 = vunpack.c.l.bf16 %v1334_v46  ;;  %v375_v55 = vmul.f32 1.5, %v1319_v15 }
  0x5f   : > { %v300_v0 = vmul.f32 0.5, %v1296_v62 }
  0x60   : > { %v426_v23 = vmul.f32 %v362_v8, %v298_v49  ;;  %v457_v54 = vadd.f32 -0.375, %v425_v52  ;;  %v498_v58 = vpack.c.bf16 %v298_v49, %v297_v48 }
  0x61   : > { %1361 = vmatpush.bf16.msra.mxu3 %v1547_v33  ;;  %v293_v33 = vmul.f32 0.5, %v1283_v3 }
  0x62   : > { %v458_v24 = vadd.f32 -0.375, %v426_v23  ;;  %v1304_v23 = vunpack.c.h.bf16 %v1334_v46 }
  0x63   : > { %v421_v9 = vmul.f32 %v357_v7, %v293_v33  ;;  %v496_v17 = vpack.c.bf16 %v294_v6, %v293_v33  ;;  %v1333_v7 = vld [vmem:[%s1496_s7 + $0x48] sm:$0xff]  }
  0x64   : > { %v804_v14 = vpack.c.bf16 %v458_v24, %v457_v54  ;;  %v303_v24 = vmul.f32 0.5, %v1303_v51 }
  0x65   : > { %1362 = vmatpush.bf16.msra.mxu3 %v1562_v38  ;;  %v358_v38 = vmul.f32 1.5, %v1284_v4  ;;  %v453_v12 = vadd.f32 -0.375, %v421_v9  ;;  %v1299_v9 = vunpack.c.l.bf16 %v1333_v7 }
  0x67   : > { %v422_v10 = vmul.f32 %v358_v38, %v294_v6  ;;  %v499_v38 = vpack.c.bf16 %v300_v0, %v299_v63 }
  0x69   : > { %1363 = vmatpush.bf16.msra.mxu3 %v1575_v43  ;;  %v454_v13 = vadd.f32 -0.375, %v422_v10  ;;  %v1330_v43 = vld [vmem:[%s1496_s7 + $0x30] sm:$0xff]  }
  0x6a   : > { %v1287_v21 = vunpack.c.l.bf16 %v1330_v43  ;;  %v1288_v22 = vunpack.c.h.bf16 %v1330_v43 }
  0x6b   : > { %v802_v18 = vpack.c.bf16 %v454_v13, %v453_v12  ;;  %v1300_v13 = vunpack.c.h.bf16 %v1333_v7 }
  0x6c   : > { %599 = vmatmul.bf16.gmra.mxu0 %v495_v26  ;;  %776 = vmatmul.bf16.vlgmr.msrb.gmra.mxu3 %v1413_v50  ;;  %v295_v25 = vmul.f32 0.5, %v1287_v21  ;;  %v296_v27 = vmul.f32 0.5, %v1288_v22  ;;  %v359_v28 = vmul.f32 1.5, %v1287_v21  ;;  %v360_v29 = vmul.f32 1.5, %v1288_v22 }
  0x6d   : > { %736 = vmatmul.bf16.gmra.mxu1 %v1413_v50  ;;  %v363_v26 = vmul.f32 1.5, %v1295_v59  ;;  %v374_v21 = vmul.f32 1.5, %v1316_v57  ;;  %v304_v59 = vmul.f32 0.5, %v1304_v23 }
  0x6e   : > { %905 = vmatmul.bf16.gmra.mxu2 %v801_v1  ;;  %v423_v30 = vmul.f32 %v359_v28, %v295_v25  ;;  %v424_v31 = vmul.f32 %v360_v29, %v296_v27  ;;  %v497_v41 = vpack.c.bf16 %v296_v27, %v295_v25  ;;  %v364_v1 = vmul.f32 1.5, %v1296_v62 }
  0x6f   : > { %v427_v3 = vmul.f32 %v363_v26, %v299_v63  ;;  %v302_v25 = vmul.f32 0.5, %v1300_v13  ;;  %v365_v27 = vmul.f32 1.5, %v1299_v9  ;;  %v366_v28 = vmul.f32 1.5, %v1300_v13 }
  0x70   : > { %v455_v32 = vadd.f32 -0.375, %v423_v30  ;;  %v456_v34 = vadd.f32 -0.375, %v424_v31  ;;  %v428_v4 = vmul.f32 %v364_v1, %v300_v0  ;;  %v438_v57 = vmul.f32 %v374_v21, %v1594_v61 }
  0x71   : > { %v459_v33 = vadd.f32 -0.375, %v427_v3  ;;  %v367_v62 = vmul.f32 1.5, %v1303_v51  ;;  %v368_v63 = vmul.f32 1.5, %v1304_v23  ;;  %v439_v1 = vmul.f32 %v375_v55, %v1611_v19 }
  0x72   : > { %v803_v45 = vpack.c.bf16 %v456_v34, %v455_v32  ;;  %v460_v6 = vadd.f32 -0.375, %v428_v4  ;;  %v430_v34 = vmul.f32 %v366_v28, %v302_v25  ;;  %v470_v40 = vadd.f32 -0.375, %v438_v57 }
  0x73   : > { %v431_v11 = vmul.f32 %v367_v62, %v303_v24 }
  0x74   : > { %v805_v12 = vpack.c.bf16 %v460_v6, %v459_v33  ;;  %v471_v6 = vadd.f32 -0.375, %v439_v1 }
  0x7c   : > { %604 = vmatmul.bf16.gmra.mxu0 %v496_v17  ;;  %781 = vmatmul.bf16.gmra.mxu3 %v1413_v50  ;;  %v301_v17 = vmul.f32 0.5, %v1299_v9 }
  0x7d   : > { %741 = vmatmul.bf16.gmra.mxu1 %v1413_v50 }
  0x7e   : > { %910 = vmatmul.bf16.gmra.mxu2 %v802_v18  ;;  %v373_v18 = vmul.f32 1.5, %v1315_v56  ;;  %v429_v32 = vmul.f32 %v365_v27, %v301_v17  ;;  %v500_v49 = vpack.c.bf16 %v302_v25, %v301_v17  ;;  %v501_v17 = vpack.c.bf16 %v304_v59, %v303_v24 }
  0x80   : > { %v437_v53 = vmul.f32 %v373_v18, %v1590_v60 }
  0x82   : > { %v469_v37 = vadd.f32 -0.375, %v437_v53  ;;  %v378_v53 = vmul.f32 1.5, %v1324_v2 }
  0x84   : > { %v810_v60 = vpack.c.bf16 %v470_v40, %v469_v37  ;;  %v442_v40 = vmul.f32 %v378_v53, %v1635_v44 }
  0x8c   : > { %609 = vmatmul.bf16.gmra.mxu0 %v497_v41  ;;  %786 = vmatmul.bf16.gmra.mxu3 %v1413_v50  ;;  %v461_v41 = vadd.f32 -0.375, %v429_v32 }
  0x8d   : > { %746 = vmatmul.bf16.gmra.mxu1 %v1413_v50 }
  0x8e   : > { %915 = vmatmul.bf16.gmra.mxu2 %v803_v45  ;;  %v462_v45 = vadd.f32 -0.375, %v430_v34 }
  0x90   : > { %v806_v52 = vpack.c.bf16 %v462_v45, %v461_v41 }
  0x9c   : > { %614 = vmatmul.bf16.gmra.mxu0 %v498_v58  ;;  %791 = vmatmul.bf16.gmra.mxu3 %v1413_v50  ;;  %v376_v58 = vmul.f32 1.5, %v1320_v16  ;;  %v432_v16 = vmul.f32 %v368_v63, %v304_v59 }
  0x9d   : > { %751 = vmatmul.bf16.gmra.mxu1 %v1413_v50 }
  0x9e   : > { %920 = vmatmul.bf16.gmra.mxu2 %v804_v14  ;;  %v440_v3 = vmul.f32 %v376_v58, %v1615_v20  ;;  %v464_v9 = vadd.f32 -0.375, %v432_v16 }
  0xa0   : > { %v472_v7 = vadd.f32 -0.375, %v440_v3 }
  0xa2   : > { %v811_v19 = vpack.c.bf16 %v472_v7, %v471_v6 }
  0xa9   : > { %v580_v10 = vpop.f32.mrf.mxu0 }
  0xaa   : > { %v717_v43 = vpop.f32.mrf.mxu1 }
  0xab   : > { %v718_v22 = vadd.f32 %v717_v43, %v580_v10  ;;  %v1335_v10 = vld [vmem:[%s1496_s7 + $0x58] sm:$0xff]  }
  0xac   : > { %619 = vmatmul.bf16.gmra.mxu0 %v499_v38  ;;  %945 = vmatmul.bf16.vlgmr.msra.gmra.mxu3 %v809_v5  ;;  %v463_v38 = vadd.f32 -0.375, %v431_v11  ;;  %v1307_v18 = vunpack.c.l.bf16 %v1335_v10  ;;  %v1308_v25 = vunpack.c.h.bf16 %v1335_v10 }
  0xad   : > { %756 = vmatmul.bf16.gmra.mxu1 %v1413_v50 }
  0xae   : > { %925 = vmatmul.bf16.gmra.mxu2 %v805_v12  ;;  %v305_v28 = vmul.f32 0.5, %v1307_v18  ;;  %v370_v32 = vmul.f32 1.5, %v1308_v25 }
  0xaf   : > { %v1667_v29 = vpop.f32.mrf.mxu3 }
  0xb1   : > { %v886_v56 = vpop.f32.mrf.mxu2  ;;  %v582_v31 = vpop.f32.mrf.mxu0 }
  0xb2   : > { %v966_v30 = vadd.f32 %v886_v56, %v718_v22  ;;  %v719_v36 = vpop.f32.mrf.mxu1  ;;  %v807_v22 = vpack.c.bf16 %v464_v9, %v463_v38  ;;  %v377_v56 = vmul.f32 1.5, %v1323_v39 }
  0xb3   : > { %v720_v47 = vadd.f32 %v719_v36, %v582_v31  ;;  %v369_v31 = vmul.f32 1.5, %v1307_v18 }
  0xb4   : > { %998 = vst [vmem:[%s1672_s22] sm:$0xff] %v966_v30  ;;  %v306_v30 = vmul.f32 0.5, %v1308_v25  ;;  %v441_v37 = vmul.f32 %v377_v56, %v1631_v42 }
  0xb5   : > { %v433_v45 = vmul.f32 %v369_v31, %v305_v28 }
  0xb6   : > { %v434_v35 = vmul.f32 %v370_v32, %v306_v30  ;;  %v473_v46 = vadd.f32 -0.375, %v441_v37 }
  0xb7   : > { %v1678_v5 = vpop.f32.mrf.mxu3 }
  0xb9   : > { %v888_v48 = vpop.f32.mrf.mxu2  ;;  %v585_v8 = vpop.f32.mrf.mxu0 }
  0xba   : > { %v967_v61 = vadd.f32 %v888_v48, %v720_v47  ;;  %v722_v54 = vpop.f32.mrf.mxu1  ;;  %v474_v47 = vadd.f32 -0.375, %v442_v40  ;;  %v465_v48 = vadd.f32 -0.375, %v433_v45 }
  0xbb   : > { %v723_v14 = vadd.f32 %v722_v54, %v585_v8  ;;  %v502_v8 = vpack.c.bf16 %v306_v30, %v305_v28 }
  0xbc   : > { %999 = vst [vmem:[%s1672_s22 + $0x8] sm:$0xff] %v967_v61  ;;  %624 = vmatmul.bf16.gmra.mxu0 %v500_v49  ;;  %950 = vmatmul.bf16.gmra.mxu3 %v810_v60  ;;  %v466_v49 = vadd.f32 -0.375, %v434_v35 }
  0xbd   : > { %761 = vmatmul.bf16.gmra.mxu1 %v1413_v50 }
  0xbe   : > { %930 = vmatmul.bf16.gmra.mxu2 %v806_v52  ;;  %v812_v52 = vpack.c.bf16 %v474_v47, %v473_v46  ;;  %v808_v23 = vpack.c.bf16 %v466_v49, %v465_v48 }
  0xbf   : > { %v1686_v0 = vpop.f32.mrf.mxu3 }
  0xc1   : > { %v891_v26 = vpop.f32.mrf.mxu2  ;;  %v587_v4 = vpop.f32.mrf.mxu0 }
  0xc2   : > { %v968_v15 = vadd.f32 %v891_v26, %v723_v14  ;;  %v724_v33 = vpop.f32.mrf.mxu1 }
  0xc3   : > { %v725_v12 = vadd.f32 %v724_v33, %v587_v4 }
  0xc4   : > { %1000 = vst [vmem:[%s1672_s22 + $0x10] sm:$0xff] %v968_v15 }
  0xc7   : > { %v1692_v13 = vpop.f32.mrf.mxu3 }
  0xc9   : > { %v893_v43 = vpop.f32.mrf.mxu2  ;;  %v590_v21 = vpop.f32.mrf.mxu0 }
  0xca   : > { %v969_v20 = vadd.f32 %v893_v43, %v725_v12  ;;  %v727_v27 = vpop.f32.mrf.mxu1 }
  0xcb   : > { %v728_v57 = vadd.f32 %v727_v27, %v590_v21 }
  0xcc   : > { %1001 = vst [vmem:[%s1672_s22 + $0x18] sm:$0xff] %v969_v20  ;;  %629 = vmatmul.bf16.gmra.mxu0 %v501_v17  ;;  %955 = vmatmul.bf16.gmra.mxu3 %v811_v19 }
  0xcd   : > { %766 = vmatmul.bf16.gmra.mxu1 %v1413_v50 }
  0xce   : > { %935 = vmatmul.bf16.gmra.mxu2 %v807_v22 }
  0xcf   : > { %v1700_v34 = vpop.f32.mrf.mxu3 }
  0xd1   : > { %v896_v36 = vpop.f32.mrf.mxu2  ;;  %v592_v39 = vpop.f32.mrf.mxu0 }
  0xd2   : > { %v970_v41 = vadd.f32 %v896_v36, %v728_v57  ;;  %v729_v2 = vpop.f32.mrf.mxu1 }
  0xd3   : > { %v730_v60 = vadd.f32 %v729_v2, %v592_v39 }
  0xd4   : > { %1002 = vst [vmem:[%s1672_s22 + $0x20] sm:$0xff] %v970_v41 }
  0xd7   : > { %v1705_v51 = vpop.f32.mrf.mxu3 }
  0xd9   : > { %v898_v61 = vpop.f32.mrf.mxu2  ;;  %v595_v44 = vpop.f32.mrf.mxu0 }
  0xda   : > { %v971_v42 = vadd.f32 %v898_v61, %v730_v60  ;;  %v732_v54 = vpop.f32.mrf.mxu1 }
  0xdb   : > { %v733_v24 = vadd.f32 %v732_v54, %v595_v44 }
  0xdc   : > { %1003 = vst [vmem:[%s1672_s22 + $0x28] sm:$0xff] %v971_v42  ;;  %634 = vmatmul.bf16.gmra.mxu0 %v502_v8  ;;  %960 = vmatmul.bf16.gmra.mxu3 %v812_v52 }
  0xdd   : > { %771 = vmatmul.bf16.gmra.mxu1 %v1413_v50 }
  0xde   : > { %940 = vmatmul.bf16.gmra.mxu2 %v808_v23 }
  0xdf   : > { %v1709_v55 = vpop.f32.mrf.mxu3 }
  0xe1   : > { %v901_v58 = vpop.f32.mrf.mxu2  ;;  %v597_v59 = vpop.f32.mrf.mxu0 }
  0xe2   : > { %v972_v14 = vadd.f32 %v901_v58, %v733_v24  ;;  %v734_v62 = vpop.f32.mrf.mxu1 }
  0xe3   : > { %v735_v63 = vadd.f32 %v734_v62, %v597_v59 }
  0xe4   : > { %1004 = vst [vmem:[%s1672_s22 + $0x30] sm:$0xff] %v972_v14 }
  0xe7   : > { %v1712_v26 = vpop.f32.mrf.mxu3 }
  0xe9   : > { %v903_v1 = vpop.f32.mrf.mxu2  ;;  %v600_v15 = vpop.f32.mrf.mxu0 }
  0xea   : > { %v973_v3 = vadd.f32 %v903_v1, %v735_v63  ;;  %v737_v4 = vpop.f32.mrf.mxu1 }
  0xeb   : > { %v738_v11 = vadd.f32 %v737_v4, %v600_v15 }
  0xec   : > { %1005 = vst [vmem:[%s1672_s22 + $0x38] sm:$0xff] %v973_v3 }
  0xef   : > { %v777_v50 = vpop.f32.mrf.mxu3 }
  0xf0   : > { %v778_v59 = vadd.f32 %v777_v50, %v1667_v29 }
  0xf1   : > { %v906_v16 = vpop.f32.mrf.mxu2  ;;  %v602_v6 = vpop.f32.mrf.mxu0 }
  0xf2   : > { %v974_v33 = vadd.f32 %v906_v16, %v738_v11  ;;  %v739_v7 = vpop.f32.mrf.mxu1 }
  0xf3   : > { %v740_v38 = vadd.f32 %v739_v7, %v602_v6 }
  0xf4   : > { %1006 = vst [vmem:[%s1672_s22 + $0x40] sm:$0xff] %v974_v33 }
  0xf7   : > { %v779_v9 = vpop.f32.mrf.mxu3 }
  0xf8   : > { %v780_v11 = vadd.f32 %v779_v9, %v1678_v5 }
  0xf9   : > { %v908_v10 = vpop.f32.mrf.mxu2  ;;  %v605_v43 = vpop.f32.mrf.mxu0 }
  0xfa   : > { %v975_v12 = vadd.f32 %v908_v10, %v740_v38  ;;  %v742_v17 = vpop.f32.mrf.mxu1 }
  0xfb   : > { %v743_v19 = vadd.f32 %v742_v17, %v605_v43 }
  0xfc   : > { %1007 = vst [vmem:[%s1672_s22 + $0x48] sm:$0xff] %v975_v12 }
  0xff   : > { %v782_v18 = vpop.f32.mrf.mxu3 }
 0x100   : > { %v783_v12 = vadd.f32 %v782_v18, %v1686_v0 }
 0x101   : > { %v911_v20 = vpop.f32.mrf.mxu2  ;;  %v607_v22 = vpop.f32.mrf.mxu0 }
 0x102   : > { %v976_v21 = vadd.f32 %v911_v20, %v743_v19  ;;  %v744_v25 = vpop.f32.mrf.mxu1 }
 0x103   : > { %v745_v27 = vadd.f32 %v744_v25, %v607_v22 }
 0x104   : > { %1008 = vst [vmem:[%s1672_s22 + $0x50] sm:$0xff] %v976_v21 }
 0x107   : > { %v1718_v28 = vpop.f32.mrf.mxu3 }
 0x108   : > { %v785_v21 = vadd.f32 %v1718_v28, %v1692_v13 }
 0x109   : > { %v913_v56 = vpop.f32.mrf.mxu2  ;;  %v610_v57 = vpop.f32.mrf.mxu0 }
 0x10a   : > { %v977_v53 = vadd.f32 %v913_v56, %v745_v27  ;;  %v747_v30 = vpop.f32.mrf.mxu1 }
 0x10b   : > { %v748_v31 = vadd.f32 %v747_v30, %v610_v57 }
 0x10c   : > { %1009 = vst [vmem:[%s1672_s22 + $0x58] sm:$0xff] %v977_v53 }
 0x10f   : > { %v1721_v32 = vpop.f32.mrf.mxu3 }
 0x110   : > { %v788_v30 = vadd.f32 %v1721_v32, %v1700_v34 }
 0x111   : > { %v916_v36 = vpop.f32.mrf.mxu2  ;;  %v612_v40 = vpop.f32.mrf.mxu0 }
 0x112   : > { %v978_v37 = vadd.f32 %v916_v36, %v748_v31  ;;  %v749_v41 = vpop.f32.mrf.mxu1 }
 0x113   : > { %v750_v39 = vadd.f32 %v749_v41, %v612_v40 }
 0x114   : > { %1010 = vst [vmem:[%s1672_s22 + $0x60] sm:$0xff] %v978_v37 }
 0x117   : > { %v1724_v45 = vpop.f32.mrf.mxu3 }
 0x118   : > { %v790_v41 = vadd.f32 %v1724_v45, %v1705_v51 }
 0x119   : > { %v918_v35 = vpop.f32.mrf.mxu2  ;;  %v615_v46 = vpop.f32.mrf.mxu0 }
 0x11a   : > { %v979_v2 = vadd.f32 %v918_v35, %v750_v39  ;;  %v752_v47 = vpop.f32.mrf.mxu1 }
 0x11b   : > { %v753_v48 = vadd.f32 %v752_v47, %v615_v46 }
 0x11c   : > { %1011 = vst [vmem:[%s1672_s22 + $0x68] sm:$0xff] %v979_v2 }
 0x11f   : > { %v1727_v49 = vpop.f32.mrf.mxu3 }
 0x121   : > { %v921_v60 = vpop.f32.mrf.mxu2  ;;  %v617_v8 = vpop.f32.mrf.mxu0 }
 0x122   : > { %v980_v61 = vadd.f32 %v921_v60, %v753_v48  ;;  %v754_v52 = vpop.f32.mrf.mxu1  ;;  %v793_v60 = vadd.f32 %v1727_v49, %v1709_v55 }
 0x123   : > { %v755_v42 = vadd.f32 %v754_v52, %v617_v8 }
 0x124   : > { %1012 = vst [vmem:[%s1672_s22 + $0x70] sm:$0xff] %v980_v61 }
 0x127   : > { %v1730_v44 = vpop.f32.mrf.mxu3 }
 0x129   : > { %v923_v23 = vpop.f32.mrf.mxu2  ;;  %v620_v24 = vpop.f32.mrf.mxu0 }
 0x12a   : > { %v981_v54 = vadd.f32 %v923_v23, %v755_v42  ;;  %v757_v58 = vpop.f32.mrf.mxu1  ;;  %v795_v23 = vadd.f32 %v1730_v44, %v1712_v26 }
 0x12b   : > { %v758_v14 = vadd.f32 %v757_v58, %v620_v24 }
 0x12c   : > { %1013 = vst [vmem:[%s1672_s22 + $0x78] sm:$0xff] %v981_v54 }
 0x12f   : > { %v946_v62 = vpop.f32.mrf.mxu3 }
 0x130   : > { %v990_v1 = vadd.f32 %v946_v62, %v778_v59 }
 0x131   : > { %v926_v63 = vpop.f32.mrf.mxu2  ;;  %v622_v15 = vpop.f32.mrf.mxu0 }
 0x132   : > { %v982_v3 = vadd.f32 %v926_v63, %v758_v14  ;;  %1022 = vst [vmem:[%s1672_s22 + $0xc0] sm:$0xff] %v990_v1  ;;  %v759_v4 = vpop.f32.mrf.mxu1 }
 0x133   : > { %v760_v16 = vadd.f32 %v759_v4, %v622_v15 }
 0x134   : > { %1014 = vst [vmem:[%s1672_s22 + $0x80] sm:$0xff] %v982_v3 }
 0x137   : > { %v948_v33 = vpop.f32.mrf.mxu3 }
 0x138   : > { %v991_v7 = vadd.f32 %v948_v33, %v780_v11 }
 0x139   : > { %v928_v6 = vpop.f32.mrf.mxu2  ;;  %v625_v29 = vpop.f32.mrf.mxu0 }
 0x13a   : > { %v983_v38 = vadd.f32 %v928_v6, %v760_v16  ;;  %1023 = vst [vmem:[%s1672_s22 + $0xc8] sm:$0xff] %v991_v7  ;;  %v762_v50 = vpop.f32.mrf.mxu1 }
 0x13b   : > { %v763_v10 = vadd.f32 %v762_v50, %v625_v29 }
 0x13c   : > { %1015 = vst [vmem:[%s1672_s22 + $0x88] sm:$0xff] %v983_v38 }
 0x13f   : > { %v951_v43 = vpop.f32.mrf.mxu3 }
 0x140   : > { %v992_v19 = vadd.f32 %v951_v43, %v783_v12 }
 0x141   : > { %v931_v17 = vpop.f32.mrf.mxu2  ;;  %v627_v9 = vpop.f32.mrf.mxu0 }
 0x142   : > { %v984_v5 = vadd.f32 %v931_v17, %v763_v10  ;;  %1024 = vst [vmem:[%s1672_s22 + $0xd0] sm:$0xff] %v992_v19  ;;  %v764_v20 = vpop.f32.mrf.mxu1 }
 0x143   : > { %v765_v22 = vadd.f32 %v764_v20, %v627_v9 }
 0x144   : > { %1016 = vst [vmem:[%s1672_s22 + $0x90] sm:$0xff] %v984_v5 }
 0x147   : > { %v953_v25 = vpop.f32.mrf.mxu3 }
 0x148   : > { %v993_v56 = vadd.f32 %v953_v25, %v785_v21 }
 0x149   : > { %v933_v27 = vpop.f32.mrf.mxu2  ;;  %v630_v18 = vpop.f32.mrf.mxu0 }
 0x14a   : > { %v985_v0 = vadd.f32 %v933_v27, %v765_v22  ;;  %1025 = vst [vmem:[%s1672_s22 + $0xd8] sm:$0xff] %v993_v56  ;;  %v767_v53 = vpop.f32.mrf.mxu1 }
 0x14b   : > { %v768_v57 = vadd.f32 %v767_v53, %v630_v18 }
 0x14c   : > { %1017 = vst [vmem:[%s1672_s22 + $0x98] sm:$0xff] %v985_v0 }
 0x14f   : > { %v956_v31 = vpop.f32.mrf.mxu3 }
 0x150   : > { %v994_v13 = vadd.f32 %v956_v31, %v788_v30 }
 0x151   : > { %v936_v36 = vpop.f32.mrf.mxu2  ;;  %v632_v37 = vpop.f32.mrf.mxu0 }
 0x152   : > { %v986_v28 = vadd.f32 %v936_v36, %v768_v57  ;;  %1026 = vst [vmem:[%s1672_s22 + $0xe0] sm:$0xff] %v994_v13  ;;  %v769_v40 = vpop.f32.mrf.mxu1 }
 0x153   : > { %v770_v39 = vadd.f32 %v769_v40, %v632_v37 }
 0x154   : > { %1018 = vst [vmem:[%s1672_s22 + $0xa0] sm:$0xff] %v986_v28 }
 0x157   : > { %v958_v35 = vpop.f32.mrf.mxu3 }
 0x158   : > { %v995_v46 = vadd.f32 %v958_v35, %v790_v41 }
 0x159   : > { %v938_v2 = vpop.f32.mrf.mxu2  ;;  %v635_v34 = vpop.f32.mrf.mxu0 }
 0x15a   : > { %v987_v47 = vadd.f32 %v938_v2, %v770_v39  ;;  %1027 = vst [vmem:[%s1672_s22 + $0xe8] sm:$0xff] %v995_v46  ;;  %v772_v32 = vpop.f32.mrf.mxu1 }
 0x15b   : > { %v773_v48 = vadd.f32 %v772_v32, %v635_v34 }
 0x15c   : > { %1019 = vst [vmem:[%s1672_s22 + $0xa8] sm:$0xff] %v987_v47 }
 0x15f   : > { %v961_v61 = vpop.f32.mrf.mxu3 }
 0x160   : > { %v996_v51 = vadd.f32 %v961_v61, %v793_v60 }
 0x161   : > { %v941_v8 = vpop.f32.mrf.mxu2  ;;  %v637_v52 = vpop.f32.mrf.mxu0 }
 0x162   : > { %v988_v45 = vadd.f32 %v941_v8, %v773_v48  ;;  %1028 = vst [vmem:[%s1672_s22 + $0xf0] sm:$0xff] %v996_v51  ;;  %v774_v42 = vpop.f32.mrf.mxu1 }
 0x163   : > { %v775_v54 = vadd.f32 %v774_v42, %v637_v52 }
 0x164   : > { %1020 = vst [vmem:[%s1672_s22 + $0xb0] sm:$0xff] %v988_v45 }
 0x167   : > { %v963_v24 = vpop.f32.mrf.mxu3 }
 0x168   : > { %v997_v14 = vadd.f32 %v963_v24, %v795_v23 }
 0x169   : > { %v943_v58 = vpop.f32.mrf.mxu2 }
 0x16a   : > { %v989_v59 = vadd.f32 %v943_v58, %v775_v54  ;;  %1029 = vst [vmem:[%s1672_s22 + $0xf8] sm:$0xff] %v997_v14 }
 0x16c   : > { %1021 = vst [vmem:[%s1672_s22 + $0xb8] sm:$0xff] %v989_v59 }
 0x16d PF: > { %s12_s11 = sadd.s32 1, %s1411_s11   ;;  %s1774_s9 = smov %s1407_s10 }
 0x16e   : > { %p9_p5 = scmp.ge.s32.totalorder %s12_s11, 4   ;;  %s1775_s10 = smov %s1777_s12 }
 0x170   :  { %11 = sbr.rel (!%p9_p5) target bundleno = 2 (0x2), region = 61 }

</bundles_post_ra>
